<compile_context>
chip_gen: v5e
topology: v5e:2x2
jax: 0.10.0
libtpu: 0.0.40
codegen_flags: <defaults>
</compile_context>

<pallas_src>
import jax
import jax.numpy as jnp
from jax import lax
from jax.experimental import pallas as pl
from jax.experimental.pallas import tpu as pltpu

EMB_DIM = 128      # groups=128 forces emb_dim == 128
KSIZE = 7
PAD = KSIZE // 2   # 3
LANE = 128


def dwconv_kernel(x_ref, xl_ref, xr_ref, wd_ref, wp_ref, bp_ref, o_ref):
    # x_ref : (nb, C, TL)  f32   main tile (C on sublanes, L on lanes)
    # xl_ref: (nb, C, 128) f32   128-block just left of the tile (clamped)
    # xr_ref: (nb, C, 128) f32   128-block just right of the tile (clamped)
    # wd_ref: (C, 7)       f32   depthwise weights (channel, tap)
    # wp_ref: (C, C)       bf16  pointwise weight (out_ch, in_ch)
    # bp_ref: (C, 1)       f32   fused bias  (bp + Wp @ bd)
    # o_ref : (nb, C, TL)  f32   output tile
    nb, C, TL = x_ref.shape
    j = pl.program_id(1)
    is_first = j == 0
    is_last = j == pl.num_programs(1) - 1

    # Loop-invariant weights, hoisted once per grid step.
    w_taps = [wd_ref[:, k:k + 1] for k in range(KSIZE)]     # each (C, 1) f32
    wp = wp_ref[...]                                        # (C, C) bf16
    bp = bp_ref[...]                                        # (C, 1) f32

    def body(b, carry):
        x = x_ref[b].astype(jnp.float32)                    # (C, TL)

        # --- depthwise k=7 on the interior: rolls ride the XLU, f32 on VPU ---
        acc = x * w_taps[PAD]
        for d in range(-PAD, PAD + 1):
            if d == 0:
                continue
            acc = acc + pltpu.roll(x, shift=(-d) % TL, axis=1) * w_taps[PAD + d]

        # --- pointwise 1x1: weight-stationary bf16 MXU matmul, f32 acc,
        #     written straight to the output block (no packing scratch) ---
        y = jnp.dot(wp, acc.astype(jnp.bfloat16),
                    preferred_element_type=jnp.float32) + bp
        o_ref[b] = y.astype(o_ref.dtype)

        # --- exact fix of the 3 wrapped columns at each end using the halo
        #     blocks (zeroed at the global sequence edges) ---
        left3 = xl_ref[b][:, LANE - PAD:].astype(jnp.float32)     # (C, 3)
        right3 = xr_ref[b][:, :PAD].astype(jnp.float32)           # (C, 3)
        left3 = jnp.where(is_first, 0.0, left3)
        right3 = jnp.where(is_last, 0.0, right3)

        strip_l = jnp.concatenate([left3, x[:, :2 * PAD]], axis=1)        # (C, 9)
        strip_r = jnp.concatenate([x[:, TL - 2 * PAD:], right3], axis=1)  # (C, 9)
        acc_l = strip_l[:, 0:PAD] * w_taps[0]
        acc_r = strip_r[:, 0:PAD] * w_taps[0]
        for k in range(1, KSIZE):
            acc_l = acc_l + strip_l[:, k:k + PAD] * w_taps[k]
            acc_r = acc_r + strip_r[:, k:k + PAD] * w_taps[k]
        edge = jnp.concatenate([acc_l, acc_r], axis=1)                    # (C, 6)
        y_edge = jnp.dot(wp, edge.astype(jnp.bfloat16),
                         preferred_element_type=jnp.float32) + bp
        o_ref[b, :, 0:PAD] = y_edge[:, 0:PAD].astype(o_ref.dtype)
        o_ref[b, :, TL - PAD:TL] = y_edge[:, PAD:].astype(o_ref.dtype)
        return carry

    # fori_loop (not a Python for) bounds live ranges across batch elements.
    lax.fori_loop(0, nb, body, 0, unroll=True)


def _divisors_desc(n):
    return [d for d in range(n, 0, -1) if n % d == 0]


def _pick_tiles(N, Lp, C=EMB_DIM, itemsize=4, target_bytes=2 * 1024 * 1024):
    """Pick (nb, tl) so one input block is ~target_bytes and the grid is >= 2."""
    # Largest multiple-of-128 divisor of Lp with C*tl*itemsize <= target.
    max_tl = max(LANE, target_bytes // (C * itemsize))
    tl = LANE
    t = LANE
    while t <= Lp and t <= max_tl:
        if Lp % t == 0:
            tl = t
        t += LANE
    # Largest divisor of N keeping the block under target.
    cap = max(1, target_bytes // (C * tl * itemsize))
    nb = 1
    for d in _divisors_desc(N):
        if d <= cap:
            nb = d
            break

    def steps(nb_):
        return (N // nb_) * (Lp // tl)

    # v7x megacore balance: prefer >= 2 (and even) total grid steps, shrinking
    # the batch tile at most 2x to get there.
    if steps(nb) < 2 or steps(nb) % 2:
        for d in _divisors_desc(N):
            if d < nb and steps(d) >= 2 and steps(d) % 2 == 0 and d * 2 >= nb:
                nb = d
                break
    return nb, tl


def dwconv(x_ncl, wd, bd, wp, bp, *, block_bytes=2 * 1024 * 1024):
    """x_ncl: (N, C=128, L) f32. Returns (N, C, L), matching DWConv.forward."""
    N, C, L = x_ncl.shape
    assert C == EMB_DIM, "groups=128 depthwise conv requires emb_dim == 128"

    # Lane-dense layout: pad L up to a multiple of 128 (the zero pad coincides
    # with the conv's own zero padding for the kept columns).
    Lp = ((L + LANE - 1) // LANE) * LANE
    xp = x_ncl if Lp == L else jnp.pad(x_ncl, ((0, 0), (0, 0), (0, Lp - L)))

    nb, tl = _pick_tiles(N, Lp, C, 4, block_bytes)
    tpb = tl // LANE            # 128-blocks per L tile
    nlb = Lp // LANE            # total 128-blocks along L
    grid = (N // nb, Lp // tl)

    # One-time weight prep (channels on sublanes).  Fold the depthwise bias
    # into the pointwise bias (stays in f32 after the matmul):
    #   point(depth(x)) = Wp (Wd (*) x) + (Wp bd + bp)
    wd2 = wd[:, 0, :].astype(jnp.float32)                         # (C, 7)
    wp_f32 = wp[:, :, 0].astype(jnp.float32)                      # (Cout, Cin)
    bp_eff = (bp.astype(jnp.float32)
              + wp_f32 @ bd.astype(jnp.float32))[:, None]         # (C, 1)
    wp2 = wp_f32.astype(jnp.bfloat16)                             # MXU operand

    in_block = nb * C * tl * 4
    halo_block = 2 * nb * C * LANE * 4
    weight_bytes = C * KSIZE * 4 + C * C * 2 + C * 4
    # 2x double-buffered in + out blocks, halos, in-kernel f32 temps, slack.
    vmem_need = (4 * in_block + 2 * halo_block + weight_bytes
                 + 6 * C * tl * 4 + (4 << 20))
    vmem_limit = int(min(48 << 20, max(16 << 20, vmem_need)))

    flops = N * Lp * (2 * C * C + 2 * KSIZE * C)
    bytes_accessed = (2 * N * C * Lp * 4 + weight_bytes
                      + grid[0] * grid[1] * halo_block)

    out = pl.pallas_call(
        dwconv_kernel,
        out_shape=jax.ShapeDtypeStruct((N, C, Lp), x_ncl.dtype),
        grid_spec=pltpu.PrefetchScalarGridSpec(
            num_scalar_prefetch=0,
            grid=grid,
            in_specs=[
                pl.BlockSpec((nb, C, tl), lambda i, j: (i, 0, j)),
                # 128-wide halo blocks just left / right of the main tile
                # (clamped at the sequence edges; zeroed in-kernel there).
                pl.BlockSpec((nb, C, LANE),
                             lambda i, j: (i, 0, jnp.maximum(j * tpb - 1, 0))),
                pl.BlockSpec((nb, C, LANE),
                             lambda i, j: (i, 0, jnp.minimum((j + 1) * tpb,
                                                             nlb - 1))),
                # Constant-index specs: weights/bias stay resident in VMEM.
                pl.BlockSpec((C, KSIZE), lambda i, j: (0, 0)),
                pl.BlockSpec((C, C), lambda i, j: (0, 0)),
                pl.BlockSpec((C, 1), lambda i, j: (0, 0)),
            ],
            out_specs=pl.BlockSpec((nb, C, tl), lambda i, j: (i, 0, j)),
        ),
        compiler_params=pltpu.CompilerParams(
            dimension_semantics=("parallel", "parallel"),
            vmem_limit_bytes=vmem_limit),
        cost_estimate=pl.CostEstimate(
            flops=flops, transcendentals=0, bytes_accessed=bytes_accessed),
    )(xp, xp, xp, wd2, wp2, bp_eff)

    return out if Lp == L else out[:, :, :L]


def dwconv_reference(x_ncl, wd, bd, wp, bp):
    """Pure-JAX f32 reference using lax convs (PyTorch Conv1d semantics)."""
    a = lax.conv_general_dilated(
        x_ncl, wd, window_strides=(1,), padding=[(PAD, PAD)],
        dimension_numbers=("NCH", "OIH", "NCH"), feature_group_count=EMB_DIM)
    a = a + bd[None, :, None]
    b = lax.conv_general_dilated(
        a, wp, window_strides=(1,), padding=[(0, 0)],
        dimension_numbers=("NCH", "OIH", "NCH"))
    b = b + bp[None, :, None]
    return b


if __name__ == "__main__":
    key = jax.random.PRNGKey(0)
    k_x, k_wd, k_bd, k_wp, k_bp = jax.random.split(key, 5)

    N, C, L = 2, EMB_DIM, 16
    x = jax.random.normal(k_x, (N, C, L), dtype=jnp.float32)

    # Deterministic parameter init (uniform, roughly PyTorch-scale).
    fan_d = 1 * KSIZE
    wd = jax.random.uniform(k_wd, (128, 1, KSIZE), jnp.float32,
                            -1.0 / fan_d ** 0.5, 1.0 / fan_d ** 0.5)
    bd = jax.random.uniform(k_bd, (128,), jnp.float32,
                            -1.0 / fan_d ** 0.5, 1.0 / fan_d ** 0.5)
    fan_p = 128 * 1
    wp = jax.random.uniform(k_wp, (128, 128, 1), jnp.float32,
                            -1.0 / fan_p ** 0.5, 1.0 / fan_p ** 0.5)
    bp = jax.random.uniform(k_bp, (128,), jnp.float32,
                            -1.0 / fan_p ** 0.5, 1.0 / fan_p ** 0.5)

    # Case 1: tiny L (exercises the lane-padding path; single L tile).
    out = dwconv(x, wd, bd, wp, bp)
    jax.block_until_ready(out)
    ref = dwconv_reference(x, wd, bd, wp, bp)
    assert out.shape == (N, C, L)
    err1 = float(jnp.max(jnp.abs(out - ref)))
    # Pointwise matmul runs in bf16 (f32 accumulate) -> loosened tolerance.
    assert jnp.allclose(out, ref, atol=2e-2, rtol=2e-2), \
        f"case1 mismatch vs reference, max_abs_err={err1}"

    # Case 2: multiple L tiles (small block budget forces tl=128), exercising
    # the cross-tile halo path.
    L2 = 256
    x2 = jax.random.normal(jax.random.PRNGKey(1), (N, C, L2), dtype=jnp.float32)
    out2 = dwconv(x2, wd, bd, wp, bp, block_bytes=64 * 1024)
    jax.block_until_ready(out2)
    ref2 = dwconv_reference(x2, wd, bd, wp, bp)
    err2 = float(jnp.max(jnp.abs(out2 - ref2)))
    assert jnp.allclose(out2, ref2, atol=2e-2, rtol=2e-2), \
        f"case2 mismatch vs reference, max_abs_err={err2}"

    print("KERNEL_OK")
</pallas_src>

<mosaic_0001>
module attributes {stable_mosaic.version = 11 : i64} {
  func.func @dwconv_kernel(%arg0: i32, %arg1: i32, %arg2: memref<1x128x128xf32, #tpu.memory_space<vmem>>, %arg3: memref<1x128x128xf32, #tpu.memory_space<vmem>>, %arg4: memref<1x128x128xf32, #tpu.memory_space<vmem>>, %arg5: memref<128x7xf32, #tpu.memory_space<vmem>>, %arg6: memref<128x128xbf16, #tpu.memory_space<vmem>>, %arg7: memref<128x1xf32, #tpu.memory_space<vmem>>, %arg8: memref<1x128x128xf32, #tpu.memory_space<vmem>>) attributes {dimension_semantics = [#tpu.dimension_semantics<parallel>, #tpu.dimension_semantics<parallel>], iteration_bounds = array<i64: 2, 1>, scalar_prefetch = 0 : i64, scratch_operands = 0 : i64, tpu.core_type = #tpu.core_type<tc>, window_params = [{transform_indices = @transform_0, window_bounds = array<i64: 1, 128, 128>}, {transform_indices = @transform_1, window_bounds = array<i64: 1, 128, 128>}, {transform_indices = @transform_2, window_bounds = array<i64: 1, 128, 128>}, {pipeline_mode = #tpu.pipeline_mode<synchronous>, transform_indices = @transform_3, window_bounds = array<i64: 128, 7>}, {pipeline_mode = #tpu.pipeline_mode<synchronous>, transform_indices = @transform_4, window_bounds = array<i64: 128, 128>}, {pipeline_mode = #tpu.pipeline_mode<synchronous>, transform_indices = @transform_5, window_bounds = array<i64: 128, 1>}, {transform_indices = @transform_6, window_bounds = array<i64: 1, 128, 128>}]} {
    %c0_i32 = arith.constant 0 : i32
    %0 = arith.cmpi eq, %arg1, %c0_i32 : i32
    %c0_i32_0 = arith.constant 0 : i32
    %1 = arith.cmpi eq, %arg1, %c0_i32_0 : i32
    %c0 = arith.constant 0 : index
    %c0_1 = arith.constant 0 : index
    %2 = vector.load %arg5[%c0, %c0_1] : memref<128x7xf32, #tpu.memory_space<vmem>>, vector<128x1xf32>
    %c0_2 = arith.constant 0 : index
    %c1 = arith.constant 1 : index
    %3 = vector.load %arg5[%c0_2, %c1] : memref<128x7xf32, #tpu.memory_space<vmem>>, vector<128x1xf32>
    %c0_3 = arith.constant 0 : index
    %c2 = arith.constant 2 : index
    %4 = vector.load %arg5[%c0_3, %c2] : memref<128x7xf32, #tpu.memory_space<vmem>>, vector<128x1xf32>
    %c0_4 = arith.constant 0 : index
    %c3 = arith.constant 3 : index
    %5 = vector.load %arg5[%c0_4, %c3] : memref<128x7xf32, #tpu.memory_space<vmem>>, vector<128x1xf32>
    %c0_5 = arith.constant 0 : index
    %c4 = arith.constant 4 : index
    %6 = vector.load %arg5[%c0_5, %c4] : memref<128x7xf32, #tpu.memory_space<vmem>>, vector<128x1xf32>
    %c0_6 = arith.constant 0 : index
    %c5 = arith.constant 5 : index
    %7 = vector.load %arg5[%c0_6, %c5] : memref<128x7xf32, #tpu.memory_space<vmem>>, vector<128x1xf32>
    %c0_7 = arith.constant 0 : index
    %c6 = arith.constant 6 : index
    %8 = vector.load %arg5[%c0_7, %c6] : memref<128x7xf32, #tpu.memory_space<vmem>>, vector<128x1xf32>
    %c0_8 = arith.constant 0 : index
    %c0_9 = arith.constant 0 : index
    %9 = vector.load %arg6[%c0_8, %c0_9] : memref<128x128xbf16, #tpu.memory_space<vmem>>, vector<128x128xbf16>
    %c0_10 = arith.constant 0 : index
    %c0_11 = arith.constant 0 : index
    %10 = vector.load %arg7[%c0_10, %c0_11] : memref<128x1xf32, #tpu.memory_space<vmem>>, vector<128x1xf32>
    %c0_i32_12 = arith.constant 0 : i32
    %11 = arith.index_cast %c0_i32_12 : i32 to index
    %c0_13 = arith.constant 0 : index
    %c0_14 = arith.constant 0 : index
    %12 = vector.load %arg2[%11, %c0_13, %c0_14] : memref<1x128x128xf32, #tpu.memory_space<vmem>>, vector<1x128x128xf32>
    %13 = vector.shape_cast %12 : vector<1x128x128xf32> to vector<128x128xf32>
    %14 = vector.broadcast %5 : vector<128x1xf32> to vector<128x128xf32>
    %15 = arith.mulf %13, %14 : vector<128x128xf32>
    %c3_i32 = arith.constant 3 : i32
    %16 = tpu.dynamic_rotate %13 by %c3_i32 dim 1 : vector<128x128xf32>, i32 -> vector<128x128xf32>
    %17 = vector.broadcast %2 : vector<128x1xf32> to vector<128x128xf32>
    %18 = arith.mulf %16, %17 : vector<128x128xf32>
    %19 = arith.addf %15, %18 : vector<128x128xf32>
    %c2_i32 = arith.constant 2 : i32
    %20 = tpu.dynamic_rotate %13 by %c2_i32 dim 1 : vector<128x128xf32>, i32 -> vector<128x128xf32>
    %21 = vector.broadcast %3 : vector<128x1xf32> to vector<128x128xf32>
    %22 = arith.mulf %20, %21 : vector<128x128xf32>
    %23 = arith.addf %19, %22 : vector<128x128xf32>
    %c1_i32 = arith.constant 1 : i32
    %24 = tpu.dynamic_rotate %13 by %c1_i32 dim 1 : vector<128x128xf32>, i32 -> vector<128x128xf32>
    %25 = vector.broadcast %4 : vector<128x1xf32> to vector<128x128xf32>
    %26 = arith.mulf %24, %25 : vector<128x128xf32>
    %27 = arith.addf %23, %26 : vector<128x128xf32>
    %c127_i32 = arith.constant 127 : i32
    %28 = tpu.dynamic_rotate %13 by %c127_i32 dim 1 : vector<128x128xf32>, i32 -> vector<128x128xf32>
    %29 = vector.broadcast %6 : vector<128x1xf32> to vector<128x128xf32>
    %30 = arith.mulf %28, %29 : vector<128x128xf32>
    %31 = arith.addf %27, %30 : vector<128x128xf32>
    %c126_i32 = arith.constant 126 : i32
    %32 = tpu.dynamic_rotate %13 by %c126_i32 dim 1 : vector<128x128xf32>, i32 -> vector<128x128xf32>
    %33 = vector.broadcast %7 : vector<128x1xf32> to vector<128x128xf32>
    %34 = arith.mulf %32, %33 : vector<128x128xf32>
    %35 = arith.addf %31, %34 : vector<128x128xf32>
    %c125_i32 = arith.constant 125 : i32
    %36 = tpu.dynamic_rotate %13 by %c125_i32 dim 1 : vector<128x128xf32>, i32 -> vector<128x128xf32>
    %37 = vector.broadcast %8 : vector<128x1xf32> to vector<128x128xf32>
    %38 = arith.mulf %36, %37 : vector<128x128xf32>
    %39 = arith.addf %35, %38 : vector<128x128xf32>
    %40 = arith.truncf %39 : vector<128x128xf32> to vector<128x128xbf16>
    %cst = arith.constant dense<0.000000e+00> : vector<128x128xf32>
    %41 = tpu.matmul %9, %40, %cst {dimension_numbers = #tpu.dot_dimension_numbers<[1], [0], [0], [1], [0, 0, 1, 1], [], []>} : vector<128x128xbf16>, vector<128x128xbf16>, vector<128x128xf32> -> vector<128x128xf32>
    %42 = vector.broadcast %10 : vector<128x1xf32> to vector<128x128xf32>
    %43 = arith.addf %41, %42 : vector<128x128xf32>
    %44 = arith.index_cast %c0_i32_12 : i32 to index
    %c0_15 = arith.constant 0 : index
    %c0_16 = arith.constant 0 : index
    %45 = vector.load %arg8[%44, %c0_15, %c0_16] : memref<1x128x128xf32, #tpu.memory_space<vmem>>, vector<1x128x128xf32>
    %46 = vector.shape_cast %45 : vector<1x128x128xf32> to vector<128x128xf32>
    %47 = vector.shape_cast %43 : vector<128x128xf32> to vector<1x128x128xf32>
    tpu.vector_store %arg8[%44, %c0_15, %c0_16], %47 {strides = array<i32>} : memref<1x128x128xf32, #tpu.memory_space<vmem>>, vector<1x128x128xf32>,
    %48 = arith.index_cast %c0_i32_12 : i32 to index
    %c0_17 = arith.constant 0 : index
    %c0_18 = arith.constant 0 : index
    %49 = vector.load %arg3[%48, %c0_17, %c0_18] : memref<1x128x128xf32, #tpu.memory_space<vmem>>, vector<1x128x128xf32>
    %50 = vector.shape_cast %49 : vector<1x128x128xf32> to vector<128x128xf32>
    %51 = vector.extract_strided_slice %50 {offsets = [0, 125], sizes = [128, 3], strides = [1, 1]} : vector<128x128xf32> to vector<128x3xf32>
    %52 = arith.index_cast %c0_i32_12 : i32 to index
    %c0_19 = arith.constant 0 : index
    %c0_20 = arith.constant 0 : index
    %53 = vector.load %arg4[%52, %c0_19, %c0_20] : memref<1x128x128xf32, #tpu.memory_space<vmem>>, vector<1x128x128xf32>
    %54 = vector.shape_cast %53 : vector<1x128x128xf32> to vector<128x128xf32>
    %55 = vector.extract_strided_slice %54 {offsets = [0, 0], sizes = [128, 3], strides = [1, 1]} : vector<128x128xf32> to vector<128x3xf32>
    %cst_21 = arith.constant 0.000000e+00 : f32
    %56 = vector.broadcast %cst_21 : f32 to vector<128x3xf32>
    %57 = arith.select %0, %56, %51 : vector<128x3xf32>
    %cst_22 = arith.constant 0.000000e+00 : f32
    %58 = vector.broadcast %cst_22 : f32 to vector<128x3xf32>
    %59 = arith.select %1, %58, %55 : vector<128x3xf32>
    %60 = vector.extract_strided_slice %13 {offsets = [0, 0], sizes = [128, 6], strides = [1, 1]} : vector<128x128xf32> to vector<128x6xf32>
    %61 = tpu.concatenate %57, %60 in 1 : vector<128x3xf32>, vector<128x6xf32> -> vector<128x9xf32>
    %62 = vector.extract_strided_slice %13 {offsets = [0, 122], sizes = [128, 6], strides = [1, 1]} : vector<128x128xf32> to vector<128x6xf32>
    %63 = tpu.concatenate %62, %59 in 1 : vector<128x6xf32>, vector<128x3xf32> -> vector<128x9xf32>
    %64 = vector.extract_strided_slice %61 {offsets = [0, 0], sizes = [128, 3], strides = [1, 1]} : vector<128x9xf32> to vector<128x3xf32>
    %65 = vector.broadcast %2 : vector<128x1xf32> to vector<128x3xf32>
    %66 = arith.mulf %64, %65 : vector<128x3xf32>
    %67 = vector.extract_strided_slice %63 {offsets = [0, 0], sizes = [128, 3], strides = [1, 1]} : vector<128x9xf32> to vector<128x3xf32>
    %68 = vector.broadcast %2 : vector<128x1xf32> to vector<128x3xf32>
    %69 = arith.mulf %67, %68 : vector<128x3xf32>
    %70 = vector.extract_strided_slice %61 {offsets = [0, 1], sizes = [128, 3], strides = [1, 1]} : vector<128x9xf32> to vector<128x3xf32>
    %71 = vector.broadcast %3 : vector<128x1xf32> to vector<128x3xf32>
    %72 = arith.mulf %70, %71 : vector<128x3xf32>
    %73 = arith.addf %66, %72 : vector<128x3xf32>
    %74 = vector.extract_strided_slice %63 {offsets = [0, 1], sizes = [128, 3], strides = [1, 1]} : vector<128x9xf32> to vector<128x3xf32>
    %75 = vector.broadcast %3 : vector<128x1xf32> to vector<128x3xf32>
    %76 = arith.mulf %74, %75 : vector<128x3xf32>
    %77 = arith.addf %69, %76 : vector<128x3xf32>
    %78 = vector.extract_strided_slice %61 {offsets = [0, 2], sizes = [128, 3], strides = [1, 1]} : vector<128x9xf32> to vector<128x3xf32>
    %79 = vector.broadcast %4 : vector<128x1xf32> to vector<128x3xf32>
    %80 = arith.mulf %78, %79 : vector<128x3xf32>
    %81 = arith.addf %73, %80 : vector<128x3xf32>
    %82 = vector.extract_strided_slice %63 {offsets = [0, 2], sizes = [128, 3], strides = [1, 1]} : vector<128x9xf32> to vector<128x3xf32>
    %83 = vector.broadcast %4 : vector<128x1xf32> to vector<128x3xf32>
    %84 = arith.mulf %82, %83 : vector<128x3xf32>
    %85 = arith.addf %77, %84 : vector<128x3xf32>
    %86 = vector.extract_strided_slice %61 {offsets = [0, 3], sizes = [128, 3], strides = [1, 1]} : vector<128x9xf32> to vector<128x3xf32>
    %87 = vector.broadcast %5 : vector<128x1xf32> to vector<128x3xf32>
    %88 = arith.mulf %86, %87 : vector<128x3xf32>
    %89 = arith.addf %81, %88 : vector<128x3xf32>
    %90 = vector.extract_strided_slice %63 {offsets = [0, 3], sizes = [128, 3], strides = [1, 1]} : vector<128x9xf32> to vector<128x3xf32>
    %91 = vector.broadcast %5 : vector<128x1xf32> to vector<128x3xf32>
    %92 = arith.mulf %90, %91 : vector<128x3xf32>
    %93 = arith.addf %85, %92 : vector<128x3xf32>
    %94 = vector.extract_strided_slice %61 {offsets = [0, 4], sizes = [128, 3], strides = [1, 1]} : vector<128x9xf32> to vector<128x3xf32>
    %95 = vector.broadcast %6 : vector<128x1xf32> to vector<128x3xf32>
    %96 = arith.mulf %94, %95 : vector<128x3xf32>
    %97 = arith.addf %89, %96 : vector<128x3xf32>
    %98 = vector.extract_strided_slice %63 {offsets = [0, 4], sizes = [128, 3], strides = [1, 1]} : vector<128x9xf32> to vector<128x3xf32>
    %99 = vector.broadcast %6 : vector<128x1xf32> to vector<128x3xf32>
    %100 = arith.mulf %98, %99 : vector<128x3xf32>
    %101 = arith.addf %93, %100 : vector<128x3xf32>
    %102 = vector.extract_strided_slice %61 {offsets = [0, 5], sizes = [128, 3], strides = [1, 1]} : vector<128x9xf32> to vector<128x3xf32>
    %103 = vector.broadcast %7 : vector<128x1xf32> to vector<128x3xf32>
    %104 = arith.mulf %102, %103 : vector<128x3xf32>
    %105 = arith.addf %97, %104 : vector<128x3xf32>
    %106 = vector.extract_strided_slice %63 {offsets = [0, 5], sizes = [128, 3], strides = [1, 1]} : vector<128x9xf32> to vector<128x3xf32>
    %107 = vector.broadcast %7 : vector<128x1xf32> to vector<128x3xf32>
    %108 = arith.mulf %106, %107 : vector<128x3xf32>
    %109 = arith.addf %101, %108 : vector<128x3xf32>
    %110 = vector.extract_strided_slice %61 {offsets = [0, 6], sizes = [128, 3], strides = [1, 1]} : vector<128x9xf32> to vector<128x3xf32>
    %111 = vector.broadcast %8 : vector<128x1xf32> to vector<128x3xf32>
    %112 = arith.mulf %110, %111 : vector<128x3xf32>
    %113 = arith.addf %105, %112 : vector<128x3xf32>
    %114 = vector.extract_strided_slice %63 {offsets = [0, 6], sizes = [128, 3], strides = [1, 1]} : vector<128x9xf32> to vector<128x3xf32>
    %115 = vector.broadcast %8 : vector<128x1xf32> to vector<128x3xf32>
    %116 = arith.mulf %114, %115 : vector<128x3xf32>
    %117 = arith.addf %109, %116 : vector<128x3xf32>
    %118 = tpu.concatenate %113, %117 in 1 : vector<128x3xf32>, vector<128x3xf32> -> vector<128x6xf32>
    %119 = arith.truncf %118 : vector<128x6xf32> to vector<128x6xbf16>
    %cst_23 = arith.constant dense<0.000000e+00> : vector<128x6xf32>
    %120 = tpu.matmul %9, %119, %cst_23 {dimension_numbers = #tpu.dot_dimension_numbers<[1], [0], [0], [1], [0, 0, 1, 1], [], []>} : vector<128x128xbf16>, vector<128x6xbf16>, vector<128x6xf32> -> vector<128x6xf32>
    %121 = vector.broadcast %10 : vector<128x1xf32> to vector<128x6xf32>
    %122 = arith.addf %120, %121 : vector<128x6xf32>
    %123 = vector.extract_strided_slice %122 {offsets = [0, 0], sizes = [128, 3], strides = [1, 1]} : vector<128x6xf32> to vector<128x3xf32>
    %124 = arith.index_cast %c0_i32_12 : i32 to index
    %c0_24 = arith.constant 0 : index
    %c0_25 = arith.constant 0 : index
    %125 = vector.load %arg8[%124, %c0_24, %c0_25] : memref<1x128x128xf32, #tpu.memory_space<vmem>>, vector<1x128x3xf32>
    %126 = vector.shape_cast %125 : vector<1x128x3xf32> to vector<128x3xf32>
    %127 = vector.shape_cast %123 : vector<128x3xf32> to vector<1x128x3xf32>
    tpu.vector_store %arg8[%124, %c0_24, %c0_25], %127 {strides = array<i32>} : memref<1x128x128xf32, #tpu.memory_space<vmem>>, vector<1x128x3xf32>,
    %128 = vector.extract_strided_slice %122 {offsets = [0, 3], sizes = [128, 3], strides = [1, 1]} : vector<128x6xf32> to vector<128x3xf32>
    %129 = arith.index_cast %c0_i32_12 : i32 to index
    %c0_26 = arith.constant 0 : index
    %c125 = arith.constant 125 : index
    %130 = vector.load %arg8[%129, %c0_26, %c125] : memref<1x128x128xf32, #tpu.memory_space<vmem>>, vector<1x128x3xf32>
    %131 = vector.shape_cast %130 : vector<1x128x3xf32> to vector<128x3xf32>
    %132 = vector.shape_cast %128 : vector<128x3xf32> to vector<1x128x3xf32>
    tpu.vector_store %arg8[%129, %c0_26, %c125], %132 {strides = array<i32>} : memref<1x128x128xf32, #tpu.memory_space<vmem>>, vector<1x128x3xf32>,
    %c1_i32_27 = arith.constant 1 : i32
    return
  }
  func.func @transform_0(%arg0: i32, %arg1: i32) -> (i32, i32, i32) {
    %c0_i32 = arith.constant 0 : i32
    %c0_i32_0 = arith.constant 0 : i32
    return %arg0, %c0_i32, %arg1 : i32, i32, i32
  }
  func.func @transform_1(%arg0: i32, %arg1: i32) -> (i32, i32, i32) {
    %c1_i32 = arith.constant 1 : i32
    %0 = arith.muli %arg1, %c1_i32 : i32
    %c1_i32_0 = arith.constant 1 : i32
    %1 = arith.subi %0, %c1_i32_0 : i32
    %c0_i32 = arith.constant 0 : i32
    %2 = arith.maxsi %1, %c0_i32 : i32
    %c0_i32_1 = arith.constant 0 : i32
    %c0_i32_2 = arith.constant 0 : i32
    return %arg0, %c0_i32_1, %2 : i32, i32, i32
  }
  func.func @transform_2(%arg0: i32, %arg1: i32) -> (i32, i32, i32) {
    %c1_i32 = arith.constant 1 : i32
    %0 = arith.addi %arg1, %c1_i32 : i32
    %c1_i32_0 = arith.constant 1 : i32
    %1 = arith.muli %0, %c1_i32_0 : i32
    %c0_i32 = arith.constant 0 : i32
    %2 = arith.minsi %1, %c0_i32 : i32
    %c0_i32_1 = arith.constant 0 : i32
    %c0_i32_2 = arith.constant 0 : i32
    return %arg0, %c0_i32_1, %2 : i32, i32, i32
  }
  func.func @transform_3(%arg0: i32, %arg1: i32) -> (i32, i32) {
    %c0_i32 = arith.constant 0 : i32
    %c0_i32_0 = arith.constant 0 : i32
    %c0_i32_1 = arith.constant 0 : i32
    return %c0_i32, %c0_i32_0 : i32, i32
  }
  func.func @transform_4(%arg0: i32, %arg1: i32) -> (i32, i32) {
    %c0_i32 = arith.constant 0 : i32
    %c0_i32_0 = arith.constant 0 : i32
    %c0_i32_1 = arith.constant 0 : i32
    return %c0_i32, %c0_i32_0 : i32, i32
  }
  func.func @transform_5(%arg0: i32, %arg1: i32) -> (i32, i32) {
    %c0_i32 = arith.constant 0 : i32
    %c0_i32_0 = arith.constant 0 : i32
    %c0_i32_1 = arith.constant 0 : i32
    return %c0_i32, %c0_i32_0 : i32, i32
  }
  func.func @transform_6(%arg0: i32, %arg1: i32) -> (i32, i32, i32) {
    %c0_i32 = arith.constant 0 : i32
    %c0_i32_0 = arith.constant 0 : i32
    return %arg0, %c0_i32, %arg1 : i32, i32, i32
  }
}

</mosaic_0001>

<bundles_post_ra>
// kernel: tpu_custom_call.1
= control target key start
LH: loop header
LB: loop body
LE: loop exit
PB: predicated region body
PF: predicated region fallthrough
CT: control target
= control target key end

     0   :  { %s6810_s0 = inlined_call_operand.vmem [shape: f32[2,128,128], index: 0, kind: input, shape index: {}]   ;;  %s6811_s1 = inlined_call_operand.hbm [shape: f32[2,128,128], index: 1, kind: input, shape index: {}]   ;;  %s6812_s2 = inlined_call_operand.hbm [shape: f32[2,128,128], index: 2, kind: input, shape index: {}]   ;;  %s6813_s3 = inlined_call_operand.vmem [shape: f32[128,7], index: 3, kind: input, shape index: {}]   ;;  %s6814_s4 = inlined_call_operand.hbm [shape: bf16[128,128], index: 4, kind: input, shape index: {}]   ;;  %s6815_s5 = inlined_call_operand.vmem [shape: f32[128,1], index: 5, kind: input, shape index: {}]   ;;  %s6816_s6 = inlined_call_operand.hbm [shape: f32[2,128,128], index: 6, kind: output, shape index: {}]  }
   0x1   :  { %7041 = sst [smem:[#allocation211_spill]] %s6814_s4 }
   0x2   :  { %11 = vsyncpa [#allocation3], 0 }
   0x3   :  { %13 = vsyncpa [#allocation3 + $0x1], 0 }
   0x4   :  { %14 = vsyncpa [#allocation6], 0 }
   0x5   :  { %16 = vsyncpa [#allocation6 + $0x1], 0 }
   0x6   :  { %17 = vsyncpa [#allocation4], 0 }
   0x7   :  { %19 = vsyncpa [#allocation4 + $0x1], 0  ;;  %s4042_s21 = smov 0   ;;  %s4044_s22 = smov 0  }
   0x8   :  { %s4046_s23 = smov 0   ;;  %s4048_s24 = smov 0  }
   0x9   :  { %s4050_s25 = smov 0   ;;  %s4052_s26 = smov 0  }
   0xa LB: > { %7042 = sst [smem:[#allocation13_spill]] %s3960_s21  ;;  %s4073_s27 = sadd.s32 4294967295, %s3980_s26   ;;  %s3980_s26 = sphi %s4052_s26, %s25_s26   ;;  %s3976_s25 = sphi %s4050_s25, %s7762_s25   ;;  %s3972_s24 = sphi %s4048_s24, %s7761_s24   ;;  %s3968_s23 = sphi %s4046_s23, %s7760_s23   ;;  %s3964_s22 = sphi %s4044_s22, %s7764_s22   ;;  %s3960_s21 = sphi %s4042_s21, %s7763_s21  }
   0xb   : > { %7043 = sst [smem:[#allocation14_spill]] %s3968_s23  ;;  %s3449_s28 = sadd.s32 4294967294, %s3980_s26  }
   0xc   : > { %7044 = sst [smem:[#allocation15_spill]] %s3976_s25  ;;  %p93_p0 = scmp.ne.s32.totalorder %s3964_s22, %s3960_s21 }
   0xd   : > { %p94_p1 = scmp.eq.s32.totalorder %s4073_s27, 0  ;;  %p216_p2 = scmp.eq.s32.totalorder %s4073_s27, 1 }
   0xe   : > { %p222_p3 = scmp.eq.s32.totalorder %s3449_s28, 1  ;;  %p3450_p5 = scmp.ge.s32.totalorder %s3980_s26, 1 }
   0xf   : > { %p4082_p4 = por %p94_p1, %p93_p0  ;;  %p229_p7 = scmp.lt.s32.totalorder %s3980_s26, 3 }
  0x10   : > { %p4087_p6 = por %p222_p3, %p93_p0  ;;  %s7048_s4 = sld [smem:[#allocation211_spill]] }
  0x11   : > { %p4095_p8 = pnand %p3450_p5, %p229_p7  ;;  %s3982_s11 = smov [#allocation7]  }
  0x12   : > { %s7046_s30 = scalar_select %p4087_p6, 1, 0 }
  0x13   : > { %p3541_p9 = pneg %p4095_p8  ;;  %s245_s12 = sshll.u32 %s3982_s11, 4  ;;  %s246_s12 = int_to_ptr.vmem [resolvable:$true] %s245_s12 }
  0x14   : > { %7047 = sst [smem:[#allocation16_spill]] %s7046_s30  ;;  %p3452_p11 = scmp.ge.s32.totalorder %s3980_s26, 2 }
  0x15   : > { %p3542_p10 = pnand %p3541_p9, %p94_p1  ;;  %s3983_s13 = smov 64  }
  0x16   : > { %s243_s9 = sshll.u32 %s7048_s4, 4  ;;  %s3984_s14 = smov 4   ;;  %s244_s9 = int_to_ptr.hbm [resolvable:$true] %s243_s9 }
  0x17   : > { %3544 = dma.hbm_to_vmem [thread:$0]  (!%p3542_p10), %s244_s9, 1024, %s246_s12, [#allocation6], %s3983_s13, %s3983_s13, %s3984_s14  }
  0x18   : > { %s37_s15 = sadd.s32 1, %s3976_s25  ;;  %s80_s16 = sadd.s32 1, %s3968_s23 }
  0x19   : > { %p39_p12 = scmp.ge.s32.totalorder %s37_s15, 2  ;;  %p87_p13 = scmp.ne.s32.totalorder %s3968_s23, %s3964_s22 }
  0x1a   : > { %p88_p0 = scmp.eq.s32.totalorder %s3980_s26, 0  ;;  %p3557_p7 = scmp.lt.s32.totalorder %s3980_s26, 2 }
  0x1b   : > { %s7766_s15 = smov (%p39_p12, %s37_s15), 0  ;;  %p4117_p5 = por %p216_p2, %p87_p13 }
  0x1c   : > { %7050 = sst [smem:[#allocation17_spill]] %s7766_s15  ;;  %p4111_p3 = por %p88_p0, %p87_p13 }
  0x1d   : > { %s75_s19 = ssub.s32 %s3976_s25, %s7766_s15  ;;  %s273_s20 = sand.u32 1, %s3968_s23  }
  0x1e   : > { %p78_p9 = scmp.eq.s32.totalorder %s75_s19, 0  ;;  %s3453_s28 = sshll.u32 %s273_s20, 7 }
  0x1f   : > { %s3503_s8 = sshll.u32 %s3976_s25, 7  ;;  %s277_s13 = scalar_lea.vmem [#allocation2], %s3453_s28 }
  0x20   : > { %s4126_s7 = scalar_select %p78_p9, %s3968_s23, %s80_s16  }
  0x21   : > { %s286_s12 = scalar_lea.hbm %s6811_s1, %s3503_s8  ;;  %s289_s14 = sshll.u32 %s277_s13, 4  ;;  %s290_s14 = int_to_ptr.vmem [resolvable:$true] %s289_s14 }
  0x22   : > { %7053 = sst [smem:[#allocation18_spill]] %s4126_s7  ;;  %s287_s4 = sshll.u32 %s286_s12, 4  ;;  %s288_s4 = int_to_ptr.hbm [resolvable:$true] %s287_s4 }
  0x23   : > { %p3546_p2 = pnand %p3557_p7, %p4111_p3  ;;  %s274_s15 = scalar_lea.sflag [#allocation3], %s273_s20 }
  0x24   : > { %s3985_s30 = smov 128   ;;  %s3986_s19 = smov 8  }
  0x25   : > { %3548 = dma.hbm_to_vmem [thread:$0]  (!%p3546_p2), %s288_s4, 2048, %s290_s14, %s274_s15, %s3985_s30, %s3985_s30, %s3986_s19  }
  0x26   : > { %s312_s25 = scalar_lea.hbm %s6812_s2, %s3503_s8  ;;  %s303_s7 = scalar_lea.vmem [#allocation5], %s3453_s28 }
  0x27   : > { %s315_s23 = sshll.u32 %s303_s7, 4  ;;  %s313_s9 = sshll.u32 %s312_s25, 4  ;;  %s316_s23 = int_to_ptr.vmem [resolvable:$true] %s315_s23  ;;  %s314_s9 = int_to_ptr.hbm [resolvable:$true] %s313_s9 }
  0x28   : > { %s299_s11 = sand.u32 1, %s3980_s26   ;;  %327 = sbr.rel (%p4095_p8) target bundleno = 1829 (0x725), region = 44 }
  0x29   : > { %s300_s13 = scalar_lea.sflag [#allocation6], %s299_s11 }
  0x2a   : > { %3551 = dma.hbm_to_vmem [thread:$0]  (!%p3546_p2), %s314_s9, 2048, %s316_s23, %s300_s13, %s3985_s30, %s3985_s30, %s3986_s19  }
  0x2d   : > { %s4141_s17 = sand.u32 1, %s3964_s22  }
  0x2e   : > { %s330_s4 = scalar_lea.sflag [#allocation3], %s4141_s17 }
  0x2f   : > { %3943 = dma.done.wait (%p4082_p4), %s330_s4, 2048  }
  0x30   : > { %3945 = vsyncadd (%p4082_p4), %s330_s4, 4294965248  ;;  %s339_s21 = sand.u32 1, %s4073_s27  }
  0x31   : > { %s340_s25 = scalar_lea.sflag [#allocation6], %s339_s21 }
  0x32   : > { %3947 = dma.done.wait (%p4082_p4), %s340_s25, 2048  }
  0x33   : > { %3949 = vsyncadd (%p4082_p4), %s340_s25, 4294965248 }
  0x34   : > { %3951 = dma.done.wait (%p94_p1), [#allocation6], 1024  }
  0x35   : > { %3953 = vsyncadd (%p94_p1), [#allocation6], 4294966272  ;;  %v3987_v0 = vmov 3   ;;  %v4160_v1 = vld [vmem:[%s6813_s3 + $0x20] sm:$0xff]  ;;  %v4165_v2 = vld [vmem:[%s6813_s3 + $0x10] sm:$0xff]  ;;  %p391_p1 = scmp.lt.s32.totalorder %s3972_s24, 1 }
  0x36   : > { %3635 = vset.pattern.permute.xlu2 %v3987_v0  ;;  %3634 = vset.pattern.permute.xlu1 %v3987_v0  ;;  %v4170_v3 = vld [vmem:[%s6813_s3] sm:$0xff]  ;;  %v4178_v4 = vld [vmem:[%s6813_s3 + $0x28] sm:$0xff]  ;;  %v4183_v5 = vld [vmem:[%s6813_s3 + $0x18] sm:$0xff]  ;;  %s3988_s4 = smov 3   ;;  %v6822_v19 = vmov 0   ;;  %s3990_s21 = smov 2  }
  0x37   : > { %3633 = vset.pattern.permute.xlu0 %v3987_v0  ;;  %492 = vperm.xlu2 %3635, %v4160_v1   ;;  %v4188_v6 = vld [vmem:[%s6813_s3 + $0x8] sm:$0xff]  ;;  %v4196_v7 = vld [vmem:[%s6813_s3 + $0x40] sm:$0xff]  ;;  %v4201_v8 = vld [vmem:[%s6813_s3 + $0x38] sm:$0xff]  ;;  %s392_s29 = scalar_select %p391_p1, %s3972_s24, 1  ;;  %v3991_v35 = vmov 1   ;;  %v3993_v62 = vmov 2  }
  0x38   : > { %482 = vperm.xlu1 %3634, %v4165_v2   ;;  %472 = vperm.xlu0 %3633, %v4170_v3   ;;  %v4206_v9 = vld [vmem:[%s6813_s3 + $0x30] sm:$0xff]  ;;  %v4214_v10 = vld [vmem:[%s6813_s3 + $0x58] sm:$0xff]  ;;  %v4224_v12 = vld [vmem:[%s6813_s3 + $0x48] sm:$0xff]  ;;  %s3992_s25 = smov 1   ;;  %s3994_s23 = smov 127   ;;  %vm1730_vm0 = vcmask 23552  }
  0x39   : > { %v4219_v11 = vld [vmem:[%s6813_s3 + $0x50] sm:$0xff]  ;;  %v4239_v14 = vld [vmem:[%s6813_s3 + $0x68] sm:$0xff]  ;;  %v4244_v15 = vld [vmem:[%s6813_s3 + $0x60] sm:$0xff]  ;;  %s3505_s14 = sshll.u32 %s392_s29, 7  ;;  %s3996_s30 = smov 126   ;;  %vm1859_vm1 = vcmask 48128  }
  0x3a   : > { %v4234_v13 = vld [vmem:[%s6813_s3 + $0x70] sm:$0xff]  ;;  %s4252_s9 = scalar_lea.vmem %s6810_s0, %s3505_s14  ;;  %v4263_v18 = vld [vmem:[%s6813_s3 + $0x78] sm:$0xff]  ;;  %s3998_s10 = smov 125   ;;  %vm3277_vm2 = vcmask 1048552  }
  0x3b   : > { %v4255_v16 = vld [vmem:[%s4252_s9 + $0x8] sm:$0xff]  ;;  %v4258_v17 = vld [vmem:[%s4252_s9] sm:$0xff]  ;;  %v4276_v21 = vld [vmem:[%s4252_s9 + $0x18] sm:$0xff]  ;;  %s4001_s20 = smov 6   ;;  %s3295_s19 = scalar_lea.sflag [#allocation4], %s4141_s17 }
  0x3c   : > { %v4273_v20 = vld [vmem:[%s4252_s9 + $0x20] sm:$0xff]  ;;  %v4279_v22 = vld [vmem:[%s4252_s9 + $0x10] sm:$0xff]  ;;  %v4288_v23 = vld [vmem:[%s4252_s9 + $0x38] sm:$0xff] }
  0x3d   : > { %v4291_v24 = vld [vmem:[%s4252_s9 + $0x30] sm:$0xff]  ;;  %v4294_v25 = vld [vmem:[%s4252_s9 + $0x28] sm:$0xff]  ;;  %v4309_v28 = vld [vmem:[%s4252_s9 + $0x40] sm:$0xff] }
  0x3e   : > { %v4303_v26 = vld [vmem:[%s4252_s9 + $0x50] sm:$0xff]  ;;  %v4306_v27 = vld [vmem:[%s4252_s9 + $0x48] sm:$0xff]  ;;  %v4321_v30 = vld [vmem:[%s4252_s9 + $0x60] sm:$0xff] }
  0x3f   : > { %497 = vperm.xlu2 %3635, %v4178_v4   ;;  %v4318_v29 = vld [vmem:[%s4252_s9 + $0x68] sm:$0xff]  ;;  %v4324_v31 = vld [vmem:[%s4252_s9 + $0x58] sm:$0xff]  ;;  %v4336_v33 = vld [vmem:[%s4252_s9 + $0x70] sm:$0xff] }
  0x40   : > { %487 = vperm.xlu1 %3634, %v4183_v5   ;;  %477 = vperm.xlu0 %3633, %v4188_v6   ;;  %v4333_v32 = vld [vmem:[%s4252_s9 + $0x78] sm:$0xff] }
  0x47   : > { %512 = vperm.xlu2 %3635, %v4196_v7  }
  0x48   : > { %507 = vperm.xlu1 %3634, %v4201_v8   ;;  %502 = vperm.xlu0 %3633, %v4206_v9  }
  0x4f   : > { %527 = vperm.xlu2 %3635, %v4214_v10  }
  0x50   : > { %522 = vperm.xlu1 %3634, %v4219_v11   ;;  %517 = vperm.xlu0 %3633, %v4224_v12  }
  0x57   : > { %542 = vperm.xlu2 %3635, %v4234_v13  }
  0x58   : > { %537 = vperm.xlu1 %3634, %v4239_v14   ;;  %532 = vperm.xlu0 %3633, %v4244_v15  }
  0x5f   : > { %568 = vrot.lane.b32.xlu2 %v4255_v16, %s3988_s4 }
  0x60   : > { %566 = vrot.lane.b32.xlu1 %v4258_v17, %s3988_s4  ;;  %547 = vperm.xlu0 %3633, %v4263_v18  }
  0x61   : > { %3636 = vset.pattern.permute.xlu2 %v6822_v19  ;;  %3637 = vset.pattern.permute.xlu1 %v6822_v19 }
  0x67   : > { %574 = vrot.lane.b32.xlu2 %v4273_v20, %s3988_s4 }
  0x68   : > { %572 = vrot.lane.b32.xlu1 %v4276_v21, %s3988_s4  ;;  %570 = vrot.lane.b32.xlu0 %v4279_v22, %s3988_s4 }
  0x69   : > { %3639 = vset.pattern.permute.xlu0 %v3991_v35 }
  0x6f   : > { %580 = vrot.lane.b32.xlu2 %v4288_v23, %s3988_s4 }
  0x70   : > { %578 = vrot.lane.b32.xlu1 %v4291_v24, %s3988_s4  ;;  %576 = vrot.lane.b32.xlu0 %v4294_v25, %s3988_s4 }
  0x77   : > { %586 = vrot.lane.b32.xlu2 %v4303_v26, %s3988_s4 }
  0x78   : > { %584 = vrot.lane.b32.xlu1 %v4306_v27, %s3988_s4  ;;  %582 = vrot.lane.b32.xlu0 %v4309_v28, %s3988_s4 }
  0x7f   : > { %592 = vrot.lane.b32.xlu2 %v4318_v29, %s3988_s4 }
  0x80   : > { %590 = vrot.lane.b32.xlu1 %v4321_v30, %s3988_s4  ;;  %588 = vrot.lane.b32.xlu0 %v4324_v31, %s3988_s4 }
  0x87   : > { %599 = vperm.xlu2 %3636, %v4170_v3  }
  0x88   : > { %596 = vrot.lane.b32.xlu1 %v4333_v32, %s3988_s4  ;;  %594 = vrot.lane.b32.xlu0 %v4336_v33, %s3988_s4 }
  0x8f   : > { %611 = vperm.xlu2 %3636, %v4183_v5  }
  0x90   : > { %607 = vperm.xlu1 %3637, %v4165_v2   ;;  %698 = vrot.lane.b32.xlu0 %v4279_v22, %s3990_s21 }
  0x91   : > { %v4347_v34 = vpop.permute.xlu2 %492 }
  0x92   : > { %7054 = vst [vmem:[#allocation19_spill] sm:$0xff] %v4347_v34 }
  0x97   : > { %619 = vperm.xlu2 %3636, %v4178_v4  }
  0x98   : > { %615 = vperm.xlu1 %3637, %v4160_v1   ;;  %704 = vrot.lane.b32.xlu0 %v4294_v25, %s3990_s21 }
  0x99   : > { %v4353_v36 = vpop.permute.xlu2 %497 }
  0x9a   : > { %7055 = vst [vmem:[#allocation20_spill] sm:$0xff] %v4353_v36 }
  0x9f   : > { %631 = vperm.xlu2 %3636, %v4196_v7  }
  0xa0   : > { %627 = vperm.xlu1 %3637, %v4201_v8   ;;  %710 = vrot.lane.b32.xlu0 %v4309_v28, %s3990_s21 }
  0xa1   : > { %v4359_v37 = vpop.permute.xlu2 %512 }
  0xa2   : > { %7056 = vst [vmem:[#allocation21_spill] sm:$0xff] %v4359_v37 }
  0xa7   : > { %643 = vperm.xlu2 %3636, %v4214_v10  }
  0xa8   : > { %639 = vperm.xlu1 %3637, %v4219_v11   ;;  %716 = vrot.lane.b32.xlu0 %v4324_v31, %s3990_s21 }
  0xa9   : > { %v4365_v38 = vpop.permute.xlu2 %527 }
  0xaa   : > { %7057 = vst [vmem:[#allocation22_spill] sm:$0xff] %v4365_v38  ;;  %v4367_v39 = vpop.permute.xlu1 %482  ;;  %v4369_v40 = vpop.permute.xlu0 %472 }
  0xab   : > { %7058 = vst [vmem:[#allocation23_spill] sm:$0xff] %v4367_v39 }
  0xac   : > { %7059 = vst [vmem:[#allocation24_spill] sm:$0xff] %v4369_v40 }
  0xaf   : > { %655 = vperm.xlu2 %3636, %v4234_v13  }
  0xb0   : > { %651 = vperm.xlu1 %3637, %v4239_v14   ;;  %722 = vrot.lane.b32.xlu0 %v4336_v33, %s3990_s21 }
  0xb1   : > { %v4375_v41 = vpop.permute.xlu2 %542 }
  0xb2   : > { %7060 = vst [vmem:[#allocation25_spill] sm:$0xff] %v4375_v41  ;;  %v4377_v42 = vpop.permute.xlu1 %487  ;;  %v4379_v43 = vpop.permute.xlu0 %477 }
  0xb3   : > { %7061 = vst [vmem:[#allocation26_spill] sm:$0xff] %v4377_v42 }
  0xb4   : > { %7062 = vst [vmem:[#allocation27_spill] sm:$0xff] %v4379_v43 }
  0xb7   : > { %696 = vrot.lane.b32.xlu2 %v4255_v16, %s3990_s21 }
  0xb8   : > { %694 = vrot.lane.b32.xlu1 %v4258_v17, %s3990_s21  ;;  %731 = vperm.xlu0 %3639, %v4188_v6  }
  0xb9   : > { %3638 = vset.pattern.permute.xlu2 %v3991_v35  ;;  %v4386_v44 = vpop.permute.xlu2 %568  ;;  %3640 = vset.pattern.permute.xlu1 %v3991_v35 }
  0xba   : > { %7063 = vst [vmem:[#allocation28_spill] sm:$0xff] %v4386_v44  ;;  %v4388_v45 = vpop.permute.xlu1 %507  ;;  %v4390_v46 = vpop.permute.xlu0 %502 }
  0xbb   : > { %7064 = vst [vmem:[#allocation29_spill] sm:$0xff] %v4388_v45 }
  0xbc   : > { %7065 = vst [vmem:[#allocation30_spill] sm:$0xff] %v4390_v46 }
  0xbf   : > { %702 = vrot.lane.b32.xlu2 %v4273_v20, %s3990_s21 }
  0xc0   : > { %700 = vrot.lane.b32.xlu1 %v4276_v21, %s3990_s21  ;;  %751 = vperm.xlu0 %3639, %v4206_v9  }
  0xc1   : > { %v4397_v47 = vpop.permute.xlu2 %574 }
  0xc2   : > { %7066 = vst [vmem:[#allocation31_spill] sm:$0xff] %v4397_v47  ;;  %v4399_v48 = vpop.permute.xlu1 %522  ;;  %v4401_v49 = vpop.permute.xlu0 %517 }
  0xc3   : > { %7067 = vst [vmem:[#allocation32_spill] sm:$0xff] %v4399_v48 }
  0xc4   : > { %7068 = vst [vmem:[#allocation33_spill] sm:$0xff] %v4401_v49 }
  0xc7   : > { %708 = vrot.lane.b32.xlu2 %v4288_v23, %s3990_s21 }
  0xc8   : > { %706 = vrot.lane.b32.xlu1 %v4291_v24, %s3990_s21  ;;  %763 = vperm.xlu0 %3639, %v4224_v12  }
  0xc9   : > { %v4408_v50 = vpop.permute.xlu2 %580 }
  0xca   : > { %7069 = vst [vmem:[#allocation34_spill] sm:$0xff] %v4408_v50  ;;  %v4410_v51 = vpop.permute.xlu1 %537  ;;  %v4412_v52 = vpop.permute.xlu0 %532 }
  0xcb   : > { %7070 = vst [vmem:[#allocation35_spill] sm:$0xff] %v4410_v51 }
  0xcc   : > { %7071 = vst [vmem:[#allocation36_spill] sm:$0xff] %v4412_v52 }
  0xcf   : > { %714 = vrot.lane.b32.xlu2 %v4303_v26, %s3990_s21 }
  0xd0   : > { %712 = vrot.lane.b32.xlu1 %v4306_v27, %s3990_s21  ;;  %775 = vperm.xlu0 %3639, %v4244_v15  }
  0xd1   : > { %v4419_v53 = vpop.permute.xlu2 %586 }
  0xd2   : > { %7072 = vst [vmem:[#allocation37_spill] sm:$0xff] %v4419_v53  ;;  %v4421_v54 = vpop.permute.xlu1 %566  ;;  %v4423_v55 = vpop.permute.xlu0 %547 }
  0xd3   : > { %7073 = vst [vmem:[#allocation38_spill] sm:$0xff] %v4421_v54 }
  0xd4   : > { %7074 = vst [vmem:[#allocation39_spill] sm:$0xff] %v4423_v55 }
  0xd7   : > { %720 = vrot.lane.b32.xlu2 %v4318_v29, %s3990_s21 }
  0xd8   : > { %718 = vrot.lane.b32.xlu1 %v4321_v30, %s3990_s21  ;;  %787 = vperm.xlu0 %3639, %v4263_v18  }
  0xd9   : > { %v4430_v56 = vpop.permute.xlu2 %592 }
  0xda   : > { %7075 = vst [vmem:[#allocation40_spill] sm:$0xff] %v4430_v56  ;;  %v4432_v57 = vpop.permute.xlu1 %572  ;;  %v4434_v58 = vpop.permute.xlu0 %570 }
  0xdb   : > { %7076 = vst [vmem:[#allocation41_spill] sm:$0xff] %v4432_v57 }
  0xdc   : > { %7077 = vst [vmem:[#allocation42_spill] sm:$0xff] %v4434_v58 }
  0xdf   : > { %727 = vperm.xlu2 %3638, %v4170_v3  }
  0xe0   : > { %724 = vrot.lane.b32.xlu1 %v4333_v32, %s3990_s21  ;;  %826 = vrot.lane.b32.xlu0 %v4279_v22, %s3992_s25  ;;  %s3910_s21 = scalar_lea.hbm %s6816_s6, 256 }
  0xe1   : > { %v4443_v60 = vpop.permute.xlu2 %599  ;;  %3642 = vset.pattern.permute.xlu0 %v3993_v62 }
  0xe2   : > { %v4441_v59 = vpop.permute.xlu1 %578  ;;  %7079 = vst [vmem:[#allocation44_spill] sm:$0xff] %v4443_v60  ;;  %v4445_v61 = vpop.permute.xlu0 %576 }
  0xe3   : > { %7078 = vst [vmem:[#allocation43_spill] sm:$0xff] %v4441_v59 }
  0xe4   : > { %7080 = vst [vmem:[#allocation45_spill] sm:$0xff] %v4445_v61 }
  0xe7   : > { %739 = vperm.xlu2 %3638, %v4183_v5  }
  0xe8   : > { %735 = vperm.xlu1 %3640, %v4165_v2   ;;  %832 = vrot.lane.b32.xlu0 %v4294_v25, %s3992_s25 }
  0xe9   : > { %v4453_v0 = vpop.permute.xlu2 %611 }
  0xea   : > { %v4451_v63 = vpop.permute.xlu1 %584  ;;  %7082 = vst [vmem:[#allocation47_spill] sm:$0xff] %v4453_v0  ;;  %v4455_v35 = vpop.permute.xlu0 %582 }
  0xeb   : > { %7081 = vst [vmem:[#allocation46_spill] sm:$0xff] %v4451_v63 }
  0xec   : > { %7083 = vst [vmem:[#allocation48_spill] sm:$0xff] %v4455_v35 }
  0xef   : > { %747 = vperm.xlu2 %3638, %v4178_v4  }
  0xf0   : > { %743 = vperm.xlu1 %3640, %v4160_v1   ;;  %838 = vrot.lane.b32.xlu0 %v4309_v28, %s3992_s25 }
  0xf1   : > { %v4463_v44 = vpop.permute.xlu2 %619 }
  0xf2   : > { %v4461_v19 = vpop.permute.xlu1 %590  ;;  %7085 = vst [vmem:[#allocation50_spill] sm:$0xff] %v4463_v44  ;;  %v4465_v59 = vpop.permute.xlu0 %588 }
  0xf3   : > { %7084 = vst [vmem:[#allocation49_spill] sm:$0xff] %v4461_v19 }
  0xf4   : > { %7086 = vst [vmem:[#allocation51_spill] sm:$0xff] %v4465_v59 }
  0xf7   : > { %759 = vperm.xlu2 %3638, %v4196_v7  }
  0xf8   : > { %755 = vperm.xlu1 %3640, %v4201_v8   ;;  %844 = vrot.lane.b32.xlu0 %v4324_v31, %s3992_s25 }
  0xf9   : > { %v4473_v56 = vpop.permute.xlu2 %631 }
  0xfa   : > { %v4471_v63 = vpop.permute.xlu1 %596  ;;  %7087 = vst [vmem:[#allocation52_spill] sm:$0xff] %v4473_v56  ;;  %v4475_v52 = vpop.permute.xlu0 %594 }
  0xff   : > { %771 = vperm.xlu2 %3638, %v4214_v10  }
 0x100   : > { %767 = vperm.xlu1 %3640, %v4219_v11   ;;  %850 = vrot.lane.b32.xlu0 %v4336_v33, %s3992_s25 }
 0x101   : > { %v4483_v49 = vpop.permute.xlu2 %643 }
 0x102   : > { %v4481_v51 = vpop.permute.xlu1 %607  ;;  %7089 = vst [vmem:[#allocation54_spill] sm:$0xff] %v4483_v49  ;;  %v4485_v19 = vpop.permute.xlu0 %698 }
 0x103   : > { %7088 = vst [vmem:[#allocation53_spill] sm:$0xff] %v4481_v51 }
 0x104   : > { %7090 = vst [vmem:[#allocation55_spill] sm:$0xff] %v4485_v19 }
 0x107   : > { %783 = vperm.xlu2 %3638, %v4234_v13  }
 0x108   : > { %779 = vperm.xlu1 %3640, %v4239_v14   ;;  %859 = vperm.xlu0 %3642, %v4188_v6  }
 0x109   : > { %v4492_v50 = vpop.permute.xlu2 %655 }
 0x10a   : > { %v4490_v53 = vpop.permute.xlu1 %615  ;;  %7092 = vst [vmem:[#allocation57_spill] sm:$0xff] %v4492_v50  ;;  %v4494_v47 = vpop.permute.xlu0 %704 }
 0x10b   : > { %7091 = vst [vmem:[#allocation56_spill] sm:$0xff] %v4490_v53 }
 0x10c   : > { %7093 = vst [vmem:[#allocation58_spill] sm:$0xff] %v4494_v47 }
 0x10f   : > { %824 = vrot.lane.b32.xlu2 %v4255_v16, %s3992_s25 }
 0x110   : > { %822 = vrot.lane.b32.xlu1 %v4258_v17, %s3992_s25  ;;  %879 = vperm.xlu0 %3642, %v4206_v9  }
 0x111   : > { %3641 = vset.pattern.permute.xlu2 %v3993_v62  ;;  %v4503_v49 = vpop.permute.xlu2 %696  ;;  %3643 = vset.pattern.permute.xlu1 %v3993_v62 }
 0x112   : > { %v4501_v19 = vpop.permute.xlu1 %627  ;;  %7095 = vst [vmem:[#allocation60_spill] sm:$0xff] %v4503_v49  ;;  %v4505_v59 = vpop.permute.xlu0 %710 }
 0x113   : > { %7094 = vst [vmem:[#allocation59_spill] sm:$0xff] %v4501_v19 }
 0x114   : > { %7096 = vst [vmem:[#allocation61_spill] sm:$0xff] %v4505_v59 }
 0x117   : > { %830 = vrot.lane.b32.xlu2 %v4273_v20, %s3992_s25 }
 0x118   : > { %828 = vrot.lane.b32.xlu1 %v4276_v21, %s3992_s25  ;;  %891 = vperm.xlu0 %3642, %v4224_v12  }
 0x119   : > { %v4514_v53 = vpop.permute.xlu2 %702 }
 0x11a   : > { %v4512_v47 = vpop.permute.xlu1 %639  ;;  %7098 = vst [vmem:[#allocation63_spill] sm:$0xff] %v4514_v53  ;;  %v4516_v51 = vpop.permute.xlu0 %716 }
 0x11b   : > { %7097 = vst [vmem:[#allocation62_spill] sm:$0xff] %v4512_v47 }
 0x11c   : > { %7099 = vst [vmem:[#allocation64_spill] sm:$0xff] %v4516_v51 }
 0x11f   : > { %836 = vrot.lane.b32.xlu2 %v4288_v23, %s3992_s25 }
 0x120   : > { %834 = vrot.lane.b32.xlu1 %v4291_v24, %s3992_s25  ;;  %903 = vperm.xlu0 %3642, %v4244_v15  }
 0x121   : > { %v4525_v49 = vpop.permute.xlu2 %708 }
 0x122   : > { %v4523_v62 = vpop.permute.xlu1 %651  ;;  %7101 = vst [vmem:[#allocation66_spill] sm:$0xff] %v4525_v49  ;;  %v4527_v59 = vpop.permute.xlu0 %722 }
 0x123   : > { %7100 = vst [vmem:[#allocation65_spill] sm:$0xff] %v4523_v62 }
 0x127   : > { %842 = vrot.lane.b32.xlu2 %v4303_v26, %s3992_s25 }
 0x128   : > { %840 = vrot.lane.b32.xlu1 %v4306_v27, %s3992_s25  ;;  %915 = vperm.xlu0 %3642, %v4263_v18  }
 0x129   : > { %v4536_v51 = vpop.permute.xlu2 %714 }
 0x12a   : > { %v4534_v53 = vpop.permute.xlu1 %694  ;;  %7103 = vst [vmem:[#allocation68_spill] sm:$0xff] %v4536_v51  ;;  %v4538_v47 = vpop.permute.xlu0 %731 }
 0x12b   : > { %7102 = vst [vmem:[#allocation67_spill] sm:$0xff] %v4534_v53  ;;  %v3995_v53 = vmov 4  }
 0x12c   : > { %7104 = vst [vmem:[#allocation69_spill] sm:$0xff] %v4538_v47 }
 0x12f   : > { %848 = vrot.lane.b32.xlu2 %v4318_v29, %s3992_s25 }
 0x130   : > { %846 = vrot.lane.b32.xlu1 %v4321_v30, %s3992_s25  ;;  %954 = vrot.lane.b32.xlu0 %v4279_v22, %s3994_s23 }
 0x131   : > { %v4548_v62 = vpop.permute.xlu2 %720  ;;  %3645 = vset.pattern.permute.xlu0 %v3995_v53 }
 0x132   : > { %v4546_v49 = vpop.permute.xlu1 %700  ;;  %7106 = vst [vmem:[#allocation71_spill] sm:$0xff] %v4548_v62  ;;  %v4550_v19 = vpop.permute.xlu0 %751 }
 0x133   : > { %7105 = vst [vmem:[#allocation70_spill] sm:$0xff] %v4546_v49 }
 0x134   : > { %7107 = vst [vmem:[#allocation72_spill] sm:$0xff] %v4550_v19 }
 0x137   : > { %855 = vperm.xlu2 %3641, %v4170_v3  }
 0x138   : > { %852 = vrot.lane.b32.xlu1 %v4333_v32, %s3992_s25  ;;  %960 = vrot.lane.b32.xlu0 %v4294_v25, %s3994_s23 }
 0x139   : > { %v4559_v47 = vpop.permute.xlu2 %727 }
 0x13a   : > { %v4557_v51 = vpop.permute.xlu1 %706  ;;  %7109 = vst [vmem:[#allocation74_spill] sm:$0xff] %v4559_v47  ;;  %v4561_v58 = vpop.permute.xlu0 %763 }
 0x13b   : > { %7108 = vst [vmem:[#allocation73_spill] sm:$0xff] %v4557_v51 }
 0x13c   : > { %7110 = vst [vmem:[#allocation75_spill] sm:$0xff] %v4561_v58 }
 0x13f   : > { %867 = vperm.xlu2 %3641, %v4183_v5  }
 0x140   : > { %863 = vperm.xlu1 %3643, %v4165_v2   ;;  %966 = vrot.lane.b32.xlu0 %v4309_v28, %s3994_s23 }
 0x141   : > { %v4569_v19 = vpop.permute.xlu2 %739 }
 0x142   : > { %v4567_v62 = vpop.permute.xlu1 %712  ;;  %7112 = vst [vmem:[#allocation77_spill] sm:$0xff] %v4569_v19  ;;  %v4571_v49 = vpop.permute.xlu0 %775 }
 0x143   : > { %7111 = vst [vmem:[#allocation76_spill] sm:$0xff] %v4567_v62 }
 0x144   : > { %7113 = vst [vmem:[#allocation78_spill] sm:$0xff] %v4571_v49 }
 0x147   : > { %875 = vperm.xlu2 %3641, %v4178_v4  }
 0x148   : > { %871 = vperm.xlu1 %3643, %v4160_v1   ;;  %972 = vrot.lane.b32.xlu0 %v4324_v31, %s3994_s23 }
 0x149   : > { %v4579_v47 = vpop.permute.xlu2 %747 }
 0x14a   : > { %v4577_v58 = vpop.permute.xlu1 %718  ;;  %7115 = vst [vmem:[#allocation80_spill] sm:$0xff] %v4579_v47  ;;  %v4581_v51 = vpop.permute.xlu0 %787 }
 0x14b   : > { %7114 = vst [vmem:[#allocation79_spill] sm:$0xff] %v4577_v58 }
 0x14c   : > { %7116 = vst [vmem:[#allocation81_spill] sm:$0xff] %v4581_v51 }
 0x14f   : > { %887 = vperm.xlu2 %3641, %v4196_v7  }
 0x150   : > { %883 = vperm.xlu1 %3643, %v4201_v8   ;;  %978 = vrot.lane.b32.xlu0 %v4336_v33, %s3994_s23 }
 0x151   : > { %v4589_v49 = vpop.permute.xlu2 %759 }
 0x152   : > { %v4587_v62 = vpop.permute.xlu1 %724  ;;  %7117 = vst [vmem:[#allocation82_spill] sm:$0xff] %v4589_v49  ;;  %v4591_v19 = vpop.permute.xlu0 %826 }
 0x153   : > { %7118 = vst [vmem:[#allocation83_spill] sm:$0xff] %v4591_v19 }
 0x157   : > { %899 = vperm.xlu2 %3641, %v4214_v10  }
 0x158   : > { %895 = vperm.xlu1 %3643, %v4219_v11   ;;  %987 = vperm.xlu0 %3645, %v4188_v6  }
 0x159   : > { %v4598_v47 = vpop.permute.xlu2 %771 }
 0x15a   : > { %v4596_v58 = vpop.permute.xlu1 %735  ;;  %7120 = vst [vmem:[#allocation85_spill] sm:$0xff] %v4598_v47  ;;  %v4600_v56 = vpop.permute.xlu0 %832 }
 0x15b   : > { %7119 = vst [vmem:[#allocation84_spill] sm:$0xff] %v4596_v58 }
 0x15c   : > { %7121 = vst [vmem:[#allocation86_spill] sm:$0xff] %v4600_v56 }
 0x15f   : > { %911 = vperm.xlu2 %3641, %v4234_v13  }
 0x160   : > { %907 = vperm.xlu1 %3643, %v4239_v14   ;;  %1007 = vperm.xlu0 %3645, %v4206_v9  }
 0x161   : > { %v4607_v19 = vpop.permute.xlu2 %783 }
 0x162   : > { %v4605_v49 = vpop.permute.xlu1 %743  ;;  %7123 = vst [vmem:[#allocation88_spill] sm:$0xff] %v4607_v19  ;;  %v4609_v35 = vpop.permute.xlu0 %838 }
 0x163   : > { %7122 = vst [vmem:[#allocation87_spill] sm:$0xff] %v4605_v49 }
 0x164   : > { %7124 = vst [vmem:[#allocation89_spill] sm:$0xff] %v4609_v35 }
 0x167   : > { %952 = vrot.lane.b32.xlu2 %v4255_v16, %s3994_s23 }
 0x168   : > { %950 = vrot.lane.b32.xlu1 %v4258_v17, %s3994_s23  ;;  %1019 = vperm.xlu0 %3645, %v4224_v12  }
 0x169   : > { %3644 = vset.pattern.permute.xlu2 %v3995_v53  ;;  %v4618_v47 = vpop.permute.xlu2 %824  ;;  %3646 = vset.pattern.permute.xlu1 %v3995_v53 }
 0x16a   : > { %v4616_v56 = vpop.permute.xlu1 %755  ;;  %7126 = vst [vmem:[#allocation91_spill] sm:$0xff] %v4618_v47  ;;  %v4620_v58 = vpop.permute.xlu0 %844 }
 0x16b   : > { %7125 = vst [vmem:[#allocation90_spill] sm:$0xff] %v4616_v56 }
 0x16c   : > { %7127 = vst [vmem:[#allocation92_spill] sm:$0xff] %v4620_v58 }
 0x16f   : > { %958 = vrot.lane.b32.xlu2 %v4273_v20, %s3994_s23 }
 0x170   : > { %956 = vrot.lane.b32.xlu1 %v4276_v21, %s3994_s23  ;;  %1031 = vperm.xlu0 %3645, %v4244_v15  }
 0x171   : > { %v4629_v49 = vpop.permute.xlu2 %830 }
 0x172   : > { %v4627_v35 = vpop.permute.xlu1 %767  ;;  %7129 = vst [vmem:[#allocation94_spill] sm:$0xff] %v4629_v49  ;;  %v4631_v44 = vpop.permute.xlu0 %850 }
 0x173   : > { %7128 = vst [vmem:[#allocation93_spill] sm:$0xff] %v4627_v35 }
 0x177   : > { %964 = vrot.lane.b32.xlu2 %v4288_v23, %s3994_s23 }
 0x178   : > { %962 = vrot.lane.b32.xlu1 %v4291_v24, %s3994_s23  ;;  %1043 = vperm.xlu0 %3645, %v4263_v18  }
 0x179   : > { %v4640_v58 = vpop.permute.xlu2 %836 }
 0x17a   : > { %v4638_v53 = vpop.permute.xlu1 %779  ;;  %7131 = vst [vmem:[#allocation96_spill] sm:$0xff] %v4640_v58  ;;  %v4642_v47 = vpop.permute.xlu0 %859 }
 0x17b   : > { %7130 = vst [vmem:[#allocation95_spill] sm:$0xff] %v4638_v53  ;;  %v3997_v53 = vmov 5  }
 0x17c   : > { %7132 = vst [vmem:[#allocation97_spill] sm:$0xff] %v4642_v47 }
 0x17f   : > { %970 = vrot.lane.b32.xlu2 %v4303_v26, %s3994_s23 }
 0x180   : > { %968 = vrot.lane.b32.xlu1 %v4306_v27, %s3994_s23  ;;  %1082 = vrot.lane.b32.xlu0 %v4279_v22, %s3996_s30 }
 0x181   : > { %v4652_v35 = vpop.permute.xlu2 %842  ;;  %3648 = vset.pattern.permute.xlu0 %v3997_v53 }
 0x182   : > { %v4650_v49 = vpop.permute.xlu1 %822  ;;  %7134 = vst [vmem:[#allocation99_spill] sm:$0xff] %v4652_v35  ;;  %v4654_v56 = vpop.permute.xlu0 %879 }
 0x183   : > { %7133 = vst [vmem:[#allocation98_spill] sm:$0xff] %v4650_v49 }
 0x184   : > { %7135 = vst [vmem:[#allocation100_spill] sm:$0xff] %v4654_v56 }
 0x187   : > { %976 = vrot.lane.b32.xlu2 %v4318_v29, %s3994_s23 }
 0x188   : > { %974 = vrot.lane.b32.xlu1 %v4321_v30, %s3994_s23  ;;  %1088 = vrot.lane.b32.xlu0 %v4294_v25, %s3996_s30 }
 0x189   : > { %v4664_v47 = vpop.permute.xlu2 %848 }
 0x18a   : > { %v4662_v58 = vpop.permute.xlu1 %828  ;;  %7137 = vst [vmem:[#allocation102_spill] sm:$0xff] %v4664_v47  ;;  %v4666_v49 = vpop.permute.xlu0 %891 }
 0x18b   : > { %7136 = vst [vmem:[#allocation101_spill] sm:$0xff] %v4662_v58 }
 0x18c   : > { %7138 = vst [vmem:[#allocation103_spill] sm:$0xff] %v4666_v49 }
 0x18f   : > { %983 = vperm.xlu2 %3644, %v4170_v3  }
 0x190   : > { %980 = vrot.lane.b32.xlu1 %v4333_v32, %s3994_s23  ;;  %1094 = vrot.lane.b32.xlu0 %v4309_v28, %s3996_s30 }
 0x191   : > { %v4675_v56 = vpop.permute.xlu2 %855 }
 0x192   : > { %v4673_v35 = vpop.permute.xlu1 %834  ;;  %7140 = vst [vmem:[#allocation105_spill] sm:$0xff] %v4675_v56  ;;  %v4677_v61 = vpop.permute.xlu0 %903 }
 0x193   : > { %7139 = vst [vmem:[#allocation104_spill] sm:$0xff] %v4673_v35 }
 0x194   : > { %7141 = vst [vmem:[#allocation106_spill] sm:$0xff] %v4677_v61 }
 0x197   : > { %995 = vperm.xlu2 %3644, %v4183_v5  }
 0x198   : > { %991 = vperm.xlu1 %3646, %v4165_v2   ;;  %1100 = vrot.lane.b32.xlu0 %v4324_v31, %s3996_s30 }
 0x199   : > { %v4685_v47 = vpop.permute.xlu2 %867 }
 0x19a   : > { %v4683_v58 = vpop.permute.xlu1 %840  ;;  %7143 = vst [vmem:[#allocation108_spill] sm:$0xff] %v4685_v47  ;;  %v4687_v49 = vpop.permute.xlu0 %915 }
 0x19b   : > { %7142 = vst [vmem:[#allocation107_spill] sm:$0xff] %v4683_v58 }
 0x19c   : > { %7144 = vst [vmem:[#allocation109_spill] sm:$0xff] %v4687_v49 }
 0x19f   : > { %1003 = vperm.xlu2 %3644, %v4178_v4  }
 0x1a0   : > { %999 = vperm.xlu1 %3646, %v4160_v1   ;;  %1106 = vrot.lane.b32.xlu0 %v4336_v33, %s3996_s30 }
 0x1a1   : > { %v4695_v35 = vpop.permute.xlu2 %875 }
 0x1a2   : > { %v4693_v56 = vpop.permute.xlu1 %846  ;;  %7146 = vst [vmem:[#allocation111_spill] sm:$0xff] %v4695_v35  ;;  %v4697_v61 = vpop.permute.xlu0 %954 }
 0x1a3   : > { %7145 = vst [vmem:[#allocation110_spill] sm:$0xff] %v4693_v56 }
 0x1a4   : > { %7147 = vst [vmem:[#allocation112_spill] sm:$0xff] %v4697_v61 }
 0x1a7   : > { %1015 = vperm.xlu2 %3644, %v4196_v7  }
 0x1a8   : > { %1011 = vperm.xlu1 %3646, %v4201_v8   ;;  %1115 = vperm.xlu0 %3648, %v4188_v6  }
 0x1a9   : > { %v4704_v58 = vpop.permute.xlu2 %887 }
 0x1aa   : > { %v4702_v47 = vpop.permute.xlu1 %852  ;;  %7148 = vst [vmem:[#allocation113_spill] sm:$0xff] %v4704_v58  ;;  %v4706_v0 = vpop.permute.xlu0 %960 }
 0x1ab   : > { %7149 = vst [vmem:[#allocation114_spill] sm:$0xff] %v4706_v0 }
 0x1af   : > { %1027 = vperm.xlu2 %3644, %v4214_v10  }
 0x1b0   : > { %1023 = vperm.xlu1 %3646, %v4219_v11   ;;  %1135 = vperm.xlu0 %3648, %v4206_v9  }
 0x1b1   : > { %v4713_v61 = vpop.permute.xlu2 %899 }
 0x1b2   : > { %v4711_v35 = vpop.permute.xlu1 %863  ;;  %7151 = vst [vmem:[#allocation116_spill] sm:$0xff] %v4713_v61  ;;  %v4715_v56 = vpop.permute.xlu0 %966 }
 0x1b3   : > { %7150 = vst [vmem:[#allocation115_spill] sm:$0xff] %v4711_v35 }
 0x1b4   : > { %7152 = vst [vmem:[#allocation117_spill] sm:$0xff] %v4715_v56 }
 0x1b7   : > { %1039 = vperm.xlu2 %3644, %v4234_v13  }
 0x1b8   : > { %1035 = vperm.xlu1 %3646, %v4239_v14   ;;  %1147 = vperm.xlu0 %3648, %v4224_v12  }
 0x1b9   : > { %v4722_v0 = vpop.permute.xlu2 %911 }
 0x1ba   : > { %v4720_v58 = vpop.permute.xlu1 %871  ;;  %7154 = vst [vmem:[#allocation119_spill] sm:$0xff] %v4722_v0  ;;  %v4724_v57 = vpop.permute.xlu0 %972 }
 0x1bb   : > { %7153 = vst [vmem:[#allocation118_spill] sm:$0xff] %v4720_v58 }
 0x1bc   : > { %7155 = vst [vmem:[#allocation120_spill] sm:$0xff] %v4724_v57 }
 0x1bf   : > { %1080 = vrot.lane.b32.xlu2 %v4255_v16, %s3996_s30 }
 0x1c0   : > { %1078 = vrot.lane.b32.xlu1 %v4258_v17, %s3996_s30  ;;  %1159 = vperm.xlu0 %3648, %v4244_v15  }
 0x1c1   : > { %3647 = vset.pattern.permute.xlu2 %v3997_v53  ;;  %v4733_v35 = vpop.permute.xlu2 %952  ;;  %3649 = vset.pattern.permute.xlu1 %v3997_v53 }
 0x1c2   : > { %v4731_v56 = vpop.permute.xlu1 %883  ;;  %7157 = vst [vmem:[#allocation122_spill] sm:$0xff] %v4733_v35  ;;  %v4735_v61 = vpop.permute.xlu0 %978 }
 0x1c3   : > { %7156 = vst [vmem:[#allocation121_spill] sm:$0xff] %v4731_v56 }
 0x1c7   : > { %1086 = vrot.lane.b32.xlu2 %v4273_v20, %s3996_s30 }
 0x1c8   : > { %1084 = vrot.lane.b32.xlu1 %v4276_v21, %s3996_s30  ;;  %1171 = vperm.xlu0 %3648, %v4263_v18  }
 0x1c9   : > { %v4744_v58 = vpop.permute.xlu2 %958 }
 0x1ca   : > { %v4742_v57 = vpop.permute.xlu1 %895  ;;  %7159 = vst [vmem:[#allocation124_spill] sm:$0xff] %v4744_v58  ;;  %v4746_v60 = vpop.permute.xlu0 %987 }
 0x1cb   : > { %7158 = vst [vmem:[#allocation123_spill] sm:$0xff] %v4742_v57  ;;  %v3999_v57 = vmov 6  }
 0x1cc   : > { %7160 = vst [vmem:[#allocation125_spill] sm:$0xff] %v4746_v60 }
 0x1cf   : > { %1092 = vrot.lane.b32.xlu2 %v4288_v23, %s3996_s30 }
 0x1d0   : > { %1090 = vrot.lane.b32.xlu1 %v4291_v24, %s3996_s30  ;;  %1210 = vrot.lane.b32.xlu0 %v4279_v22, %s3998_s10 }
 0x1d1   : > { %v4756_v35 = vpop.permute.xlu2 %964  ;;  %3651 = vset.pattern.permute.xlu0 %v3999_v57 }
 0x1d2   : > { %v4754_v53 = vpop.permute.xlu1 %907  ;;  %7162 = vst [vmem:[#allocation127_spill] sm:$0xff] %v4756_v35  ;;  %v4758_v56 = vpop.permute.xlu0 %1007 }
 0x1d3   : > { %7161 = vst [vmem:[#allocation126_spill] sm:$0xff] %v4754_v53 }
 0x1d4   : > { %7163 = vst [vmem:[#allocation128_spill] sm:$0xff] %v4758_v56 }
 0x1d7   : > { %1098 = vrot.lane.b32.xlu2 %v4303_v26, %s3996_s30 }
 0x1d8   : > { %1096 = vrot.lane.b32.xlu1 %v4306_v27, %s3996_s30  ;;  %1216 = vrot.lane.b32.xlu0 %v4294_v25, %s3998_s10 }
 0x1d9   : > { %v4768_v58 = vpop.permute.xlu2 %970 }
 0x1da   : > { %v4766_v60 = vpop.permute.xlu1 %950  ;;  %7165 = vst [vmem:[#allocation130_spill] sm:$0xff] %v4768_v58  ;;  %v4770_v53 = vpop.permute.xlu0 %1019 }
 0x1db   : > { %7164 = vst [vmem:[#allocation129_spill] sm:$0xff] %v4766_v60 }
 0x1dc   : > { %7166 = vst [vmem:[#allocation131_spill] sm:$0xff] %v4770_v53 }
 0x1df   : > { %1104 = vrot.lane.b32.xlu2 %v4318_v29, %s3996_s30 }
 0x1e0   : > { %1102 = vrot.lane.b32.xlu1 %v4321_v30, %s3996_s30  ;;  %1222 = vrot.lane.b32.xlu0 %v4309_v28, %s3998_s10 }
 0x1e1   : > { %v4780_v56 = vpop.permute.xlu2 %976 }
 0x1e2   : > { %v4778_v35 = vpop.permute.xlu1 %956  ;;  %7168 = vst [vmem:[#allocation133_spill] sm:$0xff] %v4780_v56  ;;  %v4782_v54 = vpop.permute.xlu0 %1031 }
 0x1e3   : > { %7167 = vst [vmem:[#allocation132_spill] sm:$0xff] %v4778_v35 }
 0x1e4   : > { %7169 = vst [vmem:[#allocation134_spill] sm:$0xff] %v4782_v54 }
 0x1e7   : > { %1111 = vperm.xlu2 %3647, %v4170_v3  }
 0x1e8   : > { %1108 = vrot.lane.b32.xlu1 %v4333_v32, %s3996_s30  ;;  %1228 = vrot.lane.b32.xlu0 %v4324_v31, %s3998_s10 }
 0x1e9   : > { %v4791_v53 = vpop.permute.xlu2 %983 }
 0x1ea   : > { %v4789_v60 = vpop.permute.xlu1 %962  ;;  %7171 = vst [vmem:[#allocation136_spill] sm:$0xff] %v4791_v53  ;;  %v4793_v58 = vpop.permute.xlu0 %1043 }
 0x1eb   : > { %7170 = vst [vmem:[#allocation135_spill] sm:$0xff] %v4789_v60 }
 0x1ec   : > { %7172 = vst [vmem:[#allocation137_spill] sm:$0xff] %v4793_v58 }
 0x1ef   : > { %1123 = vperm.xlu2 %3647, %v4183_v5  }
 0x1f0   : > { %1119 = vperm.xlu1 %3649, %v4165_v2   ;;  %1234 = vrot.lane.b32.xlu0 %v4336_v33, %s3998_s10 }
 0x1f1   : > { %v4801_v56 = vpop.permute.xlu2 %995 }
 0x1f2   : > { %v4799_v35 = vpop.permute.xlu1 %968  ;;  %7174 = vst [vmem:[#allocation139_spill] sm:$0xff] %v4801_v56  ;;  %v4803_v54 = vpop.permute.xlu0 %1082 }
 0x1f3   : > { %7173 = vst [vmem:[#allocation138_spill] sm:$0xff] %v4799_v35 }
 0x1f4   : > { %7175 = vst [vmem:[#allocation140_spill] sm:$0xff] %v4803_v54 }
 0x1f7   : > { %1131 = vperm.xlu2 %3647, %v4178_v4  }
 0x1f8   : > { %1127 = vperm.xlu1 %3649, %v4160_v1   ;;  %1243 = vperm.xlu0 %3651, %v4188_v6  }
 0x1f9   : > { %v4810_v60 = vpop.permute.xlu2 %1003 }
 0x1fa   : > { %v4808_v53 = vpop.permute.xlu1 %974  ;;  %7177 = vst [vmem:[#allocation142_spill] sm:$0xff] %v4810_v60  ;;  %v4812_v48 = vpop.permute.xlu0 %1088 }
 0x1fb   : > { %7176 = vst [vmem:[#allocation141_spill] sm:$0xff] %v4808_v53 }
 0x1fc   : > { %7178 = vst [vmem:[#allocation143_spill] sm:$0xff] %v4812_v48 }
 0x1ff   : > { %1143 = vperm.xlu2 %3647, %v4196_v7  }
 0x200   : > { %1139 = vperm.xlu1 %3649, %v4201_v8   ;;  %1263 = vperm.xlu0 %3651, %v4206_v9  }
 0x201   : > { %v4819_v54 = vpop.permute.xlu2 %1015 }
 0x202   : > { %v4817_v56 = vpop.permute.xlu1 %980  ;;  %7179 = vst [vmem:[#allocation144_spill] sm:$0xff] %v4819_v54  ;;  %v4821_v35 = vpop.permute.xlu0 %1094 }
 0x203   : > { %7180 = vst [vmem:[#allocation145_spill] sm:$0xff] %v4821_v35 }
 0x207   : > { %1155 = vperm.xlu2 %3647, %v4214_v10  }
 0x208   : > { %1151 = vperm.xlu1 %3649, %v4219_v11   ;;  %1275 = vperm.xlu0 %3651, %v4224_v12  }
 0x209   : > { %v4828_v48 = vpop.permute.xlu2 %1027 }
 0x20a   : > { %v4826_v60 = vpop.permute.xlu1 %991  ;;  %7182 = vst [vmem:[#allocation147_spill] sm:$0xff] %v4828_v48  ;;  %v4830_v53 = vpop.permute.xlu0 %1100 }
 0x20b   : > { %7181 = vst [vmem:[#allocation146_spill] sm:$0xff] %v4826_v60 }
 0x20c   : > { %7183 = vst [vmem:[#allocation148_spill] sm:$0xff] %v4830_v53 }
 0x20f   : > { %1167 = vperm.xlu2 %3647, %v4234_v13  }
 0x210   : > { %1163 = vperm.xlu1 %3649, %v4239_v14   ;;  %1287 = vperm.xlu0 %3651, %v4244_v15  }
 0x211   : > { %v4837_v35 = vpop.permute.xlu2 %1039 }
 0x212   : > { %v4835_v54 = vpop.permute.xlu1 %999  ;;  %7185 = vst [vmem:[#allocation150_spill] sm:$0xff] %v4837_v35  ;;  %v4839_v46 = vpop.permute.xlu0 %1106 }
 0x213   : > { %7184 = vst [vmem:[#allocation149_spill] sm:$0xff] %v4835_v54  ;;  %v7189_v54 = vmov 0  }
 0x217   : > { %1208 = vrot.lane.b32.xlu2 %v4255_v16, %s3998_s10 }
 0x218   : > { %1206 = vrot.lane.b32.xlu1 %v4258_v17, %s3998_s10  ;;  %1299 = vperm.xlu0 %3651, %v4263_v18  }
 0x219   : > { %3650 = vset.pattern.permute.xlu2 %v3999_v57  ;;  %v4848_v53 = vpop.permute.xlu2 %1080  ;;  %3652 = vset.pattern.permute.xlu1 %v3999_v57 }
 0x21a   : > { %v4846_v60 = vpop.permute.xlu1 %1011  ;;  %7187 = vst [vmem:[#allocation152_spill] sm:$0xff] %v4848_v53  ;;  %v4850_v48 = vpop.permute.xlu0 %1115 }
 0x21b   : > { %7186 = vst [vmem:[#allocation151_spill] sm:$0xff] %v4846_v60 }
 0x21c   : > { %7188 = vst [vmem:[#allocation153_spill] sm:$0xff] %v4850_v48 }
 0x21f   : > { %1214 = vrot.lane.b32.xlu2 %v4273_v20, %s3998_s10 }
 0x220   : > { %1212 = vrot.lane.b32.xlu1 %v4276_v21, %s3998_s10  ;;  %3653 = vset.pattern.permute.xlu0 %v7189_v54 }
 0x221   : > { %603 = vperm.xlu0 %3653, %v4188_v6   ;;  %v4860_v43 = vpop.permute.xlu2 %1086 }
 0x222   : > { %v4858_v45 = vpop.permute.xlu1 %1023  ;;  %7191 = vst [vmem:[#allocation155_spill] sm:$0xff] %v4860_v43  ;;  %v4862_v60 = vpop.permute.xlu0 %1135 }
 0x223   : > { %7190 = vst [vmem:[#allocation154_spill] sm:$0xff] %v4858_v45 }
 0x224   : > { %7192 = vst [vmem:[#allocation156_spill] sm:$0xff] %v4862_v60 }
 0x227   : > { %1220 = vrot.lane.b32.xlu2 %v4288_v23, %s3998_s10 }
 0x228   : > { %1218 = vrot.lane.b32.xlu1 %v4291_v24, %s3998_s10 }
 0x229   : > { %623 = vperm.xlu0 %3653, %v4206_v9   ;;  %v4871_v48 = vpop.permute.xlu2 %1092 }
 0x22a   : > { %v4869_v57 = vpop.permute.xlu1 %1035  ;;  %7194 = vst [vmem:[#allocation158_spill] sm:$0xff] %v4871_v48  ;;  %v4873_v53 = vpop.permute.xlu0 %1147 }
 0x22b   : > { %7193 = vst [vmem:[#allocation157_spill] sm:$0xff] %v4869_v57 }
 0x22c   : > { %7195 = vst [vmem:[#allocation159_spill] sm:$0xff] %v4873_v53 }
 0x22f   : > { %1226 = vrot.lane.b32.xlu2 %v4303_v26, %s3998_s10 }
 0x230   : > { %1224 = vrot.lane.b32.xlu1 %v4306_v27, %s3998_s10 }
 0x231   : > { %635 = vperm.xlu0 %3653, %v4224_v12   ;;  %v4882_v43 = vpop.permute.xlu2 %1098 }
 0x232   : > { %v4880_v6 = vpop.permute.xlu1 %1078  ;;  %v4884_v60 = vpop.permute.xlu0 %1159 }
 0x233   : > { %7196 = vst [vmem:[#allocation160_spill] sm:$0xff] %v4880_v6 }
 0x234   : > { %7197 = vst [vmem:[#allocation161_spill] sm:$0xff] %v4884_v60 }
 0x237   : > { %1232 = vrot.lane.b32.xlu2 %v4318_v29, %s3998_s10 }
 0x238   : > { %1230 = vrot.lane.b32.xlu1 %v4321_v30, %s3998_s10 }
 0x239   : > { %647 = vperm.xlu0 %3653, %v4244_v15   ;;  %v4893_v27 = vpop.permute.xlu2 %1104  ;;  %v440_v15 = vld [vmem:[%s6815_s5 + $0x10] sm:$0xff] }
 0x23a   : > { %v4891_v9 = vpop.permute.xlu1 %1084  ;;  %v4895_v48 = vpop.permute.xlu0 %1171 }
 0x23b   : > { %7198 = vst [vmem:[#allocation162_spill] sm:$0xff] %v4891_v9 }
 0x23c   : > { %7199 = vst [vmem:[#allocation163_spill] sm:$0xff] %v4895_v48 }
 0x23f   : > { %1239 = vperm.xlu2 %3650, %v4170_v3  }
 0x240   : > { %1236 = vrot.lane.b32.xlu1 %v4333_v32, %s3998_s10 }
 0x241   : > { %659 = vperm.xlu0 %3653, %v4263_v18   ;;  %v4903_v30 = vpop.permute.xlu2 %1111 }
 0x242   : > { %v4901_v12 = vpop.permute.xlu1 %1090  ;;  %7201 = vst [vmem:[#allocation165_spill] sm:$0xff] %v4903_v30  ;;  %v4905_v6 = vpop.permute.xlu0 %1210  ;;  %v445_v30 = vld [vmem:[%s6815_s5 + $0x38] sm:$0xff] }
 0x243   : > { %7200 = vst [vmem:[#allocation164_spill] sm:$0xff] %v4901_v12  ;;  %v442_v12 = vld [vmem:[%s6815_s5 + $0x20] sm:$0xff] }
 0x244   : > { %7202 = vst [vmem:[#allocation166_spill] sm:$0xff] %v4905_v6 }
 0x247   : > { %1251 = vperm.xlu2 %3650, %v4183_v5  }
 0x248   : > { %1247 = vperm.xlu1 %3652, %v4165_v2  }
 0x249   : > { %1354 = vperm.xlu0 %3653, %v440_v15   ;;  %v4914_v3 = vpop.permute.xlu2 %1123  ;;  %v448_v15 = vld [vmem:[%s6815_s5 + $0x50] sm:$0xff] }
 0x24a   : > { %v4912_v9 = vpop.permute.xlu1 %1096  ;;  %7204 = vst [vmem:[#allocation168_spill] sm:$0xff] %v4914_v3  ;;  %v4916_v18 = vpop.permute.xlu0 %1216 }
 0x24b   : > { %7203 = vst [vmem:[#allocation167_spill] sm:$0xff] %v4912_v9  ;;  %v565_v9 = vmul.f32 %v4423_v55, %v4333_v32  ;;  %v933_v32 = vmul.f32 %v4687_v49, %v4702_v47  ;;  %v1061_v47 = vmul.f32 %v4793_v58, %v4817_v56  ;;  %v555_v56 = vmul.f32 %v4353_v36, %v4294_v25  ;;  %v3785_v36 = vld [vmem:[%s4252_s9 + $0x48] sm:$0xff] }
 0x24c   : > { %7205 = vst [vmem:[#allocation169_spill] sm:$0xff] %v4916_v18 }
 0x24f   : > { %1259 = vperm.xlu2 %3650, %v4178_v4  }
 0x250   : > { %1255 = vperm.xlu1 %3652, %v4160_v1  }
 0x251   : > { %1379 = vperm.xlu0 %3653, %v445_v30   ;;  %v4925_v2 = vpop.permute.xlu2 %1131  ;;  %v451_v30 = vld [vmem:[%s6815_s5 + $0x68] sm:$0xff] }
 0x252   : > { %v4923_v6 = vpop.permute.xlu1 %1102  ;;  %7206 = vst [vmem:[#allocation170_spill] sm:$0xff] %v4925_v2  ;;  %v4927_v5 = vpop.permute.xlu0 %1222 }
 0x253   : > { %7207 = vst [vmem:[#allocation171_spill] sm:$0xff] %v4927_v5  ;;  %v453_v5 = vld [vmem:[%s6815_s5 + $0x78] sm:$0xff] }
 0x257   : > { %1271 = vperm.xlu2 %3650, %v4196_v7  }
 0x258   : > { %1267 = vperm.xlu1 %3652, %v4201_v8  }
 0x259   : > { %1394 = vperm.xlu0 %3653, %v448_v15   ;;  %v4936_v1 = vpop.permute.xlu2 %1143  ;;  %v6890_v15 = vmov 0.0  }
 0x25a   : > { %v4934_v3 = vpop.permute.xlu1 %1108  ;;  %7208 = vst [vmem:[#allocation172_spill] sm:$0xff] %v4936_v1  ;;  %v4938_v4 = vpop.permute.xlu0 %1228 }
 0x25b   : > { %7209 = vst [vmem:[#allocation173_spill] sm:$0xff] %v4938_v4  ;;  %v676_v4 = vmul.f32 %v4492_v50, %v4475_v52  ;;  %v5160_v50 = vld [vmem:[%s4252_s9 + $0x50] sm:$0xff] }
 0x25c   : > { %7250 = vst [vmem:[#allocation210_spill] sm:$0xff] %v5160_v50 }
 0x25f   : > { %1283 = vperm.xlu2 %3650, %v4214_v10  }
 0x260   : > { %1279 = vperm.xlu1 %3652, %v4219_v11  }
 0x261   : > { %1409 = vperm.xlu0 %3653, %v451_v30   ;;  %v4947_v8 = vpop.permute.xlu2 %1155  ;;  %v438_v30 = vld [vmem:[%s6815_s5] sm:$0xff] }
 0x262   : > { %v4945_v18 = vpop.permute.xlu1 %1119  ;;  %7211 = vst [vmem:[#allocation175_spill] sm:$0xff] %v4947_v8  ;;  %v4949_v7 = vpop.permute.xlu0 %1234 }
 0x263   : > { %7210 = vst [vmem:[#allocation174_spill] sm:$0xff] %v4945_v18 }
 0x267   : > { %1295 = vperm.xlu2 %3650, %v4234_v13  }
 0x268   : > { %1291 = vperm.xlu1 %3652, %v4239_v14   ;;  %v439_v14 = vld [vmem:[%s6815_s5 + $0x8] sm:$0xff] }
 0x269   : > { %3657 = vrot.lane.b32.xlu0 %v6890_v15, %s3988_s4  ;;  %v4957_v11 = vpop.permute.xlu2 %1167 }
 0x26a   : > { %v4955_v2 = vpop.permute.xlu1 %1127  ;;  %7213 = vst [vmem:[#allocation177_spill] sm:$0xff] %v4957_v11  ;;  %v4959_v10 = vpop.permute.xlu0 %1243  ;;  %v1188_v25 = vmul.f32 %v4957_v11, %v4839_v46  ;;  %v3782_v46 = vld [vmem:[%s4252_s9 + $0x30] sm:$0xff] }
 0x26b   : > { %7212 = vst [vmem:[#allocation176_spill] sm:$0xff] %v4955_v2  ;;  %v441_v2 = vld [vmem:[%s6815_s5 + $0x18] sm:$0xff] }
 0x26c   : > { %7214 = vst [vmem:[#allocation178_spill] sm:$0xff] %v4959_v10 }
 0x26f   : > { %3655 = vset.pattern.permute.xlu2 %v7189_v54 }
 0x270   : > { %3654 = vset.pattern.permute.xlu1 %v7189_v54  ;;  %1349 = vperm.xlu2 %3655, %v439_v14  }
 0x271   : > { %1344 = vperm.xlu1 %3654, %v438_v30   ;;  %3672 = vrot.lane.b32.xlu0 %v6890_v15, %s3988_s4  ;;  %v4973_v10 = vpop.permute.xlu2 %1208 }
 0x272   : > { %v4971_v13 = vpop.permute.xlu1 %1139  ;;  %7216 = vst [vmem:[#allocation180_spill] sm:$0xff] %v4973_v10  ;;  %v4975_v18 = vpop.permute.xlu0 %1263  ;;  %v443_v10 = vld [vmem:[%s6815_s5 + $0x28] sm:$0xff] }
 0x273   : > { %7215 = vst [vmem:[#allocation179_spill] sm:$0xff] %v4971_v13  ;;  %v450_v13 = vld [vmem:[%s6815_s5 + $0x60] sm:$0xff] }
 0x274   : > { %7217 = vst [vmem:[#allocation181_spill] sm:$0xff] %v4975_v18  ;;  %v444_v18 = vld [vmem:[%s6815_s5 + $0x30] sm:$0xff] }
 0x278   : > { %1364 = vperm.xlu2 %3655, %v442_v12  }
 0x279   : > { %1359 = vperm.xlu1 %3654, %v441_v2   ;;  %3687 = vrot.lane.b32.xlu0 %v6890_v15, %s3988_s4  ;;  %v4987_v30 = vpop.permute.xlu2 %1214 }
 0x27a   : > { %v4985_v54 = vpop.permute.xlu1 %1151  ;;  %7219 = vst [vmem:[#allocation183_spill] sm:$0xff] %v4987_v30  ;;  %v4989_v14 = vpop.permute.xlu0 %1275  ;;  %v446_v30 = vld [vmem:[%s6815_s5 + $0x40] sm:$0xff] }
 0x27b   : > { %7218 = vst [vmem:[#allocation182_spill] sm:$0xff] %v4985_v54 }
 0x27c   : > { %7220 = vst [vmem:[#allocation184_spill] sm:$0xff] %v4989_v14  ;;  %v447_v14 = vld [vmem:[%s6815_s5 + $0x48] sm:$0xff] }
 0x280   : > { %1374 = vperm.xlu2 %3655, %v444_v18  }
 0x281   : > { %1369 = vperm.xlu1 %3654, %v443_v10   ;;  %1684 = vrot.lane.b32.xlu0 %v4255_v16, %s3988_s4  ;;  %v5001_v2 = vpop.permute.xlu2 %1220 }
 0x282   : > { %v4999_v12 = vpop.permute.xlu1 %1163  ;;  %7222 = vst [vmem:[#allocation186_spill] sm:$0xff] %v5001_v2  ;;  %v5003_v15 = vpop.permute.xlu0 %1287  ;;  %v449_v2 = vld [vmem:[%s6815_s5 + $0x58] sm:$0xff] }
 0x283   : > { %7221 = vst [vmem:[#allocation185_spill] sm:$0xff] %v4999_v12 }
 0x284   : > { %7223 = vst [vmem:[#allocation187_spill] sm:$0xff] %v5003_v15 }
 0x288   : > { %1389 = vperm.xlu2 %3655, %v447_v14  }
 0x289   : > { %1384 = vperm.xlu1 %3654, %v446_v30   ;;  %1690 = vrot.lane.b32.xlu0 %v4273_v20, %s3988_s4  ;;  %v5015_v18 = vpop.permute.xlu2 %1226 }
 0x28a   : > { %v5013_v16 = vpop.permute.xlu1 %1206  ;;  %7225 = vst [vmem:[#allocation189_spill] sm:$0xff] %v5015_v18  ;;  %v5017_v10 = vpop.permute.xlu0 %1299  ;;  %v564_v18 = vmul.f32 %v4375_v41, %v4336_v33  ;;  %v7252_v41 = vld [vmem:[#allocation38_spill] sm:$0xff] }
 0x28b   : > { %7224 = vst [vmem:[#allocation188_spill] sm:$0xff] %v5013_v16  ;;  %v452_v16 = vld [vmem:[%s6815_s5 + $0x70] sm:$0xff] }
 0x28c   : > { %7226 = vst [vmem:[#allocation190_spill] sm:$0xff] %v5017_v10 }
 0x290   : > { %1404 = vperm.xlu2 %3655, %v450_v13  }
 0x291   : > { %1399 = vperm.xlu1 %3654, %v449_v2   ;;  %1696 = vrot.lane.b32.xlu0 %v4288_v23, %s3988_s4  ;;  %v5029_v30 = vpop.permute.xlu2 %1232 }
 0x292   : > { %v5027_v20 = vpop.permute.xlu1 %1212 }
 0x293   : > { %7227 = vst [vmem:[#allocation191_spill] sm:$0xff] %v5027_v20  ;;  %v5031_v14 = vpop.permute.xlu0 %603  ;;  %v7232_v20 = vmov 0.0  }
 0x294   : > { %7228 = vst [vmem:[#allocation192_spill] sm:$0xff] %v5031_v14 }
 0x298   : > { %1419 = vperm.xlu2 %3655, %v453_v5  }
 0x299   : > { %1414 = vperm.xlu1 %3654, %v452_v16   ;;  %1702 = vrot.lane.b32.xlu0 %v4303_v26, %s3988_s4  ;;  %v5043_v13 = vpop.permute.xlu2 %1239 }
 0x29a   : > { %v5041_v23 = vpop.permute.xlu1 %1218  ;;  %7230 = vst [vmem:[#allocation194_spill] sm:$0xff] %v5043_v13 }
 0x29b   : > { %7229 = vst [vmem:[#allocation193_spill] sm:$0xff] %v5041_v23  ;;  %v5045_v2 = vpop.permute.xlu0 %623 }
 0x29c   : > { %7231 = vst [vmem:[#allocation195_spill] sm:$0xff] %v5045_v2 }
 0x2a0   : > { %3667 = vrot.lane.b32.xlu2 %v7232_v20, %s3988_s4 }
 0x2a1   : > { %3662 = vrot.lane.b32.xlu1 %v7232_v20, %s3988_s4  ;;  %1708 = vrot.lane.b32.xlu0 %v4318_v29, %s3988_s4  ;;  %v5055_v5 = vpop.permute.xlu2 %1251 }
 0x2a2   : > { %v5053_v16 = vpop.permute.xlu1 %1224  ;;  %7234 = vst [vmem:[#allocation197_spill] sm:$0xff] %v5055_v5 }
 0x2a3   : > { %7233 = vst [vmem:[#allocation196_spill] sm:$0xff] %v5053_v16  ;;  %v5057_v26 = vpop.permute.xlu0 %635 }
 0x2a4   : > { %7235 = vst [vmem:[#allocation198_spill] sm:$0xff] %v5057_v26 }
 0x2a8   : > { %3682 = vrot.lane.b32.xlu2 %v7232_v20, %s3988_s4 }
 0x2a9   : > { %3677 = vrot.lane.b32.xlu1 %v7232_v20, %s3988_s4  ;;  %1747 = vrot.lane.b32.xlu0 %v4258_v17, %s4001_s20  ;;  %v5067_v23 = vpop.permute.xlu2 %1259 }
 0x2aa   : > { %v5065_v13 = vpop.permute.xlu1 %1230  ;;  %7236 = vst [vmem:[#allocation199_spill] sm:$0xff] %v5067_v23 }
 0x2ab   : > { %v5069_v29 = vpop.permute.xlu0 %647 }
 0x2ac   : > { %7237 = vst [vmem:[#allocation200_spill] sm:$0xff] %v5069_v29 }
 0x2b0   : > { %1682 = vrot.lane.b32.xlu2 %v4258_v17, %s3988_s4  ;;  %v805_v17 = vmul.f32 %v4581_v51, %v4587_v62  ;;  %v7268_v51 = vld [vmem:[#allocation34_spill] sm:$0xff] }
 0x2b1   : > { %3692 = vrot.lane.b32.xlu1 %v7232_v20, %s3988_s4  ;;  %1753 = vrot.lane.b32.xlu0 %v4276_v21, %s4001_s20  ;;  %v5077_v16 = vpop.permute.xlu2 %1271 }
 0x2b2   : > { %v1237_v5 = vpop.permute.xlu1 %1236  ;;  %7238 = vst [vmem:[#allocation201_spill] sm:$0xff] %v5077_v16  ;;  %v804_v16 = vmul.f32 %v4607_v19, %v4527_v59  ;;  %v692_v59 = vadd.f32 %v676_v4, %v564_v18  ;;  %v561_v4 = vmul.f32 %v4365_v38, %v4324_v31 }
 0x2b3   : > { %v5079_v53 = vpop.permute.xlu0 %659 }
 0x2b4   : > { %7239 = vst [vmem:[#allocation202_spill] sm:$0xff] %v5079_v53  ;;  %v677_v23 = vmul.f32 %v5079_v53, %v4471_v63  ;;  %v932_v63 = vmul.f32 %v4722_v0, %v4631_v44  ;;  %v7248_v53 = vld [vmem:[#allocation30_spill] sm:$0xff]  ;;  %v7266_v0 = vld [vmem:[#allocation31_spill] sm:$0xff] }
 0x2b5   : > { %v5151_v11 = vmul.f32 %v3782_v46, %v7248_v53  ;;  %v7255_v53 = vld [vmem:[#allocation47_spill] sm:$0xff] }
 0x2b6   : > { %v693_v1 = vadd.f32 %v677_v23, %v565_v9 }
 0x2b8   : > { %v821_v55 = vadd.f32 %v805_v17, %v693_v1  ;;  %1688 = vrot.lane.b32.xlu2 %v4276_v21, %s3988_s4  ;;  %v820_v21 = vadd.f32 %v804_v16, %v692_v59  ;;  %v5114_v1 = vld [vmem:[%s4252_s9 + $0x20] sm:$0xff]  ;;  %v1189_v16 = vmul.f32 %v4895_v48, %v4934_v3  ;;  %v5138_v59 = vld [vmem:[%s4252_s9 + $0x8] sm:$0xff]  ;;  %v7247_v3 = vld [vmem:[#allocation29_spill] sm:$0xff] }
 0x2b9   : > { %1686 = vrot.lane.b32.xlu1 %v4279_v22, %s3988_s4  ;;  %1759 = vrot.lane.b32.xlu0 %v4291_v24, %s4001_s20  ;;  %v5103_v33 = vpop.permute.xlu2 %1283  ;;  %v1060_v24 = vmul.f32 %v4837_v35, %v4735_v61  ;;  %7243 = vst [vmem:[#allocation206_spill] sm:$0xff] %v5114_v1  ;;  %v554_v44 = vmul.f32 %v5114_v1, %v4347_v34  ;;  %v5125_v61 = vld [vmem:[%s4252_s9 + $0x10] sm:$0xff]  ;;  %v3778_v17 = vld [vmem:[%s4252_s9] sm:$0xff]  ;;  %v7251_v48 = vld [vmem:[#allocation32_spill] sm:$0xff] }
 0x2ba   : > { %v5101_v52 = vpop.permute.xlu1 %1247  ;;  %7241 = vst [vmem:[#allocation204_spill] sm:$0xff] %v5103_v33  ;;  %v949_v22 = vadd.f32 %v933_v32, %v821_v55  ;;  %v558_v55 = vmul.f32 %v4359_v37, %v4309_v28  ;;  %v552_v18 = vmul.f32 %v5125_v61, %v4367_v39  ;;  %v948_v23 = vadd.f32 %v932_v63, %v820_v21  ;;  %v3779_v32 = vld [vmem:[%s4252_s9 + $0x18] sm:$0xff] }
 0x2bb   : > { %7240 = vst [vmem:[#allocation203_spill] sm:$0xff] %v5101_v52  ;;  %v5109_v62 = vpop.permute.xlu0 %1354  ;;  %v550_v28 = vmul.f32 %v3778_v17, %v4369_v40  ;;  %v553_v31 = vmul.f32 %v3779_v32, %v4377_v42  ;;  %v5145_v63 = vld [vmem:[%s4252_s9 + $0x38] sm:$0xff]  ;;  %v5154_v17 = vld [vmem:[%s4252_s9 + $0x28] sm:$0xff]  ;;  %v560_v35 = vmul.f32 %v5160_v50, %v7251_v48  ;;  %v7254_v42 = vld [vmem:[#allocation41_spill] sm:$0xff] }
 0x2bc   : > { %7242 = vst [vmem:[#allocation205_spill] sm:$0xff] %v5109_v62  ;;  %v1077_v9 = vadd.f32 %v1061_v47, %v949_v22  ;;  %v7245_v47 = vld [vmem:[#allocation27_spill] sm:$0xff]  ;;  %v557_v21 = vmul.f32 %v5145_v63, %v7247_v3  ;;  %v1076_v32 = vadd.f32 %v1060_v24, %v948_v23  ;;  %v7253_v3 = vld [vmem:[#allocation44_spill] sm:$0xff]  ;;  %v665_v38 = vmul.f32 %v7255_v53, %v7254_v42  ;;  %v7257_v40 = vld [vmem:[#allocation50_spill] sm:$0xff] }
 0x2bd   : > { %7244 = vst [vmem:[#allocation207_spill] sm:$0xff] %v5125_v61  ;;  %v5142_v22 = vmul.f32 %v5138_v59, %v7245_v47  ;;  %v662_v34 = vmul.f32 %v7253_v3, %v7252_v41  ;;  %v7256_v47 = vld [vmem:[#allocation45_spill] sm:$0xff]  ;;  %v7261_v23 = vld [vmem:[#allocation52_spill] sm:$0xff]  ;;  %v1317_v41 = vmul.f32 %v5017_v10, %v1237_v5  ;;  %v7262_v53 = vld [vmem:[#allocation42_spill] sm:$0xff] }
 0x2be   : > { %7246 = vst [vmem:[#allocation208_spill] sm:$0xff] %v5145_v63  ;;  %v1205_v58 = vadd.f32 %v1189_v16, %v1077_v9  ;;  %v667_v37 = vmul.f32 %v7257_v40, %v7256_v47  ;;  %v7260_v9 = vld [vmem:[#allocation48_spill] sm:$0xff]  ;;  %v1204_v3 = vadd.f32 %v1188_v25, %v1076_v32  ;;  %v7263_v47 = vld [vmem:[#allocation53_spill] sm:$0xff]  ;;  %v7264_v48 = vld [vmem:[#allocation51_spill] sm:$0xff] }
 0x2bf   : > { %7249 = vst [vmem:[#allocation209_spill] sm:$0xff] %v5154_v17  ;;  %v670_v16 = vmul.f32 %v7261_v23, %v7260_v9  ;;  %v664_v40 = vmul.f32 %v7263_v47, %v7262_v53  ;;  %v7265_v39 = vld [vmem:[#allocation54_spill] sm:$0xff]  ;;  %v7267_v62 = vld [vmem:[#allocation56_spill] sm:$0xff]  ;;  %v7269_v50 = vld [vmem:[#allocation59_spill] sm:$0xff] }
 0x2c0   : > { %1694 = vrot.lane.b32.xlu2 %v3782_v46, %s3988_s4  ;;  %v673_v49 = vmul.f32 %v7265_v39, %v7264_v48  ;;  %v666_v19 = vmul.f32 %v7267_v62, %v7266_v0  ;;  %v669_v63 = vmul.f32 %v7269_v50, %v7268_v51  ;;  %v7271_v23 = vld [vmem:[#allocation37_spill] sm:$0xff]  ;;  %v7272_v5 = vld [vmem:[#allocation62_spill] sm:$0xff]  ;;  %v5197_v52 = vld [vmem:[%s4252_s9 + $0x68] sm:$0xff] }
 0x2c1   : > { %1692 = vrot.lane.b32.xlu1 %v5154_v17, %s3988_s4  ;;  %1765 = vrot.lane.b32.xlu0 %v3785_v36, %s4001_s20  ;;  %v5174_v24 = vpop.permute.xlu2 %1295  ;;  %v672_v25 = vmul.f32 %v7272_v5, %v7271_v23  ;;  %v7273_v32 = vld [vmem:[#allocation49_spill] sm:$0xff]  ;;  %7275 = vst [vmem:[#allocation48_spill] sm:$0xff] %v5197_v52  ;;  %v7276_v48 = vld [vmem:[#allocation35_spill] sm:$0xff]  ;;  %v7277_v51 = vld [vmem:[#allocation36_spill] sm:$0xff]  ;;  %v5205_v23 = vadd.f32 %v662_v34, %v550_v28 }
 0x2c2   : > { %v5172_v46 = vpop.permute.xlu1 %1255  ;;  %7259 = vst [vmem:[#allocation41_spill] sm:$0xff] %v5174_v24  ;;  %v1316_v42 = vmul.f32 %v5174_v24, %v4949_v7  ;;  %v674_v7 = vmul.f32 %v5069_v29, %v7273_v32  ;;  %v1333_v24 = vadd.f32 %v1317_v41, %v1205_v58  ;;  %v7274_v53 = vld [vmem:[#allocation33_spill] sm:$0xff]  ;;  %v563_v0 = vmul.f32 %v5197_v52, %v7276_v48  ;;  %v3787_v62 = vld [vmem:[%s4252_s9 + $0x60] sm:$0xff]  ;;  %v7278_v50 = vld [vmem:[#allocation40_spill] sm:$0xff] }
 0x2c3   : > { %7258 = vst [vmem:[#allocation38_spill] sm:$0xff] %v5172_v46  ;;  %v5189_v9 = vpop.permute.xlu0 %1379  ;;  %v559_v47 = vmul.f32 %v3785_v36, %v7274_v53  ;;  %v562_v39 = vmul.f32 %v3787_v62, %v7277_v51  ;;  %v681_v5 = vadd.f32 %v665_v38, %v553_v31  ;;  %v683_v32 = vadd.f32 %v667_v37, %v555_v56  ;;  %v5208_v61 = vld [vmem:[%s4252_s9 + $0x40] sm:$0xff]  ;;  %v7280_v34 = vld [vmem:[#allocation70_spill] sm:$0xff]  ;;  %v7281_v28 = vld [vmem:[#allocation77_spill] sm:$0xff] }
 0x2c4   : > { %7270 = vst [vmem:[#allocation45_spill] sm:$0xff] %v5189_v9  ;;  %v1332_v10 = vadd.f32 %v1316_v42, %v1204_v3  ;;  %v7279_v9 = vld [vmem:[#allocation65_spill] sm:$0xff]  ;;  %v686_v58 = vadd.f32 %v670_v16, %v558_v55  ;;  %v680_v41 = vadd.f32 %v664_v40, %v552_v18  ;;  %v689_v42 = vadd.f32 %v673_v49, %v561_v4  ;;  %v7282_v37 = vld [vmem:[#allocation58_spill] sm:$0xff]  ;;  %v7289_v4 = vld [vmem:[#allocation55_spill] sm:$0xff] }
 0x2c5   : > { %v675_v17 = vmul.f32 %v7279_v9, %v7278_v50  ;;  %v682_v29 = vadd.f32 %v666_v19, %v554_v44  ;;  %v685_v53 = vadd.f32 %v669_v63, %v557_v21  ;;  %v688_v1 = vadd.f32 %v672_v25, %v560_v35  ;;  %v7286_v40 = vld [vmem:[#allocation78_spill] sm:$0xff]  ;;  %v7287_v35 = vld [vmem:[#allocation61_spill] sm:$0xff]  ;;  %v7291_v31 = vld [vmem:[#allocation64_spill] sm:$0xff] }
 0x2c6   : > { %v1341_v3 = vpack.c.bf16 %v1333_v24, %v1332_v10  ;;  %v690_v46 = vadd.f32 %v674_v7, %v562_v39  ;;  %v793_v38 = vmul.f32 %v7281_v28, %v7280_v34  ;;  %v7283_v10 = vld [vmem:[#allocation80_spill] sm:$0xff]  ;;  %v7285_v39 = vld [vmem:[#allocation79_spill] sm:$0xff]  ;;  %v7288_v44 = vld [vmem:[#allocation82_spill] sm:$0xff] }
 0x2c7   : > { %v691_v50 = vadd.f32 %v675_v17, %v563_v0  ;;  %v795_v56 = vmul.f32 %v7283_v10, %v7282_v37  ;;  %v802_v49 = vmul.f32 %v7286_v40, %v7285_v39  ;;  %v798_v55 = vmul.f32 %v7288_v44, %v7287_v35  ;;  %v7292_v63 = vld [vmem:[#allocation85_spill] sm:$0xff]  ;;  %v7294_v24 = vld [vmem:[#allocation60_spill] sm:$0xff]  ;;  %v7296_v7 = vld [vmem:[#allocation63_spill] sm:$0xff] }
 0x2c8   : > { %1700 = vrot.lane.b32.xlu2 %v3785_v36, %s3988_s4  ;;  %1470 = vmatpush.bf16.msra.mxu0 %v1341_v3  ;;  %v7290_v36 = vld [vmem:[#allocation84_spill] sm:$0xff]  ;;  %v801_v21 = vmul.f32 %v7292_v63, %v7291_v31  ;;  %v7295_v16 = vld [vmem:[#allocation69_spill] sm:$0xff]  ;;  %v7297_v0 = vld [vmem:[#allocation87_spill] sm:$0xff] }
 0x2c9   : > { %1698 = vrot.lane.b32.xlu1 %v5208_v61, %s3988_s4  ;;  %1771 = vrot.lane.b32.xlu0 %v3787_v62, %s4001_s20  ;;  %v792_v18 = vmul.f32 %v7290_v36, %v7289_v4  ;;  %v5232_v25 = vmul.f32 %v7295_v16, %v7294_v24  ;;  %v794_v34 = vmul.f32 %v7297_v0, %v7296_v7  ;;  %v7298_v37 = vld [vmem:[#allocation66_spill] sm:$0xff]  ;;  %v7300_v35 = vld [vmem:[#allocation68_spill] sm:$0xff]  ;;  %v7301_v48 = vld [vmem:[#allocation93_spill] sm:$0xff] }
 0x2ca   : > { %v5218_v19 = vpop.permute.xlu1 %1267  ;;  %3515 = vmatpush.bf16.msra.mxu2 %v1341_v3  ;;  %v5228_v17 = vpop.permute.xlu2 %1349  ;;  %v7299_v39 = vld [vmem:[#allocation90_spill] sm:$0xff]  ;;  %v800_v51 = vmul.f32 %v7301_v48, %v7300_v35  ;;  %v7303_v44 = vld [vmem:[#allocation73_spill] sm:$0xff]  ;;  %v7304_v31 = vld [vmem:[#allocation72_spill] sm:$0xff]  ;;  %v818_v7 = vadd.f32 %v802_v49, %v690_v46  ;;  %v5250_v0 = vadd.f32 %v793_v38, %v681_v5 }
 0x2cb   : > { %7284 = vst [vmem:[#allocation42_spill] sm:$0xff] %v5218_v19  ;;  %v797_v9 = vmul.f32 %v7299_v39, %v7298_v37  ;;  %v5240_v4 = vpop.permute.xlu0 %1394  ;;  %v796_v3 = vmul.f32 %v7304_v31, %v7303_v44  ;;  %v7305_v63 = vld [vmem:[#allocation67_spill] sm:$0xff]  ;;  %v7307_v24 = vld [vmem:[#allocation76_spill] sm:$0xff]  ;;  %v5252_v37 = vadd.f32 %v795_v56, %v683_v32  ;;  %v814_v44 = vadd.f32 %v798_v55, %v686_v58  ;;  %v7312_v28 = vld [vmem:[#allocation110_spill] sm:$0xff] }
 0x2cc   : > { %7293 = vst [vmem:[#allocation51_spill] sm:$0xff] %v5228_v17  ;;  %v7306_v17 = vld [vmem:[#allocation74_spill] sm:$0xff]  ;;  %v7308_v40 = vld [vmem:[#allocation75_spill] sm:$0xff]  ;;  %v5258_v31 = vadd.f32 %v792_v18, %v680_v41  ;;  %v816_v5 = vadd.f32 %v800_v51, %v688_v1  ;;  %v7314_v32 = vld [vmem:[#allocation89_spill] sm:$0xff] }
 0x2cd   : > { %7302 = vst [vmem:[#allocation31_spill] sm:$0xff] %v5240_v4  ;;  %v5246_v10 = vmul.f32 %v7306_v17, %v7305_v63  ;;  %v799_v36 = vmul.f32 %v7308_v40, %v7307_v24  ;;  %v7309_v39 = vld [vmem:[#allocation71_spill] sm:$0xff]  ;;  %v7311_v4 = vld [vmem:[#allocation46_spill] sm:$0xff]  ;;  %v817_v63 = vadd.f32 %v801_v21, %v689_v42  ;;  %v5262_v40 = vadd.f32 %v794_v34, %v682_v29  ;;  %v7315_v38 = vld [vmem:[#allocation113_spill] sm:$0xff] }
 0x2ce   : > { %v7310_v35 = vld [vmem:[#allocation95_spill] sm:$0xff]  ;;  %v671_v16 = vmul.f32 %v5057_v26, %v7311_v4  ;;  %v7313_v17 = vld [vmem:[#allocation106_spill] sm:$0xff]  ;;  %v5264_v46 = vadd.f32 %v797_v9, %v685_v53  ;;  %v926_v56 = vmul.f32 %v7315_v38, %v7314_v32  ;;  %v7318_v58 = vld [vmem:[#allocation92_spill] sm:$0xff] }
 0x2cf   : > { %v803_v48 = vmul.f32 %v7310_v35, %v7309_v39  ;;  %v930_v24 = vmul.f32 %v7313_v17, %v7312_v28  ;;  %v7316_v49 = vld [vmem:[#allocation91_spill] sm:$0xff]  ;;  %v7317_v39 = vld [vmem:[#allocation97_spill] sm:$0xff]  ;;  %v7319_v41 = vld [vmem:[#allocation116_spill] sm:$0xff] }
 0x2d0   : > { %v5270_v35 = vmul.f32 %v7317_v39, %v7316_v49  ;;  %v929_v55 = vmul.f32 %v7319_v41, %v7318_v58  ;;  %v5275_v42 = vld [vmem:[%s4252_s9 + $0x58] sm:$0xff]  ;;  %1706 = vrot.lane.b32.xlu2 %v3787_v62, %s3988_s4  ;;  %v7321_v1 = vld [vmem:[#allocation104_spill] sm:$0xff]  ;;  %v7323_v28 = vld [vmem:[#allocation43_spill] sm:$0xff]  ;;  %v687_v21 = vadd.f32 %v671_v16, %v559_v47 }
 0x2d1   : > { %7320 = vst [vmem:[#allocation34_spill] sm:$0xff] %v5275_v42  ;;  %1704 = vrot.lane.b32.xlu1 %v5275_v42, %s3988_s4  ;;  %v946_v29 = vadd.f32 %v930_v24, %v818_v7  ;;  %v819_v9 = vadd.f32 %v803_v48, %v691_v50  ;;  %v7322_v53 = vld [vmem:[#allocation100_spill] sm:$0xff]  ;;  %v668_v18 = vmul.f32 %v5045_v2, %v7323_v28  ;;  %v3790_v34 = vld [vmem:[%s4252_s9 + $0x78] sm:$0xff]  ;;  %v7326_v49 = vld [vmem:[#allocation105_spill] sm:$0xff] }
 0x2d2   : > { %v924_v51 = vmul.f32 %v7322_v53, %v7321_v1  ;;  %1777 = vrot.lane.b32.xlu0 %v3790_v34, %s4001_s20  ;;  %v5286_v4 = vpop.permute.xlu1 %1279  ;;  %v7325_v32 = vld [vmem:[#allocation98_spill] sm:$0xff]  ;;  %v7327_v26 = vld [vmem:[#allocation107_spill] sm:$0xff]  ;;  %v7331_v1 = vld [vmem:[#allocation141_spill] sm:$0xff]  ;;  %v5298_v28 = vpop.permute.xlu2 %1364 }
 0x2d3   : > { %7324 = vst [vmem:[#allocation37_spill] sm:$0xff] %v5286_v4  ;;  %v5290_v58 = vmul.f32 %v7326_v49, %v7325_v32  ;;  %v7328_v62 = vld [vmem:[#allocation103_spill] sm:$0xff]  ;;  %v7329_v48 = vld [vmem:[#allocation102_spill] sm:$0xff]  ;;  %v7334_v47 = vld [vmem:[#allocation101_spill] sm:$0xff]  ;;  %v942_v32 = vadd.f32 %v926_v56, %v814_v44  ;;  %v684_v44 = vadd.f32 %v668_v18, %v5151_v11  ;;  %v815_v56 = vadd.f32 %v799_v36, %v687_v21 }
 0x2d4   : > { %v927_v7 = vmul.f32 %v7328_v62, %v7327_v26  ;;  %v7330_v50 = vld [vmem:[#allocation126_spill] sm:$0xff]  ;;  %7333 = vst [vmem:[#allocation49_spill] sm:$0xff] %v5298_v28  ;;  %v7335_v16 = vld [vmem:[#allocation108_spill] sm:$0xff]  ;;  %v7337_v53 = vld [vmem:[#allocation111_spill] sm:$0xff]  ;;  %v5310_v62 = vpop.permute.xlu0 %1409 }
 0x2d5   : > { %v931_v24 = vmul.f32 %v7330_v50, %v7329_v48  ;;  %v7332_v17 = vld [vmem:[#allocation134_spill] sm:$0xff]  ;;  %v5302_v2 = vmul.f32 %v7335_v16, %v7334_v47  ;;  %v7338_v49 = vld [vmem:[#allocation99_spill] sm:$0xff]  ;;  %7340 = vst [vmem:[#allocation40_spill] sm:$0xff] %v5310_v62  ;;  %v7351_v11 = vld [vmem:[#allocation120_spill] sm:$0xff] }
 0x2d6   : > { %v1058_v41 = vmul.f32 %v7332_v17, %v7331_v1  ;;  %v7336_v38 = vld [vmem:[#allocation86_spill] sm:$0xff]  ;;  %v7339_v52 = vld [vmem:[#allocation123_spill] sm:$0xff]  ;;  %v945_v1 = vadd.f32 %v929_v55, %v817_v63  ;;  %v7343_v17 = vld [vmem:[#allocation133_spill] sm:$0xff]  ;;  %v1187_v63 = vmul.f32 %v4999_v12, %v4893_v27 }
 0x2d7   : > { %v5306_v39 = vmul.f32 %v7337_v53, %v7336_v38  ;;  %v928_v26 = vmul.f32 %v7339_v52, %v7338_v49  ;;  %v7341_v48 = vld [vmem:[#allocation83_spill] sm:$0xff]  ;;  %v1059_v47 = vmul.f32 %v4869_v57, %v7343_v17  ;;  %v7344_v28 = vld [vmem:[#allocation130_spill] sm:$0xff]  ;;  %v947_v62 = vadd.f32 %v931_v24, %v819_v9  ;;  %v7347_v55 = vld [vmem:[#allocation96_spill] sm:$0xff] }
 0x2d8   : > { %v7342_v50 = vld [vmem:[#allocation115_spill] sm:$0xff]  ;;  %v1074_v16 = vadd.f32 %v1058_v41, %v946_v29  ;;  %v1056_v38 = vmul.f32 %v4858_v45, %v7344_v28  ;;  %v7345_v53 = vld [vmem:[#allocation94_spill] sm:$0xff]  ;;  %v7348_v17 = vld [vmem:[#allocation121_spill] sm:$0xff]  ;;  %1712 = vrot.lane.b32.xlu2 %v3790_v34, %s3988_s4 }
 0x2d9   : > { %v5314_v42 = vmul.f32 %v7342_v50, %v7341_v48  ;;  %v7346_v49 = vld [vmem:[#allocation118_spill] sm:$0xff]  ;;  %v1186_v48 = vmul.f32 %v4884_v60, %v4923_v6  ;;  %v925_v41 = vmul.f32 %v7348_v17, %v7347_v55  ;;  %v944_v29 = vadd.f32 %v928_v26, %v816_v5  ;;  %v7349_v57 = vld [vmem:[#allocation135_spill] sm:$0xff]  ;;  %v7350_v28 = vld [vmem:[#allocation128_spill] sm:$0xff] }
 0x2da   : > { %v5323_v52 = vmul.f32 %v7346_v49, %v7345_v53  ;;  %v1052_v45 = vmul.f32 %v7350_v28, %v7349_v57  ;;  %v7352_v36 = vld [vmem:[#allocation147_spill] sm:$0xff]  ;;  %v1184_v53 = vmul.f32 %v4985_v54, %v4882_v43  ;;  %v5338_v9 = vld [vmem:[%s4252_s9 + $0x70] sm:$0xff]  ;;  %v1075_v6 = vadd.f32 %v1059_v47, %v947_v62  ;;  %v7354_v5 = vld [vmem:[#allocation144_spill] sm:$0xff]  ;;  %3707 = vrot.lane.b32.xlu0 %v7232_v20, %s4001_s20  ;;  %v5347_v57 = vpop.permute.xlu1 %1291  ;;  %v5353_v34 = vpop.permute.xlu2 %1374  ;;  %s3463_s9 = sshll.u32 %s4141_s17, 7 }
 0x2db   : > { %v1057_v18 = vmul.f32 %v7352_v36, %v7351_v11  ;;  %1710 = vrot.lane.b32.xlu1 %v5338_v9, %s3988_s4  ;;  %v1202_v27 = vadd.f32 %v1186_v48, %v1074_v16  ;;  %v7353_v21 = vld [vmem:[#allocation117_spill] sm:$0xff]  ;;  %v812_v26 = vadd.f32 %v796_v3, %v684_v44  ;;  %7355 = vst [vmem:[#allocation70_spill] sm:$0xff] %v5347_v57  ;;  %v7356_v11 = vld [vmem:[#allocation28_spill] sm:$0xff]  ;;  %v7358_v3 = vld [vmem:[#allocation138_spill] sm:$0xff]  ;;  %s5657_s27 = scalar_lea.vmem [#allocation8], %s3463_s9 }
 0x2dc   : > { %v1054_v24 = vmul.f32 %v7354_v5, %v7353_v21  ;;  %v1072_v55 = vadd.f32 %v1056_v38, %v944_v29  ;;  %v943_v43 = vadd.f32 %v927_v7, %v815_v56  ;;  %v663_v54 = vmul.f32 %v5031_v14, %v7356_v11  ;;  %7357 = vst [vmem:[#allocation58_spill] sm:$0xff] %v5353_v34  ;;  %v7359_v47 = vld [vmem:[#allocation131_spill] sm:$0xff]  ;;  %v7360_v48 = vld [vmem:[#allocation148_spill] sm:$0xff]  ;;  %v5361_v38 = vpop.permute.xlu0 %3657  ;;  %v7361_v56 = vld [vmem:[#allocation189_spill] sm:$0xff]  ;;  %s3308_s12 = sshll.u32 %s5657_s27, 4  ;;  %s3309_s12 = int_to_ptr.vmem [resolvable:$true] %s3308_s12 }
 0x2dd   : > { %v1314_v60 = vmul.f32 %v5003_v15, %v5065_v13  ;;  %v1203_v62 = vadd.f32 %v1187_v63, %v1075_v6  ;;  %v1315_v16 = vmul.f32 %v5347_v57, %v5029_v30  ;;  %v1055_v44 = vmul.f32 %v7359_v47, %v7358_v3  ;;  %v7362_v11 = vld [vmem:[#allocation145_spill] sm:$0xff]  ;;  %v7363_v13 = vld [vmem:[#allocation172_spill] sm:$0xff]  ;;  %v7365_v36 = vld [vmem:[#allocation127_spill] sm:$0xff] }
 0x2de   : > { %v1185_v21 = vmul.f32 %v4947_v8, %v7360_v48  ;;  %v1073_v7 = vadd.f32 %v1057_v18, %v945_v1  ;;  %v1312_v29 = vmul.f32 %v5286_v4, %v7361_v56  ;;  %v1182_v14 = vmul.f32 %v7363_v13, %v7362_v11  ;;  %v7364_v12 = vld [vmem:[#allocation173_spill] sm:$0xff]  ;;  %v7366_v5 = vld [vmem:[#allocation151_spill] sm:$0xff] }
 0x2df   : > { %v1330_v15 = vadd.f32 %v1314_v60, %v1202_v27  ;;  %v1331_v63 = vadd.f32 %v1315_v16, %v1203_v62  ;;  %v1200_v6 = vadd.f32 %v1184_v53, %v1072_v55  ;;  %v1313_v30 = vmul.f32 %v5103_v33, %v7364_v12  ;;  %v7367_v47 = vld [vmem:[#allocation167_spill] sm:$0xff]  ;;  %v7370_v27 = vld [vmem:[#allocation201_spill] sm:$0xff]  ;;  %v7371_v12 = vld [vmem:[#allocation158_spill] sm:$0xff] }
 0x2e0   : > { %v1071_v57 = vadd.f32 %v1055_v44, %v943_v43  ;;  %v940_v3 = vadd.f32 %v924_v51, %v812_v26  ;;  %v1053_v48 = vmul.f32 %v7366_v5, %v7365_v36  ;;  %v679_v8 = vadd.f32 %v663_v54, %v5142_v22  ;;  %v7368_v56 = vld [vmem:[#allocation159_spill] sm:$0xff]  ;;  %v7375_v26 = vld [vmem:[#allocation149_spill] sm:$0xff]  ;;  %v7377_v62 = vld [vmem:[#allocation156_spill] sm:$0xff] }
 0x2e1   : > { %v1340_v1 = vpack.c.bf16 %v1331_v63, %v1330_v15  ;;  %v1070_v18 = vadd.f32 %v1054_v24, %v942_v32  ;;  %v1183_v4 = vmul.f32 %v7368_v56, %v7367_v47  ;;  %v1201_v28 = vadd.f32 %v1185_v21, %v1073_v7  ;;  %v7369_v60 = vld [vmem:[#allocation171_spill] sm:$0xff]  ;;  %v7374_v24 = vld [vmem:[#allocation124_spill] sm:$0xff]  ;;  %v7455_v13 = vld [vmem:[#allocation81_spill] sm:$0xff] }
 0x2e2   : > { %v1328_v11 = vadd.f32 %v1312_v29, %v1200_v6  ;;  %v1310_v53 = vmul.f32 %v7370_v27, %v7369_v60  ;;  %v941_v55 = vadd.f32 %v925_v41, %v5264_v46  ;;  %v7372_v43 = vld [vmem:[#allocation179_spill] sm:$0xff]  ;;  %3722 = vrot.lane.b32.xlu0 %v7232_v20, %s4001_s20  ;;  %v1068_v36 = vadd.f32 %v1052_v45, %v940_v3  ;;  %v7376_v41 = vld [vmem:[#allocation164_spill] sm:$0xff]  ;;  %v5392_v44 = vpop.permute.xlu2 %1389  ;;  %v7384_v3 = vld [vmem:[#allocation142_spill] sm:$0xff] }
 0x2e3   : > { %v1181_v51 = vmul.f32 %v7372_v43, %v7371_v12  ;;  %1749 = vrot.lane.b32.xlu1 %v5138_v59, %s4001_s20  ;;  %v7373_v54 = vld [vmem:[#allocation207_spill] sm:$0xff]  ;;  %v1198_v15 = vadd.f32 %v1182_v14, %v1070_v18  ;;  %1471 = vmatpush.bf16.msra.mxu0 %v1340_v1  ;;  %v1329_v22 = vadd.f32 %v1313_v30, %v1201_v28  ;;  %v5390_v59 = vpop.permute.xlu1 %1344  ;;  %v7380_v21 = vld [vmem:[#allocation196_spill] sm:$0xff]  ;;  %v7383_v30 = vld [vmem:[#allocation114_spill] sm:$0xff] }
 0x2e4   : > { %1751 = vrot.lane.b32.xlu2 %v7373_v54, %s4001_s20  ;;  %v1199_v32 = vadd.f32 %v1183_v4, %v1071_v57  ;;  %v1050_v46 = vmul.f32 %v7375_v26, %v7374_v24  ;;  %v1180_v16 = vmul.f32 %v7377_v62, %v7376_v41  ;;  %v807_v47 = vadd.f32 %v5232_v25, %v679_v8  ;;  %v7381_v7 = vld [vmem:[#allocation184_spill] sm:$0xff]  ;;  %v5396_v28 = vpop.permute.xlu0 %3672  ;;  %v7382_v57 = vld [vmem:[#allocation186_spill] sm:$0xff]  ;;  %v7461_v27 = vld [vmem:[#allocation85_spill] sm:$0xff] }
 0x2e5   : > { %3516 = vmatpush.bf16.msra.mxu2 %v1340_v1  ;;  %7378 = vst [vmem:[#allocation79_spill] sm:$0xff] %v5390_v59  ;;  %v1069_v14 = vadd.f32 %v1053_v48, %v941_v55  ;;  %v1311_v29 = vmul.f32 %v7381_v7, %v7380_v21  ;;  %v1339_v45 = vpack.c.bf16 %v1329_v22, %v1328_v11  ;;  %v7385_v1 = vld [vmem:[#allocation155_spill] sm:$0xff]  ;;  %v7386_v18 = vld [vmem:[#allocation176_spill] sm:$0xff]  ;;  %v7388_v54 = vld [vmem:[#allocation146_spill] sm:$0xff] }
 0x2e6   : > { %7379 = vst [vmem:[#allocation61_spill] sm:$0xff] %v5392_v44  ;;  %v1326_v4 = vadd.f32 %v1310_v53, %v1198_v15  ;;  %v1309_v63 = vmul.f32 %v5218_v19, %v7382_v57  ;;  %v939_v6 = vadd.f32 %v5306_v39, %v5252_v37  ;;  %v936_v8 = vadd.f32 %v5314_v42, %v5258_v31  ;;  %v7387_v12 = vld [vmem:[#allocation112_spill] sm:$0xff]  ;;  %v7389_v37 = vld [vmem:[#allocation143_spill] sm:$0xff]  ;;  %v7390_v39 = vld [vmem:[#allocation170_spill] sm:$0xff] }
 0x2e7   : > { %v938_v25 = vadd.f32 %v5323_v52, %v5262_v40  ;;  %v1051_v48 = vmul.f32 %v7384_v3, %v7383_v30  ;;  %v1178_v60 = vmul.f32 %v7386_v18, %v7385_v1  ;;  %1472 = vmatpush.bf16.msra.mxu0 %v1339_v45  ;;  %v1327_v11 = vadd.f32 %v1311_v29, %v1199_v32  ;;  %v7391_v31 = vld [vmem:[#allocation193_spill] sm:$0xff]  ;;  %v7393_v21 = vld [vmem:[#allocation183_spill] sm:$0xff]  ;;  %v7394_v57 = vld [vmem:[#allocation38_spill] sm:$0xff] }
 0x2e8   : > { %v1196_v53 = vadd.f32 %v1180_v16, %v1068_v36  ;;  %v1197_v55 = vadd.f32 %v1181_v51, %v1069_v14  ;;  %v1048_v15 = vmul.f32 %v7388_v54, %v7387_v12  ;;  %v1179_v22 = vmul.f32 %v7390_v39, %v7389_v37  ;;  %v7392_v42 = vld [vmem:[#allocation181_spill] sm:$0xff]  ;;  %v7395_v36 = vld [vmem:[#allocation122_spill] sm:$0xff]  ;;  %v7397_v14 = vld [vmem:[#allocation132_spill] sm:$0xff] }
 0x2e9   : > { %v1308_v24 = vmul.f32 %v7392_v42, %v7391_v31  ;;  %3517 = vmatpush.bf16.msra.mxu2 %v1339_v45  ;;  %v1066_v52 = vadd.f32 %v1050_v46, %v938_v25  ;;  %v1338_v40 = vpack.c.bf16 %v1327_v11, %v1326_v4  ;;  %v1306_v30 = vmul.f32 %v7394_v57, %v7393_v21  ;;  %v7396_v51 = vld [vmem:[#allocation125_spill] sm:$0xff]  ;;  %v7398_v29 = vld [vmem:[#allocation139_spill] sm:$0xff]  ;;  %v7399_v12 = vld [vmem:[#allocation206_spill] sm:$0xff] }
 0x2ea   : > { %v1325_v41 = vadd.f32 %v1309_v63, %v1197_v55  ;;  %v935_v32 = vadd.f32 %v5270_v35, %v807_v47  ;;  %v1047_v16 = vmul.f32 %v7396_v51, %v7395_v36  ;;  %v1049_v1 = vmul.f32 %v7398_v29, %v7397_v14  ;;  %v7400_v37 = vld [vmem:[#allocation209_spill] sm:$0xff]  ;;  %v7401_v45 = vld [vmem:[#allocation140_spill] sm:$0xff]  ;;  %v7402_v4 = vld [vmem:[#allocation174_spill] sm:$0xff] }
 0x2eb   : > { %1755 = vrot.lane.b32.xlu1 %v7399_v12, %s4001_s20  ;;  %v1067_v46 = vadd.f32 %v1051_v48, %v939_v6  ;;  %v1176_v63 = vmul.f32 %v7402_v4, %v7401_v45  ;;  %1473 = vmatpush.bf16.msra.mxu0 %v1338_v40  ;;  %v1324_v25 = vadd.f32 %v1308_v24, %v1196_v53  ;;  %v7403_v35 = vld [vmem:[#allocation169_spill] sm:$0xff]  ;;  %v7404_v47 = vld [vmem:[#allocation199_spill] sm:$0xff]  ;;  %v7405_v21 = vld [vmem:[#allocation162_spill] sm:$0xff]  ;;  %v5435_v12 = vpop.permute.xlu1 %1359 }
 0x2ec   : > { %1757 = vrot.lane.b32.xlu2 %v7400_v37, %s4001_s20  ;;  %v1194_v11 = vadd.f32 %v1178_v60, %v1066_v52  ;;  %v1307_v55 = vmul.f32 %v7404_v47, %v7403_v35  ;;  %v937_v31 = vadd.f32 %v5302_v2, %v5250_v0  ;;  %v7406_v36 = vld [vmem:[#allocation168_spill] sm:$0xff]  ;;  %7407 = vst [vmem:[#allocation55_spill] sm:$0xff] %v5435_v12  ;;  %v5437_v37 = vpop.permute.xlu2 %1404  ;;  %v5439_v45 = vpop.permute.xlu0 %3687  ;;  %v7409_v24 = vld [vmem:[#allocation166_spill] sm:$0xff]  ;;  %v7410_v52 = vld [vmem:[#allocation203_spill] sm:$0xff] }
 0x2ed   : > { %v1177_v14 = vmul.f32 %v7406_v36, %v7405_v21  ;;  %3518 = vmatpush.bf16.msra.mxu2 %v1338_v40  ;;  %7408 = vst [vmem:[#allocation64_spill] sm:$0xff] %v5437_v37  ;;  %v1195_v6 = vadd.f32 %v1179_v22, %v1067_v46  ;;  %v1064_v48 = vadd.f32 %v1048_v15, %v936_v8  ;;  %v7411_v0 = vld [vmem:[#allocation129_spill] sm:$0xff]  ;;  %v7412_v21 = vld [vmem:[#allocation136_spill] sm:$0xff]  ;;  %v7415_v22 = vld [vmem:[#allocation191_spill] sm:$0xff]  ;;  %v3690_v42 = vunpack.i.h.bf16 %v5439_v45 }
 0x2ee   : > { %v1337_v53 = vpack.c.bf16 %v1325_v41, %v1324_v25  ;;  %v1322_v60 = vadd.f32 %v1306_v30, %v1194_v11  ;;  %v1304_v35 = vmul.f32 %v7410_v52, %v7409_v24  ;;  %v1063_v4 = vadd.f32 %v1047_v16, %v935_v32  ;;  %v7413_v18 = vld [vmem:[#allocation152_spill] sm:$0xff]  ;;  %v7414_v19 = vld [vmem:[#allocation153_spill] sm:$0xff] }
 0x2ef   : > { %v806_v2 = vadd.f32 %v5246_v10, %v5205_v23  ;;  %v1046_v40 = vmul.f32 %v7412_v21, %v7411_v0  ;;  %v1065_v47 = vadd.f32 %v1049_v1, %v937_v31  ;;  %v1175_v36 = vmul.f32 %v7414_v19, %v7413_v18  ;;  %v7416_v41 = vld [vmem:[#allocation197_spill] sm:$0xff]  ;;  %v7417_v25 = vld [vmem:[#allocation160_spill] sm:$0xff]  ;;  %v7426_v0 = vld [vmem:[#allocation210_spill] sm:$0xff] }
 0x2f0   : > { %1474 = vmatpush.bf16.msra.mxu0 %v1337_v53  ;;  %v1323_v8 = vadd.f32 %v1307_v55, %v1195_v6  ;;  %v1192_v15 = vadd.f32 %v1176_v63, %v1064_v48  ;;  %v1305_v30 = vmul.f32 %v7416_v41, %v7415_v22  ;;  %v7418_v32 = vld [vmem:[#allocation165_spill] sm:$0xff]  ;;  %v7419_v1 = vld [vmem:[#allocation208_spill] sm:$0xff]  ;;  %v7421_v63 = vld [vmem:[#allocation178_spill] sm:$0xff] }
 0x2f1   : > { %v934_v46 = vadd.f32 %v5290_v58, %v806_v2  ;;  %v1174_v16 = vmul.f32 %v7418_v32, %v7417_v25  ;;  %3519 = vmatpush.bf16.msra.mxu2 %v1337_v53  ;;  %v1193_v10 = vadd.f32 %v1177_v14, %v1065_v47  ;;  %v1191_v24 = vadd.f32 %v1175_v36, %v1063_v4  ;;  %v7420_v18 = vld [vmem:[#allocation180_spill] sm:$0xff]  ;;  %v7423_v48 = vld [vmem:[#allocation194_spill] sm:$0xff]  ;;  %v7454_v39 = vld [vmem:[#allocation93_spill] sm:$0xff] }
 0x2f2   : > { %v1336_v23 = vpack.c.bf16 %v1323_v8, %v1322_v60  ;;  %v1320_v11 = vadd.f32 %v1304_v35, %v1192_v15  ;;  %v1303_v55 = vmul.f32 %v7421_v63, %v7420_v18  ;;  %v7422_v6 = vld [vmem:[#allocation188_spill] sm:$0xff]  ;;  %v3506_v8 = vld [vmem:[#allocation7] sm:$0xff]  ;;  %v3675_v63 = vunpack.i.h.bf16 %v5396_v28  ;;  %v3509_v41 = vld [vmem:[#allocation7 + $0x18] sm:$0xff] }
 0x2f3   : > { %1761 = vrot.lane.b32.xlu1 %v7419_v1, %s4001_s20  ;;  %v1321_v31 = vadd.f32 %v1305_v30, %v1193_v10  ;;  %v1062_v58 = vadd.f32 %v1046_v40, %v934_v46  ;;  %v1302_v2 = vmul.f32 %v7423_v48, %v7422_v6  ;;  %v5462_v53 = vpop.permute.xlu1 %1369  ;;  %v7427_v40 = vld [vmem:[#allocation34_spill] sm:$0xff]  ;;  %v3510_v15 = vld [vmem:[#allocation7 + $0x20] sm:$0xff]  ;;  %v7429_v25 = vld [vmem:[#allocation48_spill] sm:$0xff]  ;;  %v3659_v10 = vunpack.i.l.bf16 %v5361_v38 }
 0x2f4   : > { %1763 = vrot.lane.b32.xlu2 %v5208_v61, %s4001_s20  ;;  %1475 = vmatpush.bf16.msra.mxu0 %v1336_v23  ;;  %7424 = vst [vmem:[#allocation60_spill] sm:$0xff] %v5462_v53  ;;  %v5464_v47 = vpop.permute.xlu2 %1419  ;;  %v1319_v14 = vadd.f32 %v1303_v55, %v1191_v24  ;;  %v1685_v60 = vpop.permute.xlu0 %1684  ;;  %v3511_v1 = vld [vmem:[#allocation7 + $0x28] sm:$0xff]  ;;  %v3689_v32 = vunpack.i.l.bf16 %v5439_v45  ;;  %v7458_v45 = vld [vmem:[#allocation82_spill] sm:$0xff] }
 0x2f5   : > { %3520 = vmatpush.bf16.msra.mxu2 %v1336_v23  ;;  %7425 = vst [vmem:[#allocation63_spill] sm:$0xff] %v5464_v47  ;;  %v1335_v4 = vpack.c.bf16 %v1321_v31, %v1320_v11  ;;  %v1190_v36 = vadd.f32 %v1174_v16, %v1062_v58  ;;  %v3507_v11 = vld [vmem:[#allocation7 + $0x8] sm:$0xff]  ;;  %v7433_v31 = vld [vmem:[#allocation74_spill] sm:$0xff] }
 0x2f6   : > { %v7447_v57 = vld [vmem:[#allocation84_spill] sm:$0xff] }
 0x2f7   : > { %v1318_v61 = vadd.f32 %v1302_v2, %v1190_v36 }
 0x2f8   : > { %1476 = vmatpush.bf16.msra.mxu0 %v1335_v4 }
 0x2f9   : > { %3521 = vmatpush.bf16.msra.mxu2 %v1335_v4  ;;  %v1334_v35 = vpack.c.bf16 %v1319_v14, %v1318_v61  ;;  %v7435_v61 = vld [vmem:[#allocation77_spill] sm:$0xff] }
 0x2fb   : > { %1767 = vrot.lane.b32.xlu1 %v7426_v0, %s4001_s20  ;;  %v5470_v22 = vpop.permute.xlu1 %1384  ;;  %v3660_v0 = vunpack.i.h.bf16 %v5361_v38 }
 0x2fc   : > { %1769 = vrot.lane.b32.xlu2 %v7427_v40, %s4001_s20  ;;  %1477 = vmatpush.bf16.msra.mxu0 %v1334_v35  ;;  %7428 = vst [vmem:[#allocation66_spill] sm:$0xff] %v5470_v22  ;;  %v5472_v30 = vpop.permute.xlu2 %3667  ;;  %v1691_v46 = vpop.permute.xlu0 %1690  ;;  %v3674_v40 = vunpack.i.l.bf16 %v5396_v28 }
 0x2fd   : > { %3522 = vmatpush.bf16.msra.mxu2 %v1334_v35 }
 0x2ff   : > { %1478 = vmatmul.bf16.vlgmr.msra.gmra.mxu0 %v3506_v8  ;;  %v3508_v8 = vld [vmem:[#allocation7 + $0x10] sm:$0xff] }
 0x300   : > { %1498 = vmatmul.bf16.vlgmr.msra.gmra.mxu2 %v3510_v15  ;;  %v3512_v15 = vld [vmem:[#allocation7 + $0x30] sm:$0xff] }
 0x303   : > { %1773 = vrot.lane.b32.xlu1 %v7429_v25, %s4001_s20  ;;  %v5478_v16 = vpop.permute.xlu1 %1399 }
 0x304   : > { %1775 = vrot.lane.b32.xlu2 %v5338_v9, %s4001_s20  ;;  %7430 = vst [vmem:[#allocation68_spill] sm:$0xff] %v5478_v16  ;;  %v5480_v23 = vpop.permute.xlu2 %3682  ;;  %v1697_v24 = vpop.permute.xlu0 %1696 }
 0x305   : > { %v5546_v19 = vsel %vm1730_vm0, %v3675_v63, %v1697_v24  ;;  %v3684_v62 = vunpack.i.l.bf16 %v5480_v23  ;;  %v7449_v63 = vld [vmem:[#allocation78_spill] sm:$0xff] }
 0x306   : > { %7444 = vst [vmem:[#allocation91_spill] sm:$0xff] %v5546_v19 }
 0x30b   : > { %3697 = vrot.lane.b32.xlu1 %v7232_v20, %s4001_s20  ;;  %v5487_v18 = vpop.permute.xlu1 %1414 }
 0x30c   : > { %3702 = vrot.lane.b32.xlu2 %v7232_v20, %s4001_s20  ;;  %7431 = vst [vmem:[#allocation73_spill] sm:$0xff] %v5487_v18  ;;  %v1683_v55 = vpop.permute.xlu2 %1682  ;;  %v1703_v4 = vpop.permute.xlu0 %1702 }
 0x30d   : > { %v5490_v9 = vsel %vm1730_vm0, %v3659_v10, %v1683_v55  ;;  %v7438_v55 = vld [vmem:[#allocation69_spill] sm:$0xff] }
 0x30e   : > { %7432 = vst [vmem:[#allocation67_spill] sm:$0xff] %v5490_v9  ;;  %v1908_v58 = vmul.f32 %v5490_v9, %v7433_v31 }
 0x30f   : > { %1483 = vmatmul.bf16.gmra.mxu0 %v3507_v11  ;;  %v5514_v11 = vsel %vm1730_vm0, %v3660_v0, %v1685_v60 }
 0x310   : > { %1503 = vmatmul.bf16.gmra.mxu2 %v3511_v1  ;;  %1940 = vrot.lane.b32.xlu0 %v1908_v58, %s3994_s23  ;;  %7436 = vst [vmem:[#allocation71_spill] sm:$0xff] %v5514_v11  ;;  %v1909_v58 = vmul.f32 %v5514_v11, %v7438_v55 }
 0x313   : > { %3712 = vrot.lane.b32.xlu1 %v7232_v20, %s4001_s20  ;;  %v3663_v6 = vpop.permute.xlu1 %3662 }
 0x314   : > { %3717 = vrot.lane.b32.xlu2 %v7232_v20, %s4001_s20  ;;  %v1689_v2 = vpop.permute.xlu2 %1688  ;;  %v3665_v36 = vunpack.i.h.bf16 %v3663_v6  ;;  %v1709_v1 = vpop.permute.xlu0 %1708 }
 0x316   : > { %v5500_v14 = vsel %vm1730_vm0, %v3665_v36, %v1689_v2  ;;  %v7439_v2 = vld [vmem:[#allocation72_spill] sm:$0xff] }
 0x317   : > { %7434 = vst [vmem:[#allocation76_spill] sm:$0xff] %v5500_v14  ;;  %v1911_v35 = vmul.f32 %v5500_v14, %v7435_v61 }
 0x319   : > { %1946 = vrot.lane.b32.xlu0 %v1911_v35, %s3994_s23 }
 0x31b   : > { %3727 = vrot.lane.b32.xlu1 %v7232_v20, %s4001_s20  ;;  %v5511_v25 = vpop.permute.xlu1 %3677 }
 0x31c   : > { %3732 = vrot.lane.b32.xlu2 %v7232_v20, %s4001_s20  ;;  %v1695_v10 = vpop.permute.xlu2 %1694  ;;  %v3669_v20 = vunpack.i.l.bf16 %v5472_v30  ;;  %v3680_v60 = vunpack.i.h.bf16 %v5511_v25  ;;  %v5538_v48 = vpop.permute.xlu0 %1747 }
 0x31d   : > { %v5517_v38 = vsel %vm1730_vm0, %v3674_v40, %v1695_v10 }
 0x31e   : > { %7437 = vst [vmem:[#allocation46_spill] sm:$0xff] %v5517_v38  ;;  %v1914_v36 = vmul.f32 %v5517_v38, %v7439_v2  ;;  %v5530_v40 = vsel %vm1730_vm0, %v3669_v20, %v1691_v46  ;;  %v3664_v46 = vunpack.i.l.bf16 %v3663_v6  ;;  %v3513_v20 = vld [vmem:[#allocation7 + $0x38] sm:$0xff] }
 0x31f   : > { %1488 = vmatmul.bf16.gmra.mxu0 %v3508_v8  ;;  %7440 = vst [vmem:[#allocation110_spill] sm:$0xff] %v5530_v40  ;;  %v7448_v6 = vld [vmem:[#allocation90_spill] sm:$0xff] }
 0x320   : > { %1508 = vmatmul.bf16.gmra.mxu2 %v3512_v15  ;;  %v7442_v15 = vld [vmem:[#allocation87_spill] sm:$0xff] }
 0x321   : > { %1952 = vrot.lane.b32.xlu0 %v1914_v36, %s3994_s23  ;;  %v1912_v10 = vmul.f32 %v5530_v40, %v7442_v15 }
 0x323   : > { %1942 = vrot.lane.b32.xlu1 %v1909_v58, %s3994_s23  ;;  %v5527_v35 = vpop.permute.xlu1 %3692  ;;  %v7443_v58 = vld [vmem:[#allocation75_spill] sm:$0xff] }
 0x324   : > { %v1701_v0 = vpop.permute.xlu2 %1700 }
 0x325   : > { %v5533_v8 = vsel %vm1730_vm0, %v3680_v60, %v1701_v0 }
 0x326   : > { %7441 = vst [vmem:[#allocation89_spill] sm:$0xff] %v5533_v8  ;;  %v1917_v36 = vmul.f32 %v5533_v8, %v7443_v58 }
 0x329   : > { %1958 = vrot.lane.b32.xlu0 %v1917_v36, %s3994_s23  ;;  %v1915_v36 = vmul.f32 %v5546_v19, %v7448_v6 }
 0x32b   : > { %1948 = vrot.lane.b32.xlu1 %v1912_v10, %s3994_s23  ;;  %v1687_v60 = vpop.permute.xlu1 %1686 }
 0x32c   : > { %v1707_v0 = vpop.permute.xlu2 %1706  ;;  %v5549_v28 = vsel %vm1730_vm0, %v3664_v46, %v1687_v60  ;;  %v5564_v46 = vpop.permute.xlu0 %1753 }
 0x32d   : > { %7445 = vst [vmem:[#allocation92_spill] sm:$0xff] %v5549_v28  ;;  %v5552_v52 = vsel %vm1730_vm0, %v3689_v32, %v1707_v0  ;;  %v1910_v10 = vmul.f32 %v5549_v28, %v7447_v57  ;;  %v3670_v32 = vunpack.i.h.bf16 %v5472_v30  ;;  %v5569_v0 = vsel %vm1730_vm0, %v3684_v62, %v1703_v4 }
 0x32e   : > { %7446 = vst [vmem:[#allocation104_spill] sm:$0xff] %v5552_v52  ;;  %v1920_v24 = vmul.f32 %v5552_v52, %v7449_v63  ;;  %v3679_v4 = vunpack.i.l.bf16 %v5511_v25 }
 0x32f   : > { %1493 = vmatmul.bf16.gmra.mxu0 %v3509_v41  ;;  %1944 = vrot.lane.b32.xlu2 %v1910_v10, %s3994_s23  ;;  %v3695_v41 = vunpack.i.h.bf16 %v5527_v35  ;;  %7450 = vst [vmem:[#allocation43_spill] sm:$0xff] %v5569_v0 }
 0x330   : > { %1513 = vmatmul.bf16.gmra.mxu2 %v3513_v20 }
 0x331   : > { %1964 = vrot.lane.b32.xlu0 %v1920_v24, %s3994_s23  ;;  %v1918_v24 = vmul.f32 %v5569_v0, %v7454_v39 }
 0x333   : > { %1954 = vrot.lane.b32.xlu1 %v1915_v36, %s3994_s23  ;;  %v1693_v20 = vpop.permute.xlu1 %1692  ;;  %v7453_v36 = vld [vmem:[#allocation80_spill] sm:$0xff] }
 0x334   : > { %v1713_v60 = vpop.permute.xlu2 %1712  ;;  %v5572_v10 = vsel %vm1730_vm0, %v3670_v32, %v1693_v20  ;;  %v5589_v20 = vsel %vm1730_vm0, %v3690_v42, %v1709_v1 }
 0x335   : > { %7451 = vst [vmem:[#allocation98_spill] sm:$0xff] %v5572_v10  ;;  %v5575_v7 = vsel %vm1730_vm0, %v3695_v41, %v1713_v60  ;;  %v1913_v30 = vmul.f32 %v5572_v10, %v7453_v36  ;;  %v5591_v60 = vpop.permute.xlu0 %1759 }
 0x336   : > { %7452 = vst [vmem:[#allocation107_spill] sm:$0xff] %v5575_v7  ;;  %v1923_v62 = vmul.f32 %v5575_v7, %v7455_v13 }
 0x337   : > { %1950 = vrot.lane.b32.xlu2 %v1913_v30, %s3994_s23  ;;  %7456 = vst [vmem:[#allocation102_spill] sm:$0xff] %v5589_v20 }
 0x339   : > { %1970 = vrot.lane.b32.xlu0 %v1923_v62, %s3994_s23  ;;  %v3685_v62 = vunpack.i.h.bf16 %v5480_v23  ;;  %v7463_v23 = vld [vmem:[#allocation88_spill] sm:$0xff] }
 0x33b   : > { %1960 = vrot.lane.b32.xlu1 %v1918_v24, %s3994_s23  ;;  %v1699_v32 = vpop.permute.xlu1 %1698  ;;  %v7459_v24 = vld [vmem:[#allocation95_spill] sm:$0xff] }
 0x33c   : > { %v5594_v30 = vsel %vm1730_vm0, %v3679_v4, %v1699_v32  ;;  %v1921_v25 = vmul.f32 %v5589_v20, %v7459_v24 }
 0x33d   : > { %7457 = vst [vmem:[#allocation141_spill] sm:$0xff] %v5594_v30  ;;  %v1916_v33 = vmul.f32 %v5594_v30, %v7458_v45  ;;  %v5608_v32 = vpop.permute.xlu0 %1765 }
 0x33e   : > { %v1752_v41 = vpop.permute.xlu2 %1751 }
 0x33f   : > { %1956 = vrot.lane.b32.xlu2 %v1916_v33, %s3994_s23  ;;  %v3694_v33 = vunpack.i.l.bf16 %v5527_v35 }
 0x343   : > { %1966 = vrot.lane.b32.xlu1 %v1921_v25, %s3994_s23  ;;  %v1705_v43 = vpop.permute.xlu1 %1704 }
 0x344   : > { %v5604_v1 = vsel %vm1730_vm0, %v3685_v62, %v1705_v43 }
 0x345   : > { %7460 = vst [vmem:[#allocation101_spill] sm:$0xff] %v5604_v1  ;;  %v1919_v4 = vmul.f32 %v5604_v1, %v7461_v27  ;;  %v5618_v43 = vpop.permute.xlu0 %1771 }
 0x346   : > { %v1758_v42 = vpop.permute.xlu2 %1757 }
 0x347   : > { %1962 = vrot.lane.b32.xlu2 %v1919_v4, %s3994_s23 }
 0x34d   : > { %v1711_v56 = vpop.permute.xlu1 %1710  ;;  %v5620_v54 = vpop.permute.xlu0 %1777 }
 0x34e   : > { %v1764_v5 = vpop.permute.xlu2 %1763  ;;  %v5613_v25 = vsel %vm1730_vm0, %v3694_v33, %v1711_v56 }
 0x34f   : > { %7462 = vst [vmem:[#allocation86_spill] sm:$0xff] %v5613_v25  ;;  %v1922_v3 = vmul.f32 %v5613_v25, %v7463_v23 }
 0x351   : > { %1968 = vrot.lane.b32.xlu2 %v1922_v3, %s3994_s23 }
 0x355   : > { %v1750_v62 = vpop.permute.xlu1 %1749  ;;  %v3708_v56 = vpop.permute.xlu0 %3707 }
 0x356   : > { %v1770_v26 = vpop.permute.xlu2 %1769  ;;  %v3710_v7 = vunpack.i.h.bf16 %v3708_v56 }
 0x358   : > { %v5633_v52 = vsel %vm1859_vm1, %v1758_v42, %v3710_v7 }
 0x359   : > { %7465 = vst [vmem:[#allocation83_spill] sm:$0xff] %v5633_v52  ;;  %v2009_v8 = vmul.f32 %v5633_v52, %v7453_v36 }
 0x35d   : > { %v1756_v51 = vpop.permute.xlu1 %1755 }
 0x35e   : > { %v1776_v4 = vpop.permute.xlu2 %1775 }
 0x365   : > { %v5622_v29 = vpop.permute.xlu1 %1761 }
 0x366   : > { %v3703_v35 = vpop.permute.xlu2 %3702 }
 0x367   : > { %v3704_v21 = vunpack.i.l.bf16 %v3703_v35 }
 0x369   : > { %v5625_v33 = vsel %vm1859_vm1, %v1752_v41, %v3704_v21  ;;  %v5646_v41 = vpop.permute.xlu0 %3722 }
 0x36a   : > { %7464 = vst [vmem:[#allocation99_spill] sm:$0xff] %v5625_v33  ;;  %v2006_v3 = vmul.f32 %v5625_v33, %v7447_v57  ;;  %v3725_v42 = vunpack.i.h.bf16 %v5646_v41 }
 0x36c   : > { %2040 = vrot.lane.b32.xlu0 %v2006_v3, %s3994_s23  ;;  %v5655_v47 = vsel %vm1859_vm1, %v1770_v26, %v3725_v42  ;;  %v3705_v42 = vunpack.i.h.bf16 %v3703_v35 }
 0x36d   : > { %v5630_v25 = vpop.permute.xlu1 %1767 }
 0x36e   : > { %v5635_v1 = vpop.permute.xlu2 %3717 }
 0x36f   : > { %v3719_v30 = vunpack.i.l.bf16 %v5635_v1 }
 0x371   : > { %v5644_v57 = vsel %vm1859_vm1, %v1764_v5, %v3719_v30 }
 0x372   : > { %v2012_v7 = vmul.f32 %v5644_v57, %v7458_v45 }
 0x374   : > { %2046 = vrot.lane.b32.xlu0 %v2009_v8, %s3994_s23 }
 0x375   : > { %v5641_v21 = vpop.permute.xlu1 %1773 }
 0x376   : > { %v5660_v5 = vpop.permute.xlu2 %3732 }
 0x37c   : > { %2052 = vrot.lane.b32.xlu0 %v2012_v7, %s3994_s23  ;;  %v1479_v36 = vpop.f32.mrf.mxu0  ;;  %v3709_v7 = vunpack.i.l.bf16 %v3708_v56 }
 0x37d   : > { %v1480_v3 = vadd.f32 %v1479_v36, %v5390_v59  ;;  %v3698_v52 = vpop.permute.xlu1 %3697  ;;  %v2015_v36 = vmul.f32 %v5655_v47, %v7461_v27  ;;  %v5686_v27 = vsel %vm1859_vm1, %v5564_v46, %v3705_v42 }
 0x37e   : > { %v3700_v8 = vunpack.i.h.bf16 %v3698_v52  ;;  %v3699_v33 = vunpack.i.l.bf16 %v3698_v52  ;;  %v5682_v56 = vsel %vm1859_vm1, %v1756_v51, %v3709_v7 }
 0x37f   : > { %1519 = vst [vmem:[%s5657_s27] sm:$0xff] %v1480_v3 }
 0x380   : > { %v5663_v30 = vsel %vm1859_vm1, %v1750_v62, %v3700_v8  ;;  %v5667_v45 = vsel %vm1859_vm1, %v5538_v48, %v3699_v33  ;;  %v3734_v62 = vunpack.i.l.bf16 %v5660_v5 }
 0x381   : > { %7466 = vst [vmem:[#allocation115_spill] sm:$0xff] %v5667_v45  ;;  %v2005_v52 = vmul.f32 %v5663_v30, %v7438_v55  ;;  %v2004_v26 = vmul.f32 %v5667_v45, %v7433_v31  ;;  %v7467_v55 = vld [vmem:[#allocation51_spill] sm:$0xff] }
 0x382   : > { %v5690_v35 = vsel %vm1859_vm1, %v1776_v4, %v3734_v62  ;;  %v7468_v62 = vld [vmem:[#allocation205_spill] sm:$0xff] }
 0x383   : > { %v1499_v3 = vpop.f32.mrf.mxu2  ;;  %2038 = vrot.lane.b32.xlu2 %v2005_v52, %s3994_s23  ;;  %2036 = vrot.lane.b32.xlu1 %v2004_v26, %s3994_s23  ;;  %v2008_v52 = vmul.f32 %v5682_v56, %v7442_v15  ;;  %v2007_v26 = vmul.f32 %v5686_v27, %v7435_v61  ;;  %v2018_v46 = vmul.f32 %v5690_v35, %v7463_v23 }
 0x384   : > { %v1500_v48 = vadd.f32 %v1499_v3, %v5470_v22  ;;  %v1481_v33 = vpop.f32.mrf.mxu0  ;;  %2058 = vrot.lane.b32.xlu0 %v2015_v36, %s3994_s23 }
 0x385   : > { %v1482_v31 = vadd.f32 %v1481_v33, %v7467_v55  ;;  %v3713_v8 = vpop.permute.xlu1 %3712  ;;  %v3724_v33 = vunpack.i.l.bf16 %v5646_v41  ;;  %v7501_v55 = vld [vmem:[#allocation99_spill] sm:$0xff] }
 0x386   : > { %1527 = vst [vmem:[%s5657_s27 + $0x40] sm:$0xff] %v1500_v48  ;;  %v3715_v51 = vunpack.i.h.bf16 %v3713_v8  ;;  %v3714_v7 = vunpack.i.l.bf16 %v3713_v8  ;;  %v2198_v22 = vmul.f32 %v7501_v55, %v7342_v50 }
 0x387   : > { %1520 = vst [vmem:[%s5657_s27 + $0x8] sm:$0xff] %v1482_v31  ;;  %v3720_v31 = vunpack.i.h.bf16 %v5635_v1 }
 0x388   : > { %v5706_v61 = vsel %vm1859_vm1, %v5622_v29, %v3715_v51  ;;  %v5710_v3 = vsel %vm1859_vm1, %v5591_v60, %v3714_v7  ;;  %v7469_v29 = vld [vmem:[#allocation97_spill] sm:$0xff]  ;;  %v7470_v60 = vld [vmem:[#allocation31_spill] sm:$0xff] }
 0x389   : > { %v2011_v23 = vmul.f32 %v5706_v61, %v7448_v6  ;;  %v2010_v48 = vmul.f32 %v5710_v3, %v7439_v2  ;;  %v2101_v8 = vmul.f32 %v5514_v11, %v7469_v29  ;;  %v5729_v2 = vsel %vm1859_vm1, %v5630_v25, %v3724_v33 }
 0x38a   : > { %v5733_v1 = vsel %vm1859_vm1, %v5608_v32, %v3720_v31  ;;  %v2014_v7 = vmul.f32 %v5729_v2, %v7454_v39  ;;  %v2104_v25 = vmul.f32 %v5530_v40, %v7346_v49 }
 0x38b   : > { %v1501_v42 = vpop.f32.mrf.mxu2  ;;  %2044 = vrot.lane.b32.xlu2 %v2008_v52, %s3994_s23  ;;  %2042 = vrot.lane.b32.xlu1 %v2007_v26, %s3994_s23 }
 0x38c   : > { %v1502_v4 = vadd.f32 %v1501_v42, %v5392_v44  ;;  %v1484_v36 = vpop.f32.mrf.mxu0  ;;  %2064 = vrot.lane.b32.xlu0 %v2018_v46, %s3994_s23  ;;  %v2013_v46 = vmul.f32 %v5733_v1, %v7443_v58  ;;  %v2197_v44 = vmul.f32 %v5663_v30, %v7469_v29  ;;  %v7504_v29 = vld [vmem:[#allocation83_spill] sm:$0xff] }
 0x38d   : > { %v1485_v15 = vadd.f32 %v1484_v36, %v7468_v62  ;;  %v3728_v41 = vpop.permute.xlu1 %3727 }
 0x38e   : > { %1528 = vst [vmem:[%s5657_s27 + $0x48] sm:$0xff] %v1502_v4  ;;  %v3730_v42 = vunpack.i.h.bf16 %v3728_v41  ;;  %v3729_v4 = vunpack.i.l.bf16 %v3728_v41 }
 0x38f   : > { %1521 = vst [vmem:[%s5657_s27 + $0x10] sm:$0xff] %v1485_v15 }
 0x390   : > { %v5750_v58 = vsel %vm1859_vm1, %v5641_v21, %v3730_v42  ;;  %v2107_v21 = vmul.f32 %v5546_v19, %v7348_v17 }
 0x391   : > { %v2017_v33 = vmul.f32 %v5750_v58, %v7459_v24 }
 0x393   : > { %v1504_v52 = vpop.f32.mrf.mxu2  ;;  %2050 = vrot.lane.b32.xlu2 %v2011_v23, %s3994_s23  ;;  %2048 = vrot.lane.b32.xlu1 %v2010_v48, %s3994_s23  ;;  %v7471_v23 = vld [vmem:[#allocation49_spill] sm:$0xff]  ;;  %v5754_v48 = vsel %vm1859_vm1, %v5618_v43, %v3729_v4  ;;  %v7475_v4 = vld [vmem:[#allocation40_spill] sm:$0xff] }
 0x394   : > { %v1505_v26 = vadd.f32 %v1504_v52, %v7470_v60  ;;  %v1486_v51 = vpop.f32.mrf.mxu0  ;;  %2134 = vrot.lane.b32.xlu0 %v2101_v8, %s3996_s30  ;;  %v2016_v31 = vmul.f32 %v5754_v48, %v7449_v63  ;;  %v3735_v8 = vunpack.i.h.bf16 %v5660_v5  ;;  %v7499_v60 = vld [vmem:[#allocation107_spill] sm:$0xff] }
 0x395   : > { %v1487_v6 = vadd.f32 %v1486_v51, %v5435_v12  ;;  %v5769_v51 = vpop.permute.xlu0 %1940  ;;  %v7498_v12 = vld [vmem:[#allocation109_spill] sm:$0xff] }
 0x396   : > { %1529 = vst [vmem:[%s5657_s27 + $0x50] sm:$0xff] %v1505_v26  ;;  %v5774_v63 = vsel %vm1859_vm1, %v5620_v54, %v3735_v8  ;;  %v2115_v62 = vmul.f32 %v7499_v60, %v7498_v12 }
 0x397   : > { %1522 = vst [vmem:[%s5657_s27 + $0x18] sm:$0xff] %v1487_v6  ;;  %v2019_v5 = vmul.f32 %v5774_v63, %v7455_v13  ;;  %v7473_v6 = vld [vmem:[#allocation105_spill] sm:$0xff] }
 0x398   : > { %7472 = vst [vmem:[#allocation133_spill] sm:$0xff] %v5769_v51  ;;  %v2100_v41 = vmul.f32 %v5490_v9, %v7473_v6 }
 0x39b   : > { %v1506_v36 = vpop.f32.mrf.mxu2  ;;  %2056 = vrot.lane.b32.xlu2 %v2014_v7, %s3994_s23  ;;  %2054 = vrot.lane.b32.xlu1 %v2013_v46, %s3994_s23  ;;  %v7474_v7 = vld [vmem:[#allocation123_spill] sm:$0xff] }
 0x39c   : > { %v1507_v32 = vadd.f32 %v1506_v36, %v5478_v16  ;;  %v1489_v15 = vpop.f32.mrf.mxu0  ;;  %2140 = vrot.lane.b32.xlu0 %v2104_v25, %s3996_s30  ;;  %v2110_v46 = vmul.f32 %v5569_v0, %v7474_v7  ;;  %v5788_v36 = vpop.permute.xlu2 %1944 }
 0x39d   : > { %v1490_v39 = vadd.f32 %v1489_v15, %v7471_v23  ;;  %7476 = vst [vmem:[#allocation130_spill] sm:$0xff] %v5788_v36  ;;  %v5790_v13 = vpop.permute.xlu0 %1946  ;;  %v2102_v15 = vmul.f32 %v5549_v28, %v7342_v50  ;;  %v7518_v36 = vld [vmem:[#allocation27_spill] sm:$0xff] }
 0x39e   : > { %1530 = vst [vmem:[%s5657_s27 + $0x58] sm:$0xff] %v1507_v32 }
 0x39f   : > { %1523 = vst [vmem:[%s5657_s27 + $0x20] sm:$0xff] %v1490_v39  ;;  %v7478_v39 = vld [vmem:[#allocation108_spill] sm:$0xff] }
 0x3a0   : > { %7477 = vst [vmem:[#allocation94_spill] sm:$0xff] %v5790_v13 }
 0x3a3   : > { %v1509_v52 = vpop.f32.mrf.mxu2  ;;  %2062 = vrot.lane.b32.xlu2 %v2017_v33, %s3994_s23  ;;  %2060 = vrot.lane.b32.xlu1 %v2016_v31, %s3994_s23  ;;  %v2103_v33 = vmul.f32 %v5500_v14, %v7478_v39  ;;  %v7479_v31 = vld [vmem:[#allocation126_spill] sm:$0xff] }
 0x3a4   : > { %v1510_v43 = vadd.f32 %v1509_v52, %v5437_v37  ;;  %v1491_v26 = vpop.f32.mrf.mxu0  ;;  %2146 = vrot.lane.b32.xlu0 %v2107_v21, %s3996_s30  ;;  %v2113_v8 = vmul.f32 %v5589_v20, %v7479_v31 }
 0x3a5   : > { %v1492_v24 = vadd.f32 %v1491_v26, %v5462_v53  ;;  %v7480_v26 = vld [vmem:[#allocation45_spill] sm:$0xff] }
 0x3a6   : > { %1531 = vst [vmem:[%s5657_s27 + $0x60] sm:$0xff] %v1510_v43 }
 0x3a7   : > { %1524 = vst [vmem:[%s5657_s27 + $0x28] sm:$0xff] %v1492_v24 }
 0x3ab   : > { %v1511_v42 = vpop.f32.mrf.mxu2  ;;  %2066 = vrot.lane.b32.xlu1 %v2019_v5, %s3994_s23  ;;  %2132 = vrot.lane.b32.xlu2 %v2100_v41, %s3996_s30  ;;  %v5807_v5 = vpop.permute.xlu2 %1950  ;;  %s4002_s23 = smov 124  }
 0x3ac   : > { %v1512_v54 = vadd.f32 %v1511_v42, %v7475_v4  ;;  %v1494_v25 = vpop.f32.mrf.mxu0  ;;  %2152 = vrot.lane.b32.xlu0 %v2110_v46, %s3996_s30  ;;  %v5809_v41 = vpop.permute.xlu0 %1952  ;;  %v7481_v46 = vld [vmem:[#allocation111_spill] sm:$0xff]  ;;  %v7493_v4 = vld [vmem:[#allocation104_spill] sm:$0xff] }
 0x3ad   : > { %v1495_v32 = vadd.f32 %v1494_v25, %v5353_v34  ;;  %v2105_v42 = vmul.f32 %v5572_v10, %v7481_v46  ;;  %v7488_v34 = vld [vmem:[#allocation89_spill] sm:$0xff]  ;;  %v2201_v59 = vmul.f32 %v7504_v29, %v7481_v46 }
 0x3ae   : > { %1532 = vst [vmem:[%s5657_s27 + $0x68] sm:$0xff] %v1512_v54  ;;  %v7482_v54 = vld [vmem:[#allocation100_spill] sm:$0xff] }
 0x3af   : > { %1525 = vst [vmem:[%s5657_s27 + $0x30] sm:$0xff] %v1495_v32  ;;  %v2106_v25 = vmul.f32 %v5517_v38, %v7482_v54  ;;  %v2196_v32 = vmul.f32 %v5667_v45, %v7473_v6  ;;  %v2202_v37 = vmul.f32 %v5710_v3, %v7482_v54 }
 0x3b3   : > { %v1514_v21 = vpop.f32.mrf.mxu2  ;;  %2136 = vrot.lane.b32.xlu1 %v2102_v15, %s3996_s30  ;;  %2138 = vrot.lane.b32.xlu2 %v2103_v33, %s3996_s30  ;;  %v7483_v33 = vld [vmem:[#allocation63_spill] sm:$0xff] }
 0x3b4   : > { %v1515_v52 = vadd.f32 %v1514_v21, %v5487_v18  ;;  %v1496_v43 = vpop.f32.mrf.mxu0  ;;  %2158 = vrot.lane.b32.xlu0 %v2113_v8, %s3996_s30  ;;  %v5823_v21 = vpop.permute.xlu2 %1956  ;;  %v7487_v18 = vld [vmem:[#allocation103_spill] sm:$0xff] }
 0x3b5   : > { %v1497_v24 = vadd.f32 %v1496_v43, %v7480_v26  ;;  %v7485_v43 = vld [vmem:[#allocation113_spill] sm:$0xff]  ;;  %v2109_v6 = vmul.f32 %v7488_v34, %v7487_v18  ;;  %v2205_v54 = vmul.f32 %v5733_v1, %v7487_v18 }
 0x3b6   : > { %1533 = vst [vmem:[%s5657_s27 + $0x70] sm:$0xff] %v1515_v52  ;;  %v5825_v52 = vpop.permute.xlu0 %1958  ;;  %v2204_v46 = vmul.f32 %v5644_v57, %v7485_v43 }
 0x3b7   : > { %1526 = vst [vmem:[%s5657_s27 + $0x38] sm:$0xff] %v1497_v24  ;;  %v7486_v24 = vld [vmem:[#allocation141_spill] sm:$0xff] }
 0x3b8   : > { %7484 = vst [vmem:[#allocation118_spill] sm:$0xff] %v5825_v52  ;;  %v2108_v26 = vmul.f32 %v7486_v24, %v7485_v43 }
 0x3bb   : > { %v1516_v15 = vpop.f32.mrf.mxu2  ;;  %2142 = vrot.lane.b32.xlu1 %v2105_v42, %s3996_s30  ;;  %2144 = vrot.lane.b32.xlu2 %v2106_v25, %s3996_s30  ;;  %v2199_v42 = vmul.f32 %v5686_v27, %v7478_v39  ;;  %v5835_v25 = vpop.permute.xlu1 %1942 }
 0x3bc   : > { %v1517_v8 = vadd.f32 %v1516_v15, %v7483_v33  ;;  %2228 = vrot.lane.b32.xlu0 %v2196_v32, %s3996_s30  ;;  %7489 = vst [vmem:[#allocation96_spill] sm:$0xff] %v5835_v25  ;;  %v7490_v32 = vld [vmem:[#allocation116_spill] sm:$0xff]  ;;  %v7491_v15 = vld [vmem:[#allocation101_spill] sm:$0xff]  ;;  %v7492_v33 = vld [vmem:[#allocation106_spill] sm:$0xff]  ;;  %v5844_v23 = vpop.permute.xlu2 %1962 }
 0x3bd   : > { %v2112_v53 = vmul.f32 %v7493_v4, %v7492_v33  ;;  %v2208_v18 = vmul.f32 %v5754_v48, %v7492_v33  ;;  %v2211_v33 = vmul.f32 %v5774_v63, %v7498_v12  ;;  %v2207_v43 = vmul.f32 %v5655_v47, %v7490_v32 }
 0x3be   : > { %1534 = vst [vmem:[%s5657_s27 + $0x78] sm:$0xff] %v1517_v8  ;;  %v2111_v8 = vmul.f32 %v7491_v15, %v7490_v32  ;;  %v5846_v39 = vpop.permute.xlu0 %1964 }
 0x3bf   : > { %7494 = vst [vmem:[#allocation121_spill] sm:$0xff] %v5846_v39 }
 0x3c3   : > { %2148 = vrot.lane.b32.xlu1 %v2108_v26, %s3996_s30  ;;  %2150 = vrot.lane.b32.xlu2 %v2109_v6, %s3996_s30  ;;  %v5851_v26 = vpop.permute.xlu1 %1948  ;;  %v7496_v6 = vld [vmem:[#allocation119_spill] sm:$0xff] }
 0x3c4   : > { %2234 = vrot.lane.b32.xlu0 %v2199_v42, %s3996_s30  ;;  %7495 = vst [vmem:[#allocation135_spill] sm:$0xff] %v5851_v26  ;;  %v7497_v42 = vld [vmem:[#allocation86_spill] sm:$0xff]  ;;  %v2210_v32 = vmul.f32 %v5690_v35, %v7496_v6 }
 0x3c5   : > { %v2114_v16 = vmul.f32 %v7497_v42, %v7496_v6  ;;  %v2293_v6 = vmul.f32 %v5514_v11, %v7518_v36 }
 0x3cb   : > { %2154 = vrot.lane.b32.xlu1 %v2111_v8, %s3996_s30  ;;  %2156 = vrot.lane.b32.xlu2 %v2112_v53, %s3996_s30  ;;  %v5862_v53 = vpop.permute.xlu2 %1968  ;;  %v5866_v8 = vpop.permute.xlu1 %1954 }
 0x3cc   : > { %2240 = vrot.lane.b32.xlu0 %v2202_v37, %s3996_s30  ;;  %v5864_v37 = vpop.permute.xlu0 %1970 }
 0x3cd   : > { %7500 = vst [vmem:[#allocation120_spill] sm:$0xff] %v5864_v37  ;;  %v7525_v37 = vld [vmem:[#allocation25_spill] sm:$0xff] }
 0x3d3   : > { %2160 = vrot.lane.b32.xlu1 %v2114_v16, %s3996_s30  ;;  %2162 = vrot.lane.b32.xlu2 %v2115_v62, %s3996_s30  ;;  %v5885_v50 = vpop.permute.xlu1 %1960 }
 0x3d4   : > { %2246 = vrot.lane.b32.xlu0 %v2205_v54, %s3996_s30  ;;  %v2200_v54 = vmul.f32 %v5682_v56, %v7346_v49  ;;  %v2203_v49 = vmul.f32 %v5706_v61, %v7348_v17  ;;  %v2206_v17 = vmul.f32 %v5729_v2, %v7474_v7  ;;  %v2209_v7 = vmul.f32 %v5750_v58, %v7479_v31 }
 0x3db   : > { %2230 = vrot.lane.b32.xlu1 %v2197_v44, %s3996_s30  ;;  %2232 = vrot.lane.b32.xlu2 %v2198_v22, %s3996_s30 }
 0x3dc   : > { %2252 = vrot.lane.b32.xlu0 %v2208_v18, %s3996_s30  ;;  %v7507_v18 = vld [vmem:[#allocation23_spill] sm:$0xff] }
 0x3dd   : > { %v5877_v16 = vpop.permute.xlu2 %2038  ;;  %v2294_v26 = vmul.f32 %v5549_v28, %v7507_v18 }
 0x3de   : > { %7502 = vst [vmem:[#allocation117_spill] sm:$0xff] %v5877_v16  ;;  %v5879_v62 = vpop.permute.xlu0 %2040 }
 0x3df   : > { %7503 = vst [vmem:[#allocation28_spill] sm:$0xff] %v5879_v62  ;;  %v7524_v62 = vld [vmem:[#allocation19_spill] sm:$0xff] }
 0x3e3   : > { %2236 = vrot.lane.b32.xlu1 %v2200_v54, %s3996_s30  ;;  %2238 = vrot.lane.b32.xlu2 %v2201_v59, %s3996_s30  ;;  %v5904_v59 = vpop.permute.xlu1 %1966 }
 0x3e4   : > { %2258 = vrot.lane.b32.xlu0 %v2211_v33, %s3996_s30  ;;  %v7510_v33 = vld [vmem:[#allocation20_spill] sm:$0xff] }
 0x3e5   : > { %v5892_v44 = vpop.permute.xlu2 %2044  ;;  %v2297_v25 = vmul.f32 %v5572_v10, %v7510_v33 }
 0x3e6   : > { %7505 = vst [vmem:[#allocation138_spill] sm:$0xff] %v5892_v44  ;;  %v5894_v22 = vpop.permute.xlu0 %2046  ;;  %v2389_v44 = vmul.f32 %v5663_v30, %v7518_v36  ;;  %v2392_v36 = vmul.f32 %v5682_v56, %v7524_v62 }
 0x3e7   : > { %7506 = vst [vmem:[#allocation148_spill] sm:$0xff] %v5894_v22  ;;  %v7519_v22 = vld [vmem:[#allocation22_spill] sm:$0xff] }
 0x3e8   : > { %v2303_v51 = vmul.f32 %v7491_v15, %v7519_v22 }
 0x3eb   : > { %2242 = vrot.lane.b32.xlu1 %v2203_v49, %s3996_s30  ;;  %2244 = vrot.lane.b32.xlu2 %v2204_v46, %s3996_s30 }
 0x3ec   : > { %2328 = vrot.lane.b32.xlu0 %v2294_v26, %s3998_s10 }
 0x3ed   : > { %v5907_v12 = vpop.permute.xlu2 %2050 }
 0x3ee   : > { %7508 = vst [vmem:[#allocation189_spill] sm:$0xff] %v5907_v12  ;;  %v5909_v54 = vpop.permute.xlu0 %2052  ;;  %v2306_v12 = vmul.f32 %v7497_v42, %v7525_v37 }
 0x3ef   : > { %7509 = vst [vmem:[#allocation145_spill] sm:$0xff] %v5909_v54  ;;  %v7513_v54 = vld [vmem:[#allocation21_spill] sm:$0xff] }
 0x3f0   : > { %v2300_v13 = vmul.f32 %v7486_v24, %v7513_v54 }
 0x3f3   : > { %2248 = vrot.lane.b32.xlu1 %v2206_v17, %s3996_s30  ;;  %2250 = vrot.lane.b32.xlu2 %v2207_v43, %s3996_s30 }
 0x3f4   : > { %2334 = vrot.lane.b32.xlu0 %v2297_v25, %s3998_s10 }
 0x3f5   : > { %v5920_v26 = vpop.permute.xlu2 %2056  ;;  %v5922_v49 = vpop.permute.xlu1 %2036 }
 0x3f6   : > { %7511 = vst [vmem:[#allocation173_spill] sm:$0xff] %v5920_v26  ;;  %v5924_v46 = vpop.permute.xlu0 %2058  ;;  %v2296_v26 = vmul.f32 %v5530_v40, %v7524_v62 }
 0x3f7   : > { %7512 = vst [vmem:[#allocation127_spill] sm:$0xff] %v5924_v46  ;;  %v7517_v46 = vld [vmem:[#allocation24_spill] sm:$0xff] }
 0x3f8   : > { %v2292_v31 = vmul.f32 %v5490_v9, %v7517_v46 }
 0x3fb   : > { %2254 = vrot.lane.b32.xlu1 %v2209_v7, %s3996_s30  ;;  %2256 = vrot.lane.b32.xlu2 %v2210_v32, %s3996_s30  ;;  %s4003_s30 = smov 123  }
 0x3fc   : > { %2340 = vrot.lane.b32.xlu0 %v2300_v13, %s3998_s10 }
 0x3fd   : > { %v5935_v25 = vpop.permute.xlu2 %2062  ;;  %v5937_v17 = vpop.permute.xlu1 %2042 }
 0x3fe   : > { %7514 = vst [vmem:[#allocation167_spill] sm:$0xff] %v5935_v25  ;;  %v5939_v43 = vpop.permute.xlu0 %2064 }
 0x3ff   : > { %7515 = vst [vmem:[#allocation171_spill] sm:$0xff] %v5937_v17 }
 0x400   : > { %7516 = vst [vmem:[#allocation158_spill] sm:$0xff] %v5939_v43  ;;  %v7523_v43 = vld [vmem:[#allocation26_spill] sm:$0xff] }
 0x401   : > { %v2295_v25 = vmul.f32 %v5500_v14, %v7523_v43 }
 0x403   : > { %2324 = vrot.lane.b32.xlu1 %v2292_v31, %s3998_s10  ;;  %2326 = vrot.lane.b32.xlu2 %v2293_v6, %s3998_s10 }
 0x404   : > { %2346 = vrot.lane.b32.xlu0 %v2303_v51, %s3998_s10 }
 0x405   : > { %v5950_v13 = vpop.permute.xlu1 %2048  ;;  %v5952_v7 = vpop.permute.xlu2 %2132 }
 0x406   : > { %7520 = vst [vmem:[#allocation207_spill] sm:$0xff] %v5950_v13  ;;  %v5954_v32 = vpop.permute.xlu0 %2134  ;;  %v7530_v13 = vld [vmem:[#allocation29_spill] sm:$0xff] }
 0x407   : > { %7521 = vst [vmem:[#allocation124_spill] sm:$0xff] %v5952_v7  ;;  %v2299_v39 = vmul.f32 %v5546_v19, %v7530_v13  ;;  %v2395_v62 = vmul.f32 %v5706_v61, %v7530_v13 }
 0x408   : > { %7522 = vst [vmem:[#allocation164_spill] sm:$0xff] %v5954_v32  ;;  %v7529_v32 = vld [vmem:[#allocation30_spill] sm:$0xff] }
 0x409   : > { %v2298_v7 = vmul.f32 %v5517_v38, %v7529_v32 }
 0x40b   : > { %2330 = vrot.lane.b32.xlu1 %v2295_v25, %s3998_s10  ;;  %2332 = vrot.lane.b32.xlu2 %v2296_v26, %s3998_s10 }
 0x40c   : > { %2352 = vrot.lane.b32.xlu0 %v2306_v12, %s3998_s10 }
 0x40d   : > { %v5965_v51 = vpop.permute.xlu1 %2054  ;;  %v5967_v31 = vpop.permute.xlu2 %2138 }
 0x40e   : > { %7526 = vst [vmem:[#allocation196_spill] sm:$0xff] %v5965_v51  ;;  %v5969_v6 = vpop.permute.xlu0 %2140  ;;  %v7534_v51 = vld [vmem:[#allocation32_spill] sm:$0xff] }
 0x40f   : > { %7527 = vst [vmem:[#allocation186_spill] sm:$0xff] %v5967_v31  ;;  %v2302_v17 = vmul.f32 %v5569_v0, %v7534_v51  ;;  %v2398_v13 = vmul.f32 %v5729_v2, %v7534_v51 }
 0x410   : > { %7528 = vst [vmem:[#allocation114_spill] sm:$0xff] %v5969_v6  ;;  %v7533_v6 = vld [vmem:[#allocation33_spill] sm:$0xff] }
 0x411   : > { %v2301_v31 = vmul.f32 %v7488_v34, %v7533_v6 }
 0x413   : > { %2336 = vrot.lane.b32.xlu1 %v2298_v7, %s3998_s10  ;;  %2338 = vrot.lane.b32.xlu2 %v2299_v39, %s3998_s10 }
 0x414   : > { %2422 = vrot.lane.b32.xlu0 %v2389_v44, %s3998_s10 }
 0x415   : > { %v5980_v12 = vpop.permute.xlu1 %2060  ;;  %v5982_v26 = vpop.permute.xlu2 %2144 }
 0x416   : > { %7531 = vst [vmem:[#allocation155_spill] sm:$0xff] %v5980_v12  ;;  %v5984_v25 = vpop.permute.xlu0 %2146  ;;  %v7537_v12 = vld [vmem:[#allocation36_spill] sm:$0xff] }
 0x417   : > { %7532 = vst [vmem:[#allocation112_spill] sm:$0xff] %v5982_v26  ;;  %v2304_v52 = vmul.f32 %v7493_v4, %v7537_v12  ;;  %v7538_v26 = vld [vmem:[#allocation35_spill] sm:$0xff] }
 0x418   : > { %v2305_v16 = vmul.f32 %v5589_v20, %v7538_v26  ;;  %v2401_v51 = vmul.f32 %v5750_v58, %v7538_v26 }
 0x41b   : > { %2342 = vrot.lane.b32.xlu1 %v2301_v31, %s3998_s10  ;;  %2344 = vrot.lane.b32.xlu2 %v2302_v17, %s3998_s10 }
 0x41c   : > { %2428 = vrot.lane.b32.xlu0 %v2392_v36, %s3998_s10 }
 0x41d   : > { %v5995_v39 = vpop.permute.xlu1 %2066  ;;  %v5997_v44 = vpop.permute.xlu2 %2150 }
 0x41e   : > { %7535 = vst [vmem:[#allocation143_spill] sm:$0xff] %v5995_v39  ;;  %v5999_v7 = vpop.permute.xlu0 %2152  ;;  %v7540_v39 = vld [vmem:[#allocation39_spill] sm:$0xff] }
 0x41f   : > { %7536 = vst [vmem:[#allocation193_spill] sm:$0xff] %v5997_v44  ;;  %v2307_v4 = vmul.f32 %v7499_v60, %v7540_v39  ;;  %v2388_v44 = vmul.f32 %v5667_v45, %v7517_v46  ;;  %v2391_v46 = vmul.f32 %v5686_v27, %v7523_v43  ;;  %v2394_v43 = vmul.f32 %v5710_v3, %v7529_v32 }
 0x420   : > { %v2397_v32 = vmul.f32 %v5733_v1, %v7533_v6  ;;  %v2400_v6 = vmul.f32 %v5754_v48, %v7537_v12  ;;  %v2403_v12 = vmul.f32 %v5774_v63, %v7540_v39 }
 0x423   : > { %2348 = vrot.lane.b32.xlu1 %v2304_v52, %s3998_s10  ;;  %2350 = vrot.lane.b32.xlu2 %v2305_v16, %s3998_s10 }
 0x424   : > { %2434 = vrot.lane.b32.xlu0 %v2395_v62, %s3998_s10 }
 0x425   : > { %v6010_v17 = vpop.permute.xlu1 %2136  ;;  %v6012_v31 = vpop.permute.xlu2 %2156 }
 0x426   : > { %7539 = vst [vmem:[#allocation183_spill] sm:$0xff] %v6010_v17  ;;  %v6014_v36 = vpop.permute.xlu0 %2158  ;;  %v2390_v17 = vmul.f32 %v7501_v55, %v7507_v18  ;;  %v2393_v18 = vmul.f32 %v7504_v29, %v7510_v33  ;;  %v7541_v55 = vld [vmem:[#allocation136_spill] sm:$0xff]  ;;  %v2396_v33 = vmul.f32 %v5644_v57, %v7513_v54  ;;  %v2399_v54 = vmul.f32 %v5655_v47, %v7519_v22 }
 0x427   : > { %v2484_v26 = vmul.f32 %v5490_v9, %v7541_v55  ;;  %v7543_v55 = vld [vmem:[#allocation139_spill] sm:$0xff]  ;;  %v7545_v29 = vld [vmem:[#allocation128_spill] sm:$0xff]  ;;  %v2402_v22 = vmul.f32 %v5690_v35, %v7525_v37  ;;  %v7553_v9 = vld [vmem:[#allocation150_spill] sm:$0xff] }
 0x42b   : > { %2354 = vrot.lane.b32.xlu1 %v2307_v4, %s3998_s10  ;;  %2420 = vrot.lane.b32.xlu2 %v2388_v44, %s3998_s10 }
 0x42c   : > { %2440 = vrot.lane.b32.xlu0 %v2398_v13, %s3998_s10 }
 0x42d   : > { %v6025_v52 = vpop.permute.xlu1 %2142  ;;  %v6027_v16 = vpop.permute.xlu2 %2162 }
 0x42e   : > { %v6029_v62 = vpop.permute.xlu0 %2228 }
 0x433   : > { %2424 = vrot.lane.b32.xlu1 %v2390_v17, %s3998_s10  ;;  %2426 = vrot.lane.b32.xlu2 %v2391_v46, %s3998_s10 }
 0x434   : > { %2446 = vrot.lane.b32.xlu0 %v2401_v51, %s3998_s10 }
 0x435   : > { %v6040_v4 = vpop.permute.xlu1 %2148  ;;  %v6042_v44 = vpop.permute.xlu2 %2232 }
 0x436   : > { %v6044_v13 = vpop.permute.xlu0 %2234 }
 0x43b   : > { %2430 = vrot.lane.b32.xlu1 %v2393_v18, %s3998_s10  ;;  %2432 = vrot.lane.b32.xlu2 %v2394_v43, %s3998_s10  ;;  %v2487_v18 = vmul.f32 %v5500_v14, %v7543_v55  ;;  %v2490_v55 = vmul.f32 %v5517_v38, %v7545_v29  ;;  %v7552_v14 = vld [vmem:[#allocation146_spill] sm:$0xff] }
 0x43c   : > { %2516 = vrot.lane.b32.xlu0 %v2484_v26, %s4002_s23  ;;  %v2486_v39 = vmul.f32 %v5549_v28, %v7552_v14  ;;  %v7558_v28 = vld [vmem:[#allocation142_spill] sm:$0xff] }
 0x43d   : > { %v6055_v17 = vpop.permute.xlu1 %2154  ;;  %v6057_v46 = vpop.permute.xlu2 %2238 }
 0x43e   : > { %7542 = vst [vmem:[#allocation122_spill] sm:$0xff] %v6057_v46  ;;  %v6059_v51 = vpop.permute.xlu0 %2240 }
 0x443   : > { %2436 = vrot.lane.b32.xlu1 %v2396_v33, %s3998_s10  ;;  %2438 = vrot.lane.b32.xlu2 %v2397_v32, %s3998_s10 }
 0x444   : > { %2522 = vrot.lane.b32.xlu0 %v2487_v18, %s4002_s23 }
 0x445   : > { %v6070_v43 = vpop.permute.xlu1 %2160  ;;  %v6072_v26 = vpop.permute.xlu2 %2244 }
 0x446   : > { %7544 = vst [vmem:[#allocation132_spill] sm:$0xff] %v6072_v26  ;;  %v6074_v46 = vpop.permute.xlu0 %2246  ;;  %v7548_v26 = vld [vmem:[#allocation131_spill] sm:$0xff] }
 0x447   : > { %v2493_v29 = vmul.f32 %v7488_v34, %v7548_v26 }
 0x44b   : > { %2442 = vrot.lane.b32.xlu1 %v2399_v54, %s3998_s10  ;;  %2444 = vrot.lane.b32.xlu2 %v2400_v6, %s3998_s10 }
 0x44c   : > { %2528 = vrot.lane.b32.xlu0 %v2490_v55, %s4002_s23 }
 0x44d   : > { %v6085_v33 = vpop.permute.xlu1 %2230  ;;  %v6087_v32 = vpop.permute.xlu2 %2250 }
 0x44e   : > { %7546 = vst [vmem:[#allocation206_spill] sm:$0xff] %v6087_v32  ;;  %v6089_v18 = vpop.permute.xlu0 %2252  ;;  %v7551_v32 = vld [vmem:[#allocation125_spill] sm:$0xff] }
 0x44f   : > { %7547 = vst [vmem:[#allocation209_spill] sm:$0xff] %v6089_v18  ;;  %v2485_v37 = vmul.f32 %v5514_v11, %v7551_v32  ;;  %v2594_v18 = vmul.f32 %v5690_v35, %v7553_v9  ;;  %v7557_v11 = vld [vmem:[#allocation149_spill] sm:$0xff]  ;;  %v2489_v9 = vmul.f32 %v5572_v10, %v7558_v28  ;;  %v7562_v28 = vld [vmem:[#allocation59_spill] sm:$0xff] }
 0x450   : > { %v2488_v14 = vmul.f32 %v5530_v40, %v7557_v11 }
 0x453   : > { %2448 = vrot.lane.b32.xlu1 %v2402_v22, %s3998_s10  ;;  %2450 = vrot.lane.b32.xlu2 %v2403_v12, %s3998_s10  ;;  %s4004_s10 = smov 122  }
 0x454   : > { %2534 = vrot.lane.b32.xlu0 %v2493_v29, %s4002_s23 }
 0x455   : > { %v6100_v55 = vpop.permute.xlu1 %2236  ;;  %v6102_v54 = vpop.permute.xlu2 %2256 }
 0x456   : > { %7549 = vst [vmem:[#allocation140_spill] sm:$0xff] %v6102_v54  ;;  %v6104_v6 = vpop.permute.xlu0 %2258  ;;  %v7556_v54 = vld [vmem:[#allocation50_spill] sm:$0xff] }
 0x457   : > { %7550 = vst [vmem:[#allocation169_spill] sm:$0xff] %v6104_v6  ;;  %v1881_v32 = vmul.f32 %v5572_v10, %v7556_v54  ;;  %v7565_v6 = vld [vmem:[#allocation144_spill] sm:$0xff] }
 0x45b   : > { %2518 = vrot.lane.b32.xlu1 %v2485_v37, %s4002_s23  ;;  %2520 = vrot.lane.b32.xlu2 %v2486_v39, %s4002_s23  ;;  %v7559_v37 = vld [vmem:[#allocation163_spill] sm:$0xff] }
 0x45c   : > { %2640 = vrot.lane.b32.xlu0 %v2594_v18, %s4002_s23  ;;  %v2787_v39 = vmul.f32 %v5774_v63, %v7559_v37  ;;  %v1993_v18 = vadd.f32 %v5807_v5, %v1881_v32  ;;  %v1883_v37 = vmul.f32 %v5546_v19, %v7562_v28  ;;  %v7563_v5 = vld [vmem:[#allocation52_spill] sm:$0xff]  ;;  %v7564_v32 = vld [vmem:[#allocation151_spill] sm:$0xff] }
 0x45d   : > { %v6115_v29 = vpop.permute.xlu1 %2242  ;;  %v6117_v22 = vpop.permute.xlu2 %2326 }
 0x45e   : > { %7554 = vst [vmem:[#allocation162_spill] sm:$0xff] %v6117_v22  ;;  %v6119_v12 = vpop.permute.xlu0 %2328  ;;  %v2185_v22 = vadd.f32 %v6025_v52, %v1993_v18  ;;  %v1995_v52 = vadd.f32 %v5866_v8, %v1883_v37  ;;  %v7566_v18 = vld [vmem:[#allocation41_spill] sm:$0xff] }
 0x45f   : > { %7555 = vst [vmem:[#allocation166_spill] sm:$0xff] %v6119_v12 }
 0x463   : > { %2524 = vrot.lane.b32.xlu1 %v2488_v14, %s4002_s23  ;;  %2526 = vrot.lane.b32.xlu2 %v2489_v9, %s4002_s23  ;;  %v1884_v14 = vmul.f32 %v7486_v24, %v7563_v5  ;;  %v2491_v9 = vmul.f32 %v5546_v19, %v7564_v32  ;;  %v7572_v32 = vld [vmem:[#allocation185_spill] sm:$0xff] }
 0x464   : > { %2834 = vrot.lane.b32.xlu0 %v2787_v39, %s4003_s30  ;;  %v2492_v39 = vmul.f32 %v7486_v24, %v7565_v6 }
 0x465   : > { %v6134_v12 = vpop.permute.xlu1 %2248  ;;  %v6136_v40 = vpop.permute.xlu2 %2332 }
 0x466   : > { %7560 = vst [vmem:[#allocation129_spill] sm:$0xff] %v6136_v40  ;;  %v2335_v11 = vpop.permute.xlu0 %2334  ;;  %v2978_v40 = vmul.f32 %v5690_v35, %v7566_v18 }
 0x467   : > { %v6138_v10 = vadd.f32 %v2335_v11, %v2185_v22  ;;  %v1996_v11 = vadd.f32 %v5823_v21, %v1884_v14  ;;  %v2187_v22 = vadd.f32 %v5984_v25, %v1995_v52  ;;  %v7568_v21 = vld [vmem:[#allocation62_spill] sm:$0xff] }
 0x468   : > { %v1886_v14 = vmul.f32 %v5569_v0, %v7568_v21  ;;  %v7570_v25 = vld [vmem:[#allocation154_spill] sm:$0xff] }
 0x469   : > { %7561 = vst [vmem:[#allocation152_spill] sm:$0xff] %v6138_v10  ;;  %v2188_v19 = vadd.f32 %v6040_v4, %v1996_v11  ;;  %v2494_v52 = vmul.f32 %v5569_v0, %v7570_v25 }
 0x46a   : > { %v1998_v11 = vadd.f32 %v5885_v50, %v1886_v14 }
 0x46b   : > { %2530 = vrot.lane.b32.xlu1 %v2491_v9, %s4002_s23  ;;  %2532 = vrot.lane.b32.xlu2 %v2492_v39, %s4002_s23  ;;  %v7569_v9 = vld [vmem:[#allocation54_spill] sm:$0xff] }
 0x46c   : > { %3024 = vrot.lane.b32.xlu0 %v2978_v40, %s4004_s10  ;;  %v1887_v39 = vmul.f32 %v7491_v15, %v7569_v9  ;;  %v7571_v40 = vld [vmem:[#allocation147_spill] sm:$0xff] }
 0x46d   : > { %v6157_v10 = vpop.permute.xlu1 %2254  ;;  %v2339_v24 = vpop.permute.xlu2 %2338  ;;  %v2495_v4 = vmul.f32 %v7491_v15, %v7571_v40 }
 0x46e   : > { %v6159_v8 = vadd.f32 %v2339_v24, %v2187_v22  ;;  %v2341_v37 = vpop.permute.xlu0 %2340  ;;  %v2785_v24 = vmul.f32 %v5750_v58, %v7572_v32  ;;  %v2190_v22 = vadd.f32 %v5999_v7, %v1998_v11  ;;  %v7574_v32 = vld [vmem:[#allocation65_spill] sm:$0xff] }
 0x46f   : > { %v6161_v18 = vadd.f32 %v2341_v37, %v2188_v19  ;;  %v1999_v19 = vadd.f32 %v5844_v23, %v1887_v39  ;;  %v1889_v23 = vmul.f32 %v5589_v20, %v7574_v32  ;;  %v7575_v39 = vld [vmem:[#allocation57_spill] sm:$0xff] }
 0x470   : > { %7567 = vst [vmem:[#allocation191_spill] sm:$0xff] %v6159_v8  ;;  %v7577_v11 = vld [vmem:[#allocation177_spill] sm:$0xff] }
 0x471   : > { %v2191_v37 = vadd.f32 %v6055_v17, %v1999_v19  ;;  %v2786_v17 = vmul.f32 %v5690_v35, %v7577_v11  ;;  %v7578_v19 = vld [vmem:[#allocation187_spill] sm:$0xff] }
 0x473   : > { %2536 = vrot.lane.b32.xlu1 %v2494_v52, %s4002_s23  ;;  %2538 = vrot.lane.b32.xlu2 %v2495_v4, %s4002_s23  ;;  %v1890_v52 = vmul.f32 %v7497_v42, %v7575_v39  ;;  %v7576_v4 = vld [vmem:[#allocation137_spill] sm:$0xff] }
 0x474   : > { %2830 = vrot.lane.b32.xlu0 %v2785_v24, %s4003_s30  ;;  %v2595_v7 = vmul.f32 %v5774_v63, %v7576_v4  ;;  %v2001_v24 = vadd.f32 %v5904_v59, %v1889_v23 }
 0x475   : > { %v6180_v0 = vpop.permute.xlu1 %2324  ;;  %v2345_v15 = vpop.permute.xlu2 %2344 }
 0x476   : > { %v6182_v8 = vadd.f32 %v2345_v15, %v2190_v22  ;;  %v2347_v50 = vpop.permute.xlu0 %2346  ;;  %v2976_v15 = vmul.f32 %v5754_v48, %v7578_v19  ;;  %v2002_v22 = vadd.f32 %v5862_v53, %v1890_v52  ;;  %v7581_v19 = vld [vmem:[#allocation195_spill] sm:$0xff]  ;;  %v7582_v52 = vld [vmem:[#allocation44_spill] sm:$0xff] }
 0x477   : > { %v6184_v14 = vadd.f32 %v2347_v50, %v2191_v37  ;;  %v2193_v37 = vadd.f32 %v6014_v36, %v2001_v24  ;;  %v1882_v53 = vmul.f32 %v5517_v38, %v7581_v19  ;;  %v7584_v24 = vld [vmem:[#allocation134_spill] sm:$0xff]  ;;  %v7588_v38 = vld [vmem:[#allocation112_spill] sm:$0xff] }
 0x478   : > { %7573 = vst [vmem:[#allocation160_spill] sm:$0xff] %v6182_v8  ;;  %v2194_v50 = vadd.f32 %v6070_v43, %v2002_v22  ;;  %v2592_v43 = vmul.f32 %v5754_v48, %v7584_v24 }
 0x47b   : > { %2642 = vrot.lane.b32.xlu1 %v2595_v7, %s4002_s23  ;;  %2832 = vrot.lane.b32.xlu2 %v2786_v17, %s4003_s30  ;;  %v1892_v7 = vmul.f32 %v5667_v45, %v7582_v52  ;;  %v7583_v17 = vld [vmem:[#allocation192_spill] sm:$0xff] }
 0x47c   : > { %3020 = vrot.lane.b32.xlu0 %v2976_v15, %s4004_s10  ;;  %v1893_v36 = vmul.f32 %v5663_v30, %v7583_v17  ;;  %v7585_v15 = vld [vmem:[#allocation157_spill] sm:$0xff] }
 0x47d   : > { %v6203_v4 = vpop.permute.xlu1 %2330  ;;  %v2351_v11 = vpop.permute.xlu2 %2350  ;;  %v2593_v22 = vmul.f32 %v5750_v58, %v7585_v15 }
 0x47e   : > { %v6205_v20 = vadd.f32 %v2351_v11, %v2193_v37  ;;  %v2353_v59 = vpop.permute.xlu0 %2352  ;;  %v1994_v11 = vadd.f32 %v5809_v41, %v1882_v53  ;;  %v2084_v37 = vadd.f32 %v5922_v49, %v1892_v7 }
 0x47f   : > { %v6207_v23 = vadd.f32 %v2353_v59, %v2194_v50  ;;  %v7586_v50 = vld [vmem:[#allocation175_spill] sm:$0xff] }
 0x480   : > { %7579 = vst [vmem:[#allocation208_spill] sm:$0xff] %v6205_v20  ;;  %v2783_v59 = vmul.f32 %v5655_v47, %v7586_v50  ;;  %v2186_v8 = vadd.f32 %v7588_v38, %v1994_v11  ;;  %v2276_v24 = vadd.f32 %v6029_v62, %v2084_v37  ;;  %v7593_v62 = vld [vmem:[#allocation56_spill] sm:$0xff]  ;;  %v7594_v37 = vld [vmem:[#allocation190_spill] sm:$0xff] }
 0x481   : > { %7580 = vst [vmem:[#allocation180_spill] sm:$0xff] %v6207_v23  ;;  %v7587_v23 = vld [vmem:[#allocation117_spill] sm:$0xff]  ;;  %v1896_v11 = vmul.f32 %v5682_v56, %v7593_v62 }
 0x482   : > { %v2085_v20 = vadd.f32 %v7587_v23, %v1893_v36  ;;  %v7591_v36 = vld [vmem:[#allocation198_spill] sm:$0xff] }
 0x483   : > { %2636 = vrot.lane.b32.xlu1 %v2592_v43, %s4002_s23  ;;  %2638 = vrot.lane.b32.xlu2 %v2593_v22, %s4002_s23  ;;  %v1885_v43 = vmul.f32 %v7488_v34, %v7591_v36  ;;  %v7592_v22 = vld [vmem:[#allocation47_spill] sm:$0xff]  ;;  %v7600_v34 = vld [vmem:[#allocation193_spill] sm:$0xff] }
 0x484   : > { %2826 = vrot.lane.b32.xlu0 %v2783_v59, %s4003_s30  ;;  %v2277_v15 = vadd.f32 %v6085_v33, %v2085_v20  ;;  %v1895_v38 = vmul.f32 %v5686_v27, %v7592_v22  ;;  %v2979_v20 = vmul.f32 %v5774_v63, %v7594_v37  ;;  %v7595_v33 = vld [vmem:[#allocation161_spill] sm:$0xff] }
 0x485   : > { %v2337_v41 = vpop.permute.xlu1 %2336  ;;  %v2421_v53 = vpop.permute.xlu2 %2420 }
 0x486   : > { %v6230_v49 = vadd.f32 %v2337_v41, %v2186_v8  ;;  %v6232_v7 = vadd.f32 %v2421_v53, %v2276_v24  ;;  %v2423_v50 = vpop.permute.xlu0 %2422  ;;  %v2784_v8 = vmul.f32 %v5754_v48, %v7595_v33  ;;  %v7596_v24 = vld [vmem:[#allocation118_spill] sm:$0xff]  ;;  %v7597_v41 = vld [vmem:[#allocation171_spill] sm:$0xff] }
 0x487   : > { %v6234_v23 = vadd.f32 %v2423_v50, %v2277_v15  ;;  %v1997_v59 = vadd.f32 %v7596_v24, %v1885_v43  ;;  %v2087_v15 = vadd.f32 %v7597_v41, %v1895_v38  ;;  %v7598_v50 = vld [vmem:[#allocation37_spill] sm:$0xff] }
 0x488   : > { %7589 = vst [vmem:[#allocation188_spill] sm:$0xff] %v6232_v7  ;;  %v2974_v53 = vmul.f32 %v5729_v2, %v7598_v50 }
 0x489   : > { %7590 = vst [vmem:[#allocation210_spill] sm:$0xff] %v6234_v23  ;;  %v7599_v23 = vld [vmem:[#allocation138_spill] sm:$0xff]  ;;  %v2189_v45 = vadd.f32 %v7600_v34, %v1997_v59  ;;  %v2279_v37 = vadd.f32 %v6044_v13, %v2087_v15  ;;  %v1898_v34 = vmul.f32 %v5710_v3, %v7581_v19  ;;  %v1899_v13 = vmul.f32 %v5706_v61, %v7562_v28  ;;  %v7605_v59 = vld [vmem:[#allocation207_spill] sm:$0xff] }
 0x48a   : > { %v2088_v7 = vadd.f32 %v7599_v23, %v1896_v11  ;;  %v7602_v11 = vld [vmem:[#allocation200_spill] sm:$0xff]  ;;  %v7606_v15 = vld [vmem:[#allocation159_spill] sm:$0xff] }
 0x48b   : > { %3026 = vrot.lane.b32.xlu1 %v2979_v20, %s4004_s10  ;;  %2828 = vrot.lane.b32.xlu2 %v2784_v8, %s4003_s30  ;;  %v7603_v20 = vld [vmem:[#allocation104_spill] sm:$0xff] }
 0x48c   : > { %3016 = vrot.lane.b32.xlu0 %v2974_v53, %s4004_s10  ;;  %v2280_v33 = vadd.f32 %v6100_v55, %v2088_v7  ;;  %v1888_v8 = vmul.f32 %v7603_v20, %v7602_v11  ;;  %v2590_v55 = vmul.f32 %v5729_v2, %v7570_v25  ;;  %v7604_v7 = vld [vmem:[#allocation121_spill] sm:$0xff] }
 0x48d   : > { %v2343_v43 = vpop.permute.xlu1 %2342  ;;  %v2427_v24 = vpop.permute.xlu2 %2426  ;;  %v7607_v53 = vld [vmem:[#allocation189_spill] sm:$0xff] }
 0x48e   : > { %v6257_v38 = vadd.f32 %v2343_v43, %v2189_v45  ;;  %v6259_v41 = vadd.f32 %v2427_v24, %v2279_v37  ;;  %v2429_v50 = vpop.permute.xlu0 %2428  ;;  %v2591_v45 = vmul.f32 %v5655_v47, %v7571_v40  ;;  %v2000_v37 = vadd.f32 %v7604_v7, %v1888_v8 }
 0x48f   : > { %v6261_v23 = vadd.f32 %v2429_v50, %v2280_v33  ;;  %v2090_v33 = vadd.f32 %v7605_v59, %v1898_v34  ;;  %v2781_v50 = vmul.f32 %v5733_v1, %v7606_v15  ;;  %v2091_v43 = vadd.f32 %v7607_v53, %v1899_v13  ;;  %v7611_v59 = vld [vmem:[#allocation182_spill] sm:$0xff] }
 0x490   : > { %7601 = vst [vmem:[#allocation34_spill] sm:$0xff] %v6259_v41  ;;  %v2192_v28 = vadd.f32 %v6012_v31, %v2000_v37  ;;  %v1901_v31 = vmul.f32 %v5733_v1, %v7591_v36  ;;  %v7610_v37 = vld [vmem:[#allocation70_spill] sm:$0xff] }
 0x491   : > { %v2282_v25 = vadd.f32 %v6059_v51, %v2090_v33  ;;  %v2283_v40 = vadd.f32 %v6115_v29, %v2091_v43  ;;  %v1902_v51 = vmul.f32 %v5729_v2, %v7568_v21  ;;  %v2977_v29 = vmul.f32 %v5750_v58, %v7610_v37  ;;  %v7613_v43 = vld [vmem:[#allocation196_spill] sm:$0xff] }
 0x492   : > { %v2782_v33 = vmul.f32 %v5729_v2, %v7611_v59 }
 0x493   : > { %2632 = vrot.lane.b32.xlu1 %v2590_v55, %s4002_s23  ;;  %2634 = vrot.lane.b32.xlu2 %v2591_v45, %s4002_s23  ;;  %v7609_v55 = vld [vmem:[#allocation202_spill] sm:$0xff] }
 0x494   : > { %2822 = vrot.lane.b32.xlu0 %v2781_v50, %s4003_s30  ;;  %v1891_v45 = vmul.f32 %v7499_v60, %v7609_v55  ;;  %v7612_v50 = vld [vmem:[#allocation120_spill] sm:$0xff] }
 0x495   : > { %v2349_v19 = vpop.permute.xlu1 %2348  ;;  %v2433_v24 = vpop.permute.xlu2 %2432 }
 0x496   : > { %v6284_v8 = vadd.f32 %v2349_v19, %v2192_v28  ;;  %v6286_v34 = vadd.f32 %v2433_v24, %v2282_v25  ;;  %v2435_v7 = vpop.permute.xlu0 %2434  ;;  %v2003_v53 = vadd.f32 %v7612_v50, %v1891_v45  ;;  %v2093_v28 = vadd.f32 %v7613_v43, %v1901_v31  ;;  %v7614_v25 = vld [vmem:[#allocation201_spill] sm:$0xff] }
 0x497   : > { %v6288_v13 = vadd.f32 %v2435_v7, %v2283_v40  ;;  %v2972_v40 = vmul.f32 %v5644_v57, %v7614_v25  ;;  %v7615_v19 = vld [vmem:[#allocation173_spill] sm:$0xff] }
 0x498   : > { %7608 = vst [vmem:[#allocation48_spill] sm:$0xff] %v6284_v8  ;;  %v2094_v24 = vadd.f32 %v7615_v19, %v1902_v51  ;;  %v2195_v21 = vadd.f32 %v6027_v16, %v2003_v53  ;;  %v2285_v36 = vadd.f32 %v6074_v46, %v2093_v28  ;;  %v7618_v19 = vld [vmem:[#allocation99_spill] sm:$0xff]  ;;  %v1904_v16 = vmul.f32 %v5754_v48, %v7602_v11  ;;  %v7619_v28 = vld [vmem:[#allocation28_spill] sm:$0xff]  ;;  %v7623_v48 = vld [vmem:[#allocation209_spill] sm:$0xff] }
 0x499   : > { %v1905_v46 = vmul.f32 %v5750_v58, %v7574_v32  ;;  %v2589_v53 = vmul.f32 %v5733_v1, %v7548_v26  ;;  %v7643_v8 = vld [vmem:[#allocation183_spill] sm:$0xff] }
 0x49a   : > { %v2286_v2 = vadd.f32 %v6134_v12, %v2094_v24  ;;  %v2588_v12 = vmul.f32 %v5644_v57, %v7565_v6  ;;  %v7620_v24 = vld [vmem:[#allocation155_spill] sm:$0xff] }
 0x49b   : > { %3022 = vrot.lane.b32.xlu1 %v2977_v29, %s4004_s10  ;;  %2824 = vrot.lane.b32.xlu2 %v2782_v33, %s4003_s30  ;;  %v7617_v29 = vld [vmem:[#allocation53_spill] sm:$0xff] }
 0x49c   : > { %3012 = vrot.lane.b32.xlu0 %v2972_v40, %s4004_s10  ;;  %v1894_v33 = vmul.f32 %v7618_v19, %v7617_v29 }
 0x49d   : > { %v2355_v7 = vpop.permute.xlu1 %2354  ;;  %v2439_v45 = vpop.permute.xlu2 %2438 }
 0x49e   : > { %v6311_v31 = vadd.f32 %v2355_v7, %v2195_v21  ;;  %v6313_v50 = vadd.f32 %v2439_v45, %v2285_v36  ;;  %v2441_v43 = vpop.permute.xlu0 %2440  ;;  %v2086_v40 = vadd.f32 %v7619_v28, %v1894_v33  ;;  %v2096_v21 = vadd.f32 %v7620_v24, %v1904_v16  ;;  %v7621_v36 = vld [vmem:[#allocation179_spill] sm:$0xff]  ;;  %v7626_v24 = vld [vmem:[#allocation133_spill] sm:$0xff] }
 0x49f   : > { %v6315_v51 = vadd.f32 %v2441_v43, %v2286_v2  ;;  %v2779_v2 = vmul.f32 %v5706_v61, %v7621_v36  ;;  %v7622_v7 = vld [vmem:[#allocation167_spill] sm:$0xff] }
 0x4a0   : > { %7616 = vst [vmem:[#allocation74_spill] sm:$0xff] %v6311_v31  ;;  %v2097_v45 = vadd.f32 %v7622_v7, %v1905_v46  ;;  %v2278_v58 = vadd.f32 %v6042_v44, %v2086_v40  ;;  %v2288_v6 = vadd.f32 %v7623_v48, %v2096_v21  ;;  %v7624_v46 = vld [vmem:[#allocation67_spill] sm:$0xff]  ;;  %v1907_v40 = vmul.f32 %v5774_v63, %v7609_v55  ;;  %v7627_v21 = vld [vmem:[#allocation204_spill] sm:$0xff]  ;;  %v7633_v63 = vld [vmem:[#allocation122_spill] sm:$0xff] }
 0x4a1   : > { %v7625_v44 = vld [vmem:[#allocation83_spill] sm:$0xff]  ;;  %v7628_v7 = vld [vmem:[#allocation172_spill] sm:$0xff] }
 0x4a2   : > { %v2289_v26 = vadd.f32 %v6157_v10, %v2097_v45  ;;  %v2780_v45 = vmul.f32 %v5644_v57, %v7628_v7 }
 0x4a3   : > { %2628 = vrot.lane.b32.xlu1 %v2588_v12, %s4002_s23  ;;  %2630 = vrot.lane.b32.xlu2 %v2589_v53, %s4002_s23  ;;  %v1876_v12 = vmul.f32 %v7624_v46, %v7582_v52  ;;  %v1897_v53 = vmul.f32 %v7625_v44, %v7556_v54 }
 0x4a4   : > { %2818 = vrot.lane.b32.xlu0 %v2779_v2, %s4003_s30  ;;  %v2975_v2 = vmul.f32 %v5655_v47, %v7627_v21 }
 0x4a5   : > { %v2425_v32 = vpop.permute.xlu1 %2424  ;;  %v2445_v11 = vpop.permute.xlu2 %2444  ;;  %v1988_v10 = vadd.f32 %v7626_v24, %v1876_v12 }
 0x4a6   : > { %v6338_v43 = vadd.f32 %v2425_v32, %v2278_v58  ;;  %v6340_v33 = vadd.f32 %v2445_v11, %v2288_v6  ;;  %v2447_v16 = vpop.permute.xlu0 %2446  ;;  %v7629_v58 = vld [vmem:[#allocation148_spill] sm:$0xff]  ;;  %v7630_v6 = vld [vmem:[#allocation143_spill] sm:$0xff] }
 0x4a7   : > { %v6344_v28 = vadd.f32 %v2447_v16, %v2289_v26  ;;  %v2089_v48 = vadd.f32 %v7629_v58, %v1897_v53  ;;  %v2099_v52 = vadd.f32 %v7630_v6, %v1907_v40  ;;  %v7631_v26 = vld [vmem:[#allocation181_spill] sm:$0xff]  ;;  %v7632_v11 = vld [vmem:[#allocation124_spill] sm:$0xff] }
 0x4a8   : > { %v2970_v32 = vmul.f32 %v5710_v3, %v7631_v26  ;;  %v2180_v54 = vadd.f32 %v7632_v11, %v1988_v10  ;;  %v7634_v16 = vld [vmem:[#allocation169_spill] sm:$0xff]  ;;  %v7635_v40 = vld [vmem:[#allocation92_spill] sm:$0xff] }
 0x4a9   : > { %v2281_v55 = vadd.f32 %v7633_v63, %v2089_v48  ;;  %v2291_v12 = vadd.f32 %v7634_v16, %v2099_v52  ;;  %v1878_v6 = vmul.f32 %v7635_v40, %v7617_v29  ;;  %v7638_v52 = vld [vmem:[#allocation130_spill] sm:$0xff]  ;;  %v7640_v16 = vld [vmem:[#allocation128_spill] sm:$0xff] }
 0x4aa   : > { %v2372_v24 = vadd.f32 %v6180_v0, %v2180_v54  ;;  %v1900_v0 = vmul.f32 %v5644_v57, %v7563_v5  ;;  %v2586_v29 = vmul.f32 %v5710_v3, %v7640_v16  ;;  %v7646_v57 = vld [vmem:[#allocation132_spill] sm:$0xff] }
 0x4ab   : > { %3018 = vrot.lane.b32.xlu1 %v2975_v2, %s4004_s10  ;;  %2820 = vrot.lane.b32.xlu2 %v2780_v45, %s4003_s30  ;;  %v7636_v45 = vld [vmem:[#allocation76_spill] sm:$0xff]  ;;  %v1990_v63 = vadd.f32 %v7638_v52, %v1878_v6 }
 0x4ac   : > { %3008 = vrot.lane.b32.xlu0 %v2970_v32, %s4004_s10  ;;  %v1879_v11 = vmul.f32 %v7636_v45, %v7592_v22  ;;  %v7639_v32 = vld [vmem:[#allocation94_spill] sm:$0xff] }
 0x4ad   : > { %v2431_v53 = vpop.permute.xlu1 %2430  ;;  %v2451_v58 = vpop.permute.xlu2 %2450  ;;  %v2182_v41 = vadd.f32 %v7643_v8, %v1990_v63  ;;  %v7644_v22 = vld [vmem:[#allocation170_spill] sm:$0xff] }
 0x4ae   : > { %v6368_v31 = vadd.f32 %v2431_v53, %v2281_v55  ;;  %v6370_v10 = vadd.f32 %v2451_v58, %v2291_v12  ;;  %v2517_v2 = vpop.permute.xlu0 %2516  ;;  %v1991_v54 = vadd.f32 %v7639_v32, %v1879_v11  ;;  %v7641_v55 = vld [vmem:[#allocation151_spill] sm:$0xff]  ;;  %v7642_v53 = vld [vmem:[#allocation145_spill] sm:$0xff]  ;;  %v7647_v11 = vld [vmem:[#allocation166_spill] sm:$0xff] }
 0x4af   : > { %v6374_v48 = vadd.f32 %v2517_v2, %v2372_v24  ;;  %v2587_v12 = vmul.f32 %v5706_v61, %v7641_v55  ;;  %v2092_v58 = vadd.f32 %v7642_v53, %v1900_v0  ;;  %v2777_v24 = vmul.f32 %v7625_v44, %v7644_v22  ;;  %v7645_v2 = vld [vmem:[#allocation186_spill] sm:$0xff] }
 0x4b0   : > { %v2183_v6 = vadd.f32 %v7645_v2, %v1991_v54  ;;  %v2374_v52 = vadd.f32 %v7647_v11, %v2182_v41  ;;  %v7651_v41 = vld [vmem:[#allocation156_spill] sm:$0xff]  ;;  %v7653_v2 = vld [vmem:[#allocation38_spill] sm:$0xff] }
 0x4b1   : > { %7637 = vst [vmem:[#allocation77_spill] sm:$0xff] %v6374_v48  ;;  %v2284_v5 = vadd.f32 %v7646_v57, %v2092_v58  ;;  %v2778_v58 = vmul.f32 %v5710_v3, %v7651_v41  ;;  %v7654_v57 = vld [vmem:[#allocation206_spill] sm:$0xff]  ;;  %v7677_v48 = vld [vmem:[#allocation139_spill] sm:$0xff] }
 0x4b2   : > { %v2375_v32 = vadd.f32 %v6203_v4, %v2183_v6  ;;  %v2968_v6 = vmul.f32 %v5682_v56, %v7653_v2 }
 0x4b3   : > { %2624 = vrot.lane.b32.xlu1 %v2586_v29, %s4002_s23  ;;  %2626 = vrot.lane.b32.xlu2 %v2587_v12, %s4002_s23  ;;  %v1903_v29 = vmul.f32 %v5655_v47, %v7569_v9  ;;  %v7650_v12 = vld [vmem:[#allocation184_spill] sm:$0xff] }
 0x4b4   : > { %2814 = vrot.lane.b32.xlu0 %v2777_v24, %s4003_s30  ;;  %v2973_v53 = vmul.f32 %v5733_v1, %v7650_v12  ;;  %v7652_v24 = vld [vmem:[#allocation127_spill] sm:$0xff]  ;;  %v7655_v1 = vld [vmem:[#allocation152_spill] sm:$0xff] }
 0x4b5   : > { %v2437_v0 = vpop.permute.xlu1 %2436  ;;  %v2521_v16 = vpop.permute.xlu2 %2520  ;;  %v2095_v4 = vadd.f32 %v7652_v24, %v1903_v29  ;;  %v7659_v29 = vld [vmem:[#allocation142_spill] sm:$0xff] }
 0x4b6   : > { %v6395_v8 = vadd.f32 %v2437_v0, %v2284_v5  ;;  %v6397_v63 = vadd.f32 %v2521_v16, %v2374_v52  ;;  %v2523_v55 = vpop.permute.xlu0 %2522  ;;  %v1906_v0 = vmul.f32 %v5690_v35, %v7575_v39  ;;  %v7658_v16 = vld [vmem:[#allocation149_spill] sm:$0xff] }
 0x4b7   : > { %v6399_v54 = vadd.f32 %v2523_v55, %v2375_v32  ;;  %v2287_v5 = vadd.f32 %v7654_v57, %v2095_v4  ;;  %v2584_v55 = vmul.f32 %v5682_v56, %v7658_v16  ;;  %v7661_v4 = vld [vmem:[#allocation168_spill] sm:$0xff] }
 0x4b8   : > { %7648 = vst [vmem:[#allocation69_spill] sm:$0xff] %v6397_v63  ;;  %v7666_v16 = vld [vmem:[#allocation96_spill] sm:$0xff] }
 0x4b9   : > { %7649 = vst [vmem:[#allocation72_spill] sm:$0xff] %v6399_v54  ;;  %v7679_v54 = vld [vmem:[#allocation153_spill] sm:$0xff] }
 0x4ba   : > { %v2773_v63 = vmul.f32 %v5663_v30, %v7679_v54 }
 0x4bb   : > { %3014 = vrot.lane.b32.xlu1 %v2973_v53, %s4004_s10  ;;  %2816 = vrot.lane.b32.xlu2 %v2778_v58, %s4003_s30  ;;  %v2585_v53 = vmul.f32 %v7625_v44, %v7659_v29  ;;  %v7660_v58 = vld [vmem:[#allocation158_spill] sm:$0xff] }
 0x4bc   : > { %3004 = vrot.lane.b32.xlu0 %v2968_v6, %s4004_s10  ;;  %v2098_v24 = vadd.f32 %v7660_v58, %v1906_v0  ;;  %v2775_v6 = vmul.f32 %v5686_v27, %v7661_v4  ;;  %v7667_v29 = vld [vmem:[#allocation42_spill] sm:$0xff]  ;;  %v7668_v58 = vld [vmem:[#allocation176_spill] sm:$0xff] }
 0x4bd   : > { %v2443_v47 = vpop.permute.xlu1 %2442  ;;  %v2527_v9 = vpop.permute.xlu2 %2526 }
 0x4be   : > { %v6414_v11 = vadd.f32 %v2443_v47, %v2287_v5  ;;  %v6417_v52 = vadd.f32 %v2527_v9, %v7655_v1  ;;  %v2529_v3 = vpop.permute.xlu0 %2528  ;;  %v7663_v5 = vld [vmem:[#allocation71_spill] sm:$0xff] }
 0x4bf   : > { %v6420_v32 = vadd.f32 %v2529_v3, %v6230_v49  ;;  %v7662_v49 = vld [vmem:[#allocation140_spill] sm:$0xff]  ;;  %v1877_v47 = vmul.f32 %v7663_v5, %v7583_v17  ;;  %v7670_v17 = vld [vmem:[#allocation203_spill] sm:$0xff] }
 0x4c0   : > { %7656 = vst [vmem:[#allocation87_spill] sm:$0xff] %v6417_v52  ;;  %v2290_v57 = vadd.f32 %v7662_v49, %v2098_v24  ;;  %v2776_v24 = vmul.f32 %v5682_v56, %v7668_v58  ;;  %v7690_v52 = vld [vmem:[#allocation163_spill] sm:$0xff] }
 0x4c1   : > { %7657 = vst [vmem:[#allocation75_spill] sm:$0xff] %v6420_v32  ;;  %v7694_v32 = vld [vmem:[#allocation165_spill] sm:$0xff] }
 0x4c3   : > { %2620 = vrot.lane.b32.xlu1 %v2584_v55, %s4002_s23  ;;  %2622 = vrot.lane.b32.xlu2 %v2585_v53, %s4002_s23  ;;  %v1989_v55 = vadd.f32 %v7666_v16, %v1877_v47  ;;  %v2971_v53 = vmul.f32 %v5706_v61, %v7667_v29  ;;  %v7672_v61 = vld [vmem:[#allocation110_spill] sm:$0xff] }
 0x4c4   : > { %2810 = vrot.lane.b32.xlu0 %v2775_v6, %s4003_s30  ;;  %v7669_v6 = vld [vmem:[#allocation164_spill] sm:$0xff]  ;;  %v1880_v47 = vmul.f32 %v7672_v61, %v7593_v62 }
 0x4c5   : > { %v2449_v35 = vpop.permute.xlu1 %2448  ;;  %v2533_v39 = vpop.permute.xlu2 %2532  ;;  %v2181_v49 = vadd.f32 %v7669_v6, %v1989_v55  ;;  %v7675_v55 = vld [vmem:[#allocation135_spill] sm:$0xff] }
 0x4c6   : > { %v6437_v9 = vadd.f32 %v2449_v35, %v2290_v57  ;;  %v6440_v1 = vadd.f32 %v2533_v39, %v6161_v18  ;;  %v2535_v3 = vpop.permute.xlu0 %2534  ;;  %v2966_v57 = vmul.f32 %v7618_v19, %v7670_v17  ;;  %v7671_v18 = vld [vmem:[#allocation162_spill] sm:$0xff]  ;;  %v1992_v6 = vadd.f32 %v7675_v55, %v1880_v47  ;;  %v7682_v55 = vld [vmem:[#allocation199_spill] sm:$0xff] }
 0x4c7   : > { %v6443_v0 = vadd.f32 %v2535_v3, %v6257_v38  ;;  %v2373_v38 = vadd.f32 %v7671_v18, %v2181_v49  ;;  %v2583_v49 = vmul.f32 %v5686_v27, %v7677_v48  ;;  %v2969_v48 = vmul.f32 %v7625_v44, %v7682_v55  ;;  %v7688_v44 = vld [vmem:[#allocation115_spill] sm:$0xff] }
 0x4c8   : > { %7664 = vst [vmem:[#allocation84_spill] sm:$0xff] %v6440_v1  ;;  %v7697_v1 = vld [vmem:[#allocation178_spill] sm:$0xff] }
 0x4c9   : > { %7665 = vst [vmem:[#allocation90_spill] sm:$0xff] %v6443_v0  ;;  %v7695_v0 = vld [vmem:[#allocation41_spill] sm:$0xff] }
 0x4cb   : > { %3010 = vrot.lane.b32.xlu1 %v2971_v53, %s4004_s10  ;;  %2812 = vrot.lane.b32.xlu2 %v2776_v24, %s4003_s30  ;;  %v7676_v53 = vld [vmem:[#allocation146_spill] sm:$0xff] }
 0x4cc   : > { %3000 = vrot.lane.b32.xlu0 %v2966_v57, %s4004_s10  ;;  %v2582_v24 = vmul.f32 %v7618_v19, %v7676_v53  ;;  %v7678_v57 = vld [vmem:[#allocation114_spill] sm:$0xff] }
 0x4cd   : > { %v2519_v35 = vpop.permute.xlu1 %2518  ;;  %v2539_v39 = vpop.permute.xlu2 %2538  ;;  %v2184_v18 = vadd.f32 %v7678_v57, %v1992_v6  ;;  %v7683_v6 = vld [vmem:[#allocation174_spill] sm:$0xff] }
 0x4ce   : > { %v6459_v3 = vadd.f32 %v2519_v35, %v2373_v38  ;;  %v6462_v56 = vadd.f32 %v2539_v39, %v6184_v14  ;;  %v2641_v16 = vpop.permute.xlu0 %2640  ;;  %v7680_v14 = vld [vmem:[#allocation129_spill] sm:$0xff]  ;;  %v2774_v53 = vmul.f32 %v7618_v19, %v7683_v6  ;;  %v7684_v57 = vld [vmem:[#allocation150_spill] sm:$0xff] }
 0x4cf   : > { %v2376_v62 = vadd.f32 %v7680_v14, %v2184_v18  ;;  %v7685_v18 = vld [vmem:[#allocation191_spill] sm:$0xff] }
 0x4d0   : > { %7673 = vst [vmem:[#allocation78_spill] sm:$0xff] %v6459_v3 }
 0x4d1   : > { %7674 = vst [vmem:[#allocation80_spill] sm:$0xff] %v6462_v56  ;;  %v7699_v56 = vld [vmem:[#allocation102_spill] sm:$0xff] }
 0x4d3   : > { %2616 = vrot.lane.b32.xlu1 %v2582_v24, %s4002_s23  ;;  %2618 = vrot.lane.b32.xlu2 %v2583_v49, %s4002_s23  ;;  %v2498_v24 = vmul.f32 %v7497_v42, %v7684_v57  ;;  %v2691_v57 = vmul.f32 %v7499_v60, %v7690_v52  ;;  %v2882_v52 = vmul.f32 %v7497_v42, %v7695_v0 }
 0x4d4   : > { %2806 = vrot.lane.b32.xlu0 %v2773_v63, %s4003_s30 }
 0x4d5   : > { %v2525_v38 = vpop.permute.xlu1 %2524  ;;  %v2833_v35 = vpop.permute.xlu2 %2832 }
 0x4d6   : > { %v6476_v39 = vadd.f32 %v2525_v38, %v2376_v62  ;;  %v2835_v47 = vpop.permute.xlu0 %2834  ;;  %v7687_v38 = vld [vmem:[#allocation136_spill] sm:$0xff] }
 0x4d7   : > { %v2580_v3 = vmul.f32 %v7688_v44, %v7687_v38 }
 0x4d8   : > { %7681 = vst [vmem:[#allocation93_spill] sm:$0xff] %v6476_v39  ;;  %v7689_v39 = vld [vmem:[#allocation125_spill] sm:$0xff] }
 0x4d9   : > { %v2581_v19 = vmul.f32 %v5663_v30, %v7689_v39  ;;  %v2772_v39 = vmul.f32 %v7688_v44, %v7694_v32  ;;  %v7700_v32 = vld [vmem:[#allocation137_spill] sm:$0xff] }
 0x4db   : > { %3006 = vrot.lane.b32.xlu1 %v2969_v48, %s4004_s10  ;;  %2808 = vrot.lane.b32.xlu2 %v2774_v53, %s4003_s30 }
 0x4dc   : > { %2544 = vrot.lane.b32.xlu0 %v2498_v24, %s4002_s23  ;;  %v7691_v24 = vld [vmem:[#allocation160_spill] sm:$0xff] }
 0x4dd   : > { %v2531_v63 = vpop.permute.xlu1 %2530  ;;  %v2639_v49 = vpop.permute.xlu2 %2638 }
 0x4de   : > { %v6488_v14 = vadd.f32 %v2531_v63, %v7685_v18  ;;  %v3025_v62 = vpop.permute.xlu0 %3024 }
 0x4e0   : > { %7686 = vst [vmem:[#allocation81_spill] sm:$0xff] %v6488_v14  ;;  %v7693_v14 = vld [vmem:[#allocation197_spill] sm:$0xff] }
 0x4e1   : > { %v2967_v38 = vmul.f32 %v5686_v27, %v7693_v14  ;;  %v2965_v27 = vmul.f32 %v5663_v30, %v7697_v1  ;;  %v2674_v1 = vadd.f32 %v2641_v16, %v6437_v9  ;;  %v7703_v16 = vld [vmem:[#allocation157_spill] sm:$0xff] }
 0x4e3   : > { %2612 = vrot.lane.b32.xlu1 %v2580_v3, %s4002_s23  ;;  %2614 = vrot.lane.b32.xlu2 %v2581_v19, %s4002_s23 }
 0x4e4   : > { %2738 = vrot.lane.b32.xlu0 %v2691_v57, %s4003_s30 }
 0x4e5   : > { %v2537_v48 = vpop.permute.xlu1 %2536  ;;  %v2829_v53 = vpop.permute.xlu2 %2828 }
 0x4e6   : > { %v6500_v63 = vadd.f32 %v2537_v48, %v7691_v24  ;;  %v2831_v18 = vpop.permute.xlu0 %2830  ;;  %v7696_v48 = vld [vmem:[#allocation194_spill] sm:$0xff] }
 0x4e7   : > { %v2964_v24 = vmul.f32 %v7688_v44, %v7696_v48  ;;  %v2499_v44 = vmul.f32 %v7499_v60, %v7700_v32  ;;  %v7701_v48 = vld [vmem:[#allocation177_spill] sm:$0xff] }
 0x4e8   : > { %7692 = vst [vmem:[#allocation82_spill] sm:$0xff] %v6500_v63  ;;  %v7698_v63 = vld [vmem:[#allocation185_spill] sm:$0xff]  ;;  %v2690_v30 = vmul.f32 %v7497_v42, %v7701_v48  ;;  %v7702_v42 = vld [vmem:[#allocation134_spill] sm:$0xff] }
 0x4e9   : > { %v2689_v46 = vmul.f32 %v7699_v56, %v7698_v63  ;;  %v2881_v63 = vmul.f32 %v7699_v56, %v7610_v37  ;;  %v2496_v9 = vmul.f32 %v7603_v20, %v7702_v42  ;;  %v2497_v37 = vmul.f32 %v7699_v56, %v7703_v16  ;;  %v7706_v42 = vld [vmem:[#allocation187_spill] sm:$0xff] }
 0x4ea   : > { %v7708_v16 = vld [vmem:[#allocation175_spill] sm:$0xff] }
 0x4eb   : > { %3002 = vrot.lane.b32.xlu1 %v2967_v38, %s4004_s10  ;;  %2804 = vrot.lane.b32.xlu2 %v2772_v39, %s4003_s30 }
 0x4ec   : > { %2928 = vrot.lane.b32.xlu0 %v2882_v52, %s4004_s10 }
 0x4ed   : > { %v2643_v3 = vpop.permute.xlu1 %2642  ;;  %v2635_v19 = vpop.permute.xlu2 %2634 }
 0x4ee   : > { %v3021_v57 = vpop.permute.xlu0 %3020  ;;  %v2675_v52 = vadd.f32 %v2643_v3, %v6370_v10 }
 0x4f3   : > { %2996 = vrot.lane.b32.xlu1 %v2964_v24, %s4004_s10  ;;  %2998 = vrot.lane.b32.xlu2 %v2965_v27, %s4004_s10  ;;  %v2867_v24 = vadd.f32 %v2835_v47, %v2675_v52  ;;  %v7704_v52 = vld [vmem:[#allocation190_spill] sm:$0xff] }
 0x4f4   : > { %2734 = vrot.lane.b32.xlu0 %v2689_v46, %s4003_s30  ;;  %v2866_v46 = vadd.f32 %v2833_v35, %v2674_v1 }
 0x4f5   : > { %v2637_v0 = vpop.permute.xlu1 %2636  ;;  %v2825_v38 = vpop.permute.xlu2 %2824 }
 0x4f6   : > { %v2827_v39 = vpop.permute.xlu0 %2826  ;;  %v3058_v27 = vadd.f32 %v3025_v62, %v2866_v46  ;;  %v2672_v47 = vadd.f32 %v2637_v0, %v6340_v33  ;;  %v2883_v62 = vmul.f32 %v7499_v60, %v7704_v52  ;;  %v2880_v60 = vmul.f32 %v7603_v20, %v7706_v42  ;;  %v7710_v52 = vld [vmem:[#allocation43_spill] sm:$0xff] }
 0x4f8   : > { %v2864_v46 = vadd.f32 %v2829_v53, %v2672_v47 }
 0x4fb   : > { %2546 = vrot.lane.b32.xlu1 %v2499_v44, %s4002_s23  ;;  %2736 = vrot.lane.b32.xlu2 %v2690_v30, %s4003_s30  ;;  %v7705_v44 = vld [vmem:[#allocation161_spill] sm:$0xff] }
 0x4fc   : > { %2926 = vrot.lane.b32.xlu0 %v2881_v63, %s4004_s10  ;;  %v2688_v30 = vmul.f32 %v7603_v20, %v7705_v44  ;;  %v2673_v63 = vadd.f32 %v2639_v49, %v6344_v28  ;;  %v2686_v20 = vmul.f32 %v7710_v52, %v7611_v59 }
 0x4fd   : > { %v3027_v10 = vpop.permute.xlu1 %3026  ;;  %v2631_v3 = vpop.permute.xlu2 %2630 }
 0x4fe   : > { %v3059_v32 = vadd.f32 %v3027_v10, %v2867_v24  ;;  %v3017_v14 = vpop.permute.xlu0 %3016  ;;  %v2865_v56 = vadd.f32 %v2831_v18, %v2673_v63 }
 0x500   : > { %v3736_v5 = vpack.i.bf16 %v3059_v32, %v3058_v27  ;;  %v3056_v27 = vadd.f32 %v3021_v57, %v2864_v46 }
 0x503   : > { %2540 = vrot.lane.b32.xlu1 %v2496_v9, %s4002_s23  ;;  %2542 = vrot.lane.b32.xlu2 %v2497_v37, %s4002_s23  ;;  %v7707_v9 = vld [vmem:[#allocation141_spill] sm:$0xff] }
 0x504   : > { %v2684_v57 = vmul.f32 %v7707_v9, %v7628_v7  ;;  %v7709_v37 = vld [vmem:[#allocation101_spill] sm:$0xff] }
 0x505   : > { %v2633_v1 = vpop.permute.xlu1 %2632  ;;  %v2821_v35 = vpop.permute.xlu2 %2820  ;;  %v2687_v47 = vmul.f32 %v7709_v37, %v7708_v16  ;;  %v2879_v59 = vmul.f32 %v7709_v37, %v7627_v21 }
 0x506   : > { %v2823_v48 = vpop.permute.xlu0 %2822  ;;  %v2670_v53 = vadd.f32 %v2633_v1, %v6315_v51 }
 0x508   : > { %v2862_v44 = vadd.f32 %v2825_v38, %v2670_v53 }
 0x50b   : > { %2930 = vrot.lane.b32.xlu1 %v2883_v62, %s4004_s10  ;;  %2732 = vrot.lane.b32.xlu2 %v2688_v30, %s4003_s30  ;;  %v2671_v62 = vadd.f32 %v2635_v19, %v6414_v11  ;;  %v3054_v30 = vadd.f32 %v3017_v14, %v2862_v44  ;;  %v7711_v11 = vld [vmem:[#allocation37_spill] sm:$0xff] }
 0x50c   : > { %v2878_v19 = vmul.f32 %v7710_v52, %v7711_v11 }
 0x50d   : > { %v3023_v24 = vpop.permute.xlu1 %3022  ;;  %v6545_v10 = vpop.permute.xlu2 %2626  ;;  %v2863_v51 = vadd.f32 %v2827_v39, %v2671_v62 }
 0x50e   : > { %v3057_v33 = vadd.f32 %v3023_v24, %v2865_v56  ;;  %v3013_v0 = vpop.permute.xlu0 %3012  ;;  %v2876_v56 = vmul.f32 %v7707_v9, %v7614_v25 }
 0x510   : > { %v3741_v32 = vpack.i.bf16 %v3057_v33, %v3056_v27  ;;  %v7712_v27 = vld [vmem:[#allocation91_spill] sm:$0xff]  ;;  %v7713_v33 = vld [vmem:[#allocation89_spill] sm:$0xff] }
 0x511   : > { %v2683_v25 = vmul.f32 %v7712_v27, %v7621_v36  ;;  %v2685_v21 = vmul.f32 %v7713_v33, %v7606_v15  ;;  %v2875_v36 = vmul.f32 %v7712_v27, %v7667_v29  ;;  %v2877_v15 = vmul.f32 %v7713_v33, %v7650_v12  ;;  %v7719_v27 = vld [vmem:[#allocation67_spill] sm:$0xff] }
 0x512   : > { %3742 = vrot.lane.b32.xlu0 %v3741_v32, %s3988_s4  ;;  %v2669_v32 = vadd.f32 %v2631_v3, %v6313_v50  ;;  %v7714_v50 = vld [vmem:[#allocation46_spill] sm:$0xff]  ;;  %v2667_v12 = vadd.f32 %v6545_v10, %v6288_v13 }
 0x513   : > { %2924 = vrot.lane.b32.xlu2 %v2880_v60, %s4004_s10  ;;  %3737 = vrot.lane.b32.xlu1 %v3736_v5, %s3988_s4  ;;  %v2682_v3 = vmul.f32 %v7714_v50, %v7651_v41  ;;  %v2874_v29 = vmul.f32 %v7714_v50, %v7631_v26  ;;  %v2680_v26 = vmul.f32 %v7672_v61, %v7668_v58 }
 0x514   : > { %v2861_v60 = vadd.f32 %v2823_v48, %v2669_v32 }
 0x515   : > { %v2629_v28 = vpop.permute.xlu1 %2628  ;;  %v2817_v49 = vpop.permute.xlu2 %2816 }
 0x516   : > { %v2819_v18 = vpop.permute.xlu0 %2818  ;;  %v2668_v39 = vadd.f32 %v2629_v28, %v6395_v8 }
 0x517   : > { %v2859_v41 = vadd.f32 %v2819_v18, %v2667_v12  ;;  %v2678_v18 = vmul.f32 %v7635_v40, %v7683_v6 }
 0x518   : > { %v2860_v42 = vadd.f32 %v2821_v35, %v2668_v39 }
 0x51a   : > { %2724 = vrot.lane.b32.xlu0 %v2684_v57, %s4003_s30  ;;  %v3052_v8 = vadd.f32 %v3013_v0, %v2860_v42 }
 0x51b   : > { %2730 = vrot.lane.b32.xlu2 %v2687_v47, %s4003_s30  ;;  %2728 = vrot.lane.b32.xlu1 %v2686_v20, %s4003_s30 }
 0x51d   : > { %v3019_v5 = vpop.permute.xlu1 %3018  ;;  %v2623_v1 = vpop.permute.xlu2 %2622 }
 0x51e   : > { %v3055_v7 = vadd.f32 %v3019_v5, %v2863_v51  ;;  %v3009_v63 = vpop.permute.xlu0 %3008  ;;  %v2665_v58 = vadd.f32 %v2623_v1, %v6368_v31  ;;  %v2679_v31 = vmul.f32 %v7636_v45, %v7661_v4 }
 0x520   : > { %v3746_v46 = vpack.i.bf16 %v3055_v7, %v3054_v30 }
 0x522   : > { %2916 = vrot.lane.b32.xlu0 %v2876_v56, %s4004_s10 }
 0x523   : > { %2922 = vrot.lane.b32.xlu2 %v2879_v59, %s4004_s10  ;;  %2920 = vrot.lane.b32.xlu1 %v2878_v19, %s4004_s10 }
 0x525   : > { %v2625_v38 = vpop.permute.xlu1 %2624  ;;  %v2813_v14 = vpop.permute.xlu2 %2812 }
 0x526   : > { %v2815_v24 = vpop.permute.xlu0 %2814  ;;  %v2666_v0 = vadd.f32 %v2625_v38, %v6286_v34  ;;  %v7715_v34 = vld [vmem:[#allocation98_spill] sm:$0xff] }
 0x527   : > { %v2681_v30 = vmul.f32 %v7715_v34, %v7644_v22  ;;  %v2873_v7 = vmul.f32 %v7715_v34, %v7682_v55  ;;  %v2872_v22 = vmul.f32 %v7672_v61, %v7653_v2  ;;  %v2870_v55 = vmul.f32 %v7635_v40, %v7670_v17  ;;  %v7718_v17 = vld [vmem:[#allocation165_spill] sm:$0xff] }
 0x528   : > { %v2858_v47 = vadd.f32 %v2817_v49, %v2666_v0  ;;  %v2676_v4 = vmul.f32 %v7719_v27, %v7718_v17 }
 0x52a   : > { %2722 = vrot.lane.b32.xlu0 %v2683_v25, %s4003_s30  ;;  %v3050_v62 = vadd.f32 %v3009_v63, %v2858_v47  ;;  %v7720_v25 = vld [vmem:[#allocation34_spill] sm:$0xff] }
 0x52b   : > { %2726 = vrot.lane.b32.xlu1 %v2685_v21, %s4003_s30  ;;  %3747 = vrot.lane.b32.xlu2 %v3746_v46, %s3988_s4 }
 0x52d   : > { %v3015_v53 = vpop.permute.xlu1 %3014  ;;  %v2619_v9 = vpop.permute.xlu2 %2618 }
 0x52e   : > { %v3053_v28 = vadd.f32 %v3015_v53, %v2861_v60  ;;  %v3005_v57 = vpop.permute.xlu0 %3004  ;;  %v2663_v33 = vadd.f32 %v2619_v9, %v7720_v25  ;;  %v7723_v9 = vld [vmem:[#allocation194_spill] sm:$0xff] }
 0x530   : > { %v3751_v16 = vpack.i.bf16 %v3053_v28, %v3052_v8  ;;  %v7721_v8 = vld [vmem:[#allocation188_spill] sm:$0xff] }
 0x532   : > { %2914 = vrot.lane.b32.xlu0 %v2875_v36, %s4004_s10  ;;  %v2868_v36 = vmul.f32 %v7719_v27, %v7723_v9 }
 0x533   : > { %2918 = vrot.lane.b32.xlu1 %v2877_v15, %s4004_s10  ;;  %2720 = vrot.lane.b32.xlu2 %v2682_v3, %s4003_s30  ;;  %v7724_v15 = vld [vmem:[#allocation210_spill] sm:$0xff] }
 0x535   : > { %v2621_v35 = vpop.permute.xlu1 %2620  ;;  %v2809_v48 = vpop.permute.xlu2 %2808 }
 0x536   : > { %v2811_v37 = vpop.permute.xlu0 %2810  ;;  %v2664_v49 = vadd.f32 %v2621_v35, %v6261_v23  ;;  %v2857_v23 = vadd.f32 %v2815_v24, %v2665_v58  ;;  %v7717_v24 = vld [vmem:[#allocation197_spill] sm:$0xff] }
 0x537   : > { %v2871_v40 = vmul.f32 %v7636_v45, %v7717_v24  ;;  %v2855_v32 = vadd.f32 %v2811_v37, %v2663_v33 }
 0x538   : > { %v2856_v63 = vadd.f32 %v2813_v14, %v2664_v49  ;;  %v7716_v14 = vld [vmem:[#allocation71_spill] sm:$0xff]  ;;  %v7727_v49 = vld [vmem:[#allocation208_spill] sm:$0xff] }
 0x539   : > { %v2677_v39 = vmul.f32 %v7716_v14, %v7679_v54 }
 0x53a   : > { %v3048_v6 = vadd.f32 %v3005_v57, %v2856_v63  ;;  %v7722_v57 = vld [vmem:[#allocation178_spill] sm:$0xff] }
 0x53b   : > { %2912 = vrot.lane.b32.xlu2 %v2874_v29, %s4004_s10  ;;  %3752 = vrot.lane.b32.xlu1 %v3751_v16, %s3988_s4  ;;  %v2869_v16 = vmul.f32 %v7716_v14, %v7722_v57 }
 0x53d   : > { %v3011_v52 = vpop.permute.xlu1 %3010  ;;  %v2615_v20 = vpop.permute.xlu2 %2614 }
 0x53e   : > { %v3051_v44 = vadd.f32 %v3011_v52, %v2859_v41  ;;  %v3001_v5 = vpop.permute.xlu0 %3000  ;;  %v2661_v50 = vadd.f32 %v2615_v20, %v7724_v15 }
 0x540   : > { %v3756_v51 = vpack.i.bf16 %v3051_v44, %v3050_v62 }
 0x542   : > { %3757 = vrot.lane.b32.xlu0 %v3756_v51, %s3988_s4 }
 0x543   : > { %2718 = vrot.lane.b32.xlu2 %v2681_v30, %s4003_s30  ;;  %2716 = vrot.lane.b32.xlu1 %v2680_v26, %s4003_s30 }
 0x545   : > { %v2617_v13 = vpop.permute.xlu1 %2616  ;;  %v2805_v10 = vpop.permute.xlu2 %2804 }
 0x546   : > { %v2807_v46 = vpop.permute.xlu0 %2806  ;;  %v2662_v38 = vadd.f32 %v2617_v13, %v6338_v43  ;;  %v7726_v13 = vld [vmem:[#allocation74_spill] sm:$0xff] }
 0x547   : > { %v2853_v3 = vadd.f32 %v2807_v46, %v2661_v50 }
 0x548   : > { %v2854_v21 = vadd.f32 %v2809_v48, %v2662_v38 }
 0x54a   : > { %2712 = vrot.lane.b32.xlu0 %v2678_v18, %s4003_s30  ;;  %v3046_v54 = vadd.f32 %v3001_v5, %v2854_v21  ;;  %v7725_v5 = vld [vmem:[#allocation48_spill] sm:$0xff] }
 0x54b   : > { %2910 = vrot.lane.b32.xlu2 %v2873_v7, %s4004_s10  ;;  %2908 = vrot.lane.b32.xlu1 %v2872_v22, %s4004_s10  ;;  %v7728_v22 = vld [vmem:[#allocation180_spill] sm:$0xff] }
 0x54c   : > { %v7729_v21 = vld [vmem:[#allocation80_spill] sm:$0xff] }
 0x54d   : > { %v3007_v56 = vpop.permute.xlu1 %3006  ;;  %v2999_v59 = vpop.permute.xlu2 %2998 }
 0x54e   : > { %v3049_v11 = vadd.f32 %v3007_v56, %v2857_v23  ;;  %v2545_v2 = vpop.permute.xlu0 %2544  ;;  %v3045_v37 = vadd.f32 %v2999_v59, %v2853_v3 }
 0x54f   : > { %v2578_v58 = vadd.f32 %v2545_v2, %v7728_v22 }
 0x550   : > { %v3761_v19 = vpack.i.bf16 %v3049_v11, %v3048_v6 }
 0x552   : > { %2904 = vrot.lane.b32.xlu0 %v2870_v55, %s4004_s10 }
 0x553   : > { %2714 = vrot.lane.b32.xlu1 %v2679_v31, %s4003_s30  ;;  %3762 = vrot.lane.b32.xlu2 %v3761_v19, %s3988_s4 }
 0x555   : > { %v2613_v61 = vpop.permute.xlu1 %2612  ;;  %v2737_v1 = vpop.permute.xlu2 %2736 }
 0x556   : > { %v2739_v60 = vpop.permute.xlu0 %2738  ;;  %v2660_v45 = vadd.f32 %v2613_v61, %v7721_v8  ;;  %v2770_v46 = vadd.f32 %v2737_v1, %v2578_v58 }
 0x558   : > { %v2852_v35 = vadd.f32 %v2805_v10, %v2660_v45 }
 0x55a   : > { %2710 = vrot.lane.b32.xlu0 %v2677_v39, %s4003_s30 }
 0x55b   : > { %2906 = vrot.lane.b32.xlu1 %v2871_v40, %s4004_s10  ;;  %2708 = vrot.lane.b32.xlu2 %v2676_v4, %s4003_s30 }
 0x55d   : > { %v3003_v43 = vpop.permute.xlu1 %3002  ;;  %v2543_v42 = vpop.permute.xlu2 %2542 }
 0x55e   : > { %v3047_v53 = vadd.f32 %v3003_v43, %v2855_v32  ;;  %v2929_v12 = vpop.permute.xlu0 %2928  ;;  %v2577_v18 = vadd.f32 %v2543_v42, %v7727_v49  ;;  %v7730_v42 = vld [vmem:[#allocation82_spill] sm:$0xff] }
 0x55f   : > { %v2962_v31 = vadd.f32 %v2929_v12, %v2770_v46 }
 0x560   : > { %v3766_v28 = vpack.i.bf16 %v3047_v53, %v3046_v54 }
 0x562   : > { %2902 = vrot.lane.b32.xlu0 %v2869_v16, %s4004_s10 }
 0x563   : > { %2900 = vrot.lane.b32.xlu2 %v2868_v36, %s4004_s10  ;;  %3767 = vrot.lane.b32.xlu1 %v3766_v28, %s3988_s4 }
 0x565   : > { %v2997_v48 = vpop.permute.xlu1 %2996  ;;  %v2733_v0 = vpop.permute.xlu2 %2732 }
 0x566   : > { %v3044_v29 = vadd.f32 %v2997_v48, %v2852_v35  ;;  %v2735_v62 = vpop.permute.xlu0 %2734  ;;  %v7731_v48 = vld [vmem:[#allocation84_spill] sm:$0xff] }
 0x567   : > { %v2769_v63 = vadd.f32 %v2735_v62, %v2577_v18 }
 0x568   : > { %v3771_v47 = vpack.i.bf16 %v3045_v37, %v3044_v29  ;;  %v7732_v37 = vld [vmem:[#allocation90_spill] sm:$0xff] }
 0x56b   : > { %3772 = vrot.lane.b32.xlu1 %v3771_v47, %s3988_s4  ;;  %s3514_s4 = sshll.u32 %s3972_s24, 7 }
 0x56c   : > { %s3307_s8 = scalar_lea.hbm %s6816_s6, %s3514_s4 }
 0x56d   : > { %v2547_v41 = vpop.permute.xlu1 %2546  ;;  %v2925_v52 = vpop.permute.xlu2 %2924  ;;  %s3310_s14 = sshll.u32 %s3307_s8, 4  ;;  %s3311_s14 = int_to_ptr.hbm [resolvable:$true] %s3310_s14 }
 0x56e   : > { %v2927_v51 = vpop.permute.xlu0 %2926  ;;  %v2579_v10 = vadd.f32 %v2547_v41, %v7726_v13  ;;  %v7734_v13 = vld [vmem:[#allocation81_spill] sm:$0xff]  ;;  %s3904_s24 = sshra.s32 %s3311_s14, 4  ;;  %s3905_s24 = int_to_ptr.hbm [resolvable:$true] %s3904_s24 }
 0x56f   : > { %v2961_v59 = vadd.f32 %v2927_v51, %v2769_v63  ;;  %s3906_s16 = scalar_lea.hbm %s3905_s24, 128  ;;  %p3911_p12 = scmp.lt.s32.totalorder %s3905_s24, %s6816_s6 }
 0x570   : > { %v2771_v23 = vadd.f32 %v2739_v60, %v2579_v10  ;;  %p3907_p4 = scmp.ne.s32.totalorder %s3905_s24, %s3906_s16  ;;  %p3912_p13 = scmp.lt.s32.totalorder %s3910_s21, %s3906_s16 }
 0x572   : > { %p3908_p8 = pnand %p3907_p4, %p4117_p5  ;;  %p3913_p0 = por %p3912_p13, %p3911_p12 }
 0x574   : > { %p3909_p10 = pneg %p3908_p8 }
 0x575   : > { %v2541_v20 = vpop.permute.xlu1 %2540  ;;  %v2731_v44 = vpop.permute.xlu2 %2730 }
 0x576   : > { %v2576_v34 = vadd.f32 %v2541_v20, %v7725_v5  ;;  %v2767_v32 = vadd.f32 %v2731_v44, %v7729_v21  ;;  %v7737_v21 = vld [vmem:[#allocation69_spill] sm:$0xff]  ;;  %p3914_p3 = pnand %p3913_p0, %p3909_p10 }
 0x578   : > { %v2768_v7 = vadd.f32 %v2733_v0, %v2576_v34 }
 0x57a   : > { %v2960_v6 = vadd.f32 %v2925_v52, %v2768_v7 }
 0x57d   : > { %v2931_v30 = vpop.permute.xlu1 %2930  ;;  %v2923_v26 = vpop.permute.xlu2 %2922 }
 0x57e   : > { %v2963_v61 = vadd.f32 %v2931_v30, %v2771_v23  ;;  %v2959_v53 = vadd.f32 %v2923_v26, %v2767_v32  ;;  %v7733_v30 = vld [vmem:[#allocation75_spill] sm:$0xff] }
 0x584   : > { %v3743_v56 = vpop.permute.xlu0 %3742 }
 0x585   : > { %v3745_v11 = vunpack.i.h.bf16 %v3743_v56  ;;  %v3744_v19 = vunpack.i.l.bf16 %v3743_v56  ;;  %v3738_v55 = vpop.permute.xlu1 %3737  ;;  %v3748_v39 = vpop.permute.xlu2 %3747 }
 0x586   : > { %v3740_v38 = vunpack.i.h.bf16 %v3738_v55  ;;  %v3739_v14 = vunpack.i.l.bf16 %v3738_v55  ;;  %v3750_v43 = vunpack.i.h.bf16 %v3748_v39  ;;  %v3749_v8 = vunpack.i.l.bf16 %v3748_v39  ;;  %v7736_v55 = vld [vmem:[#allocation93_spill] sm:$0xff] }
 0x587   : > { %v3136_v24 = vsel %vm1730_vm0, %v2960_v6, %v3744_v19  ;;  %v3137_v40 = vsel %vm1730_vm0, %v2961_v59, %v3745_v11  ;;  %v7735_v6 = vld [vmem:[#allocation87_spill] sm:$0xff] }
 0x588   : > { %v3138_v2 = vsel %vm1730_vm0, %v2962_v31, %v3739_v14  ;;  %v3139_v1 = vsel %vm1730_vm0, %v2963_v61, %v3740_v38  ;;  %v3146_v17 = vpack.c.bf16 %v3137_v40, %v3136_v24  ;;  %v3135_v16 = vsel %vm1730_vm0, %v2959_v53, %v3750_v43  ;;  %v7738_v43 = vld [vmem:[#allocation72_spill] sm:$0xff] }
 0x589   : > { %v3147_v27 = vpack.c.bf16 %v3139_v1, %v3138_v2 }
 0x58b   : > { %3148 = vmatpush.bf16.msra.mxu1 %v3147_v27  ;;  %3523 = vmatpush.bf16.msra.mxu3 %v3147_v27 }
 0x58c   : > { %v2725_v25 = vpop.permute.xlu0 %2724 }
 0x58d   : > { %v2729_v4 = vpop.permute.xlu1 %2728  ;;  %v2721_v33 = vpop.permute.xlu2 %2720  ;;  %v2764_v0 = vadd.f32 %v2725_v25, %v7731_v48 }
 0x58e   : > { %v2766_v60 = vadd.f32 %v2729_v4, %v7730_v42  ;;  %v2762_v26 = vadd.f32 %v2721_v33, %v7733_v30  ;;  %v3798_v30 = vld [vmem:[#allocation7 + $0x18] sm:$0xff] }
 0x58f   : > { %3149 = vmatpush.bf16.msra.mxu1 %v3146_v17  ;;  %3524 = vmatpush.bf16.msra.mxu3 %v3146_v17 }
 0x594   : > { %v2917_v28 = vpop.permute.xlu0 %2916 }
 0x595   : > { %v2921_v54 = vpop.permute.xlu1 %2920  ;;  %v2913_v36 = vpop.permute.xlu2 %2912  ;;  %v2956_v41 = vadd.f32 %v2917_v28, %v2764_v0 }
 0x596   : > { %v2958_v45 = vadd.f32 %v2921_v54, %v2766_v60  ;;  %v2954_v18 = vadd.f32 %v2913_v36, %v2762_v26  ;;  %v3799_v26 = vld [vmem:[#allocation7 + $0x38] sm:$0xff] }
 0x598   : > { %v3134_v57 = vsel %vm1730_vm0, %v2958_v45, %v3749_v8 }
 0x599   : > { %v3145_v9 = vpack.c.bf16 %v3135_v16, %v3134_v57 }
 0x59b   : > { %3150 = vmatpush.bf16.msra.mxu1 %v3145_v9  ;;  %3525 = vmatpush.bf16.msra.mxu3 %v3145_v9 }
 0x59c   : > { %v2723_v50 = vpop.permute.xlu0 %2722 }
 0x59d   : > { %v2727_v15 = vpop.permute.xlu1 %2726  ;;  %v2719_v3 = vpop.permute.xlu2 %2718  ;;  %v2763_v10 = vadd.f32 %v2723_v50, %v7734_v13 }
 0x59e   : > { %v2765_v29 = vadd.f32 %v2727_v15, %v7732_v37  ;;  %v2761_v11 = vadd.f32 %v2719_v3, %v7735_v6  ;;  %v7739_v15 = vld [vmem:[#allocation77_spill] sm:$0xff]  ;;  %v7740_v3 = vld [vmem:[#allocation78_spill] sm:$0xff] }
 0x5a4   : > { %v2915_v12 = vpop.permute.xlu0 %2914 }
 0x5a5   : > { %v2919_v35 = vpop.permute.xlu1 %2918  ;;  %v2911_v44 = vpop.permute.xlu2 %2910  ;;  %v2955_v7 = vadd.f32 %v2915_v12, %v2763_v10  ;;  %v7741_v10 = vld [vmem:[#allocation79_spill] sm:$0xff] }
 0x5a6   : > { %v2957_v52 = vadd.f32 %v2919_v35, %v2765_v29  ;;  %v2953_v14 = vadd.f32 %v2911_v44, %v2761_v11  ;;  %v3794_v44 = vld [vmem:[#allocation7 + $0x8] sm:$0xff]  ;;  %v7745_v11 = vld [vmem:[#allocation205_spill] sm:$0xff] }
 0x5ad   : > { %v3753_v47 = vpop.permute.xlu1 %3752  ;;  %v3763_v59 = vpop.permute.xlu2 %3762 }
 0x5ae   : > { %v3755_v62 = vunpack.i.h.bf16 %v3753_v47  ;;  %v3754_v20 = vunpack.i.l.bf16 %v3753_v47  ;;  %v3765_v19 = vunpack.i.h.bf16 %v3763_v59  ;;  %v3764_v39 = vunpack.i.l.bf16 %v3763_v59 }
 0x5b0   : > { %v3132_v51 = vsel %vm1730_vm0, %v2956_v41, %v3754_v20  ;;  %v3133_v5 = vsel %vm1730_vm0, %v2957_v52, %v3755_v62  ;;  %v3129_v2 = vsel %vm1730_vm0, %v2953_v14, %v3765_v19  ;;  %v3792_v62 = vld [vmem:[#allocation7] sm:$0xff] }
 0x5b1   : > { %v3144_v34 = vpack.c.bf16 %v3133_v5, %v3132_v51  ;;  %v3793_v20 = vld [vmem:[#allocation7 + $0x20] sm:$0xff]  ;;  %v3795_v51 = vld [vmem:[#allocation7 + $0x28] sm:$0xff]  ;;  %v3796_v5 = vld [vmem:[#allocation7 + $0x10] sm:$0xff] }
 0x5b2   : > { %v7747_v14 = vld [vmem:[#allocation55_spill] sm:$0xff] }
 0x5b3   : > { %3151 = vmatpush.bf16.msra.mxu1 %v3144_v34  ;;  %3526 = vmatpush.bf16.msra.mxu3 %v3144_v34  ;;  %v3797_v34 = vld [vmem:[#allocation7 + $0x30] sm:$0xff] }
 0x5b4   : > { %v3758_v49 = vpop.permute.xlu0 %3757 }
 0x5b5   : > { %v3760_v22 = vunpack.i.h.bf16 %v3758_v49  ;;  %v3759_v58 = vunpack.i.l.bf16 %v3758_v49  ;;  %v2717_v63 = vpop.permute.xlu1 %2716  ;;  %v2709_v25 = vpop.permute.xlu2 %2708 }
 0x5b6   : > { %v2760_v31 = vadd.f32 %v2717_v63, %v7736_v55  ;;  %v2756_v50 = vadd.f32 %v2709_v25, %v7739_v15  ;;  %v7743_v63 = vld [vmem:[#allocation51_spill] sm:$0xff]  ;;  %v7750_v25 = vld [vmem:[#allocation64_spill] sm:$0xff] }
 0x5b7   : > { %v3130_v46 = vsel %vm1730_vm0, %v2954_v18, %v3759_v58  ;;  %v3131_v23 = vsel %vm1730_vm0, %v2955_v7, %v3760_v22  ;;  %v7742_v7 = vld [vmem:[#allocation66_spill] sm:$0xff] }
 0x5b8   : > { %v3143_v56 = vpack.c.bf16 %v3131_v23, %v3130_v46 }
 0x5ba   : > { %3152 = vmatpush.bf16.msra.mxu1 %v3143_v56  ;;  %3527 = vmatpush.bf16.msra.mxu3 %v3143_v56  ;;  %v7744_v56 = vld [vmem:[#allocation61_spill] sm:$0xff] }
 0x5bc   : > { %v2713_v61 = vpop.permute.xlu0 %2712 }
 0x5bd   : > { %v2909_v38 = vpop.permute.xlu1 %2908  ;;  %v2758_v32 = vadd.f32 %v2713_v61, %v7737_v21  ;;  %v2901_v9 = vpop.permute.xlu2 %2900 }
 0x5be   : > { %v2952_v24 = vadd.f32 %v2909_v38, %v2760_v31  ;;  %v2948_v0 = vadd.f32 %v2901_v9, %v2756_v50  ;;  %v7746_v31 = vld [vmem:[#allocation31_spill] sm:$0xff] }
 0x5c0   : > { %v3128_v40 = vsel %vm1730_vm0, %v2952_v24, %v3764_v39 }
 0x5c1   : > { %v3142_v1 = vpack.c.bf16 %v3129_v2, %v3128_v40  ;;  %v7748_v40 = vld [vmem:[#allocation68_spill] sm:$0xff] }
 0x5c3   : > { %3153 = vmatpush.bf16.msra.mxu1 %v3142_v1  ;;  %3528 = vmatpush.bf16.msra.mxu3 %v3142_v1 }
 0x5c4   : > { %v2905_v27 = vpop.permute.xlu0 %2904 }
 0x5c5   : > { %v2715_v17 = vpop.permute.xlu1 %2714  ;;  %v2950_v54 = vadd.f32 %v2905_v27, %v2758_v32  ;;  %v7751_v32 = vld [vmem:[#allocation60_spill] sm:$0xff] }
 0x5c6   : > { %v2759_v42 = vadd.f32 %v2715_v17, %v7738_v43  ;;  %v7749_v17 = vld [vmem:[#allocation49_spill] sm:$0xff] }
 0x5cc   : > { %v2711_v33 = vpop.permute.xlu0 %2710 }
 0x5cd   : > { %v2907_v4 = vpop.permute.xlu1 %2906  ;;  %v2757_v35 = vadd.f32 %v2711_v33, %v7740_v3  ;;  %v7756_v3 = vld [vmem:[#allocation63_spill] sm:$0xff] }
 0x5ce   : > { %v2951_v53 = vadd.f32 %v2907_v4, %v2759_v42 }
 0x5d4   : > { %v2903_v36 = vpop.permute.xlu0 %2902 }
 0x5d5   : > { %v3768_v60 = vpop.permute.xlu1 %3767  ;;  %v2949_v37 = vadd.f32 %v2903_v36, %v2757_v35  ;;  %v7755_v36 = vld [vmem:[#allocation45_spill] sm:$0xff] }
 0x5d6   : > { %v3770_v8 = vunpack.i.h.bf16 %v3768_v60  ;;  %v3769_v45 = vunpack.i.l.bf16 %v3768_v60  ;;  %v7752_v60 = vld [vmem:[#allocation40_spill] sm:$0xff] }
 0x5d8   : > { %v3126_v28 = vsel %vm1730_vm0, %v2950_v54, %v3769_v45  ;;  %v3127_v57 = vsel %vm1730_vm0, %v2951_v53, %v3770_v8  ;;  %v7753_v8 = vld [vmem:[#allocation58_spill] sm:$0xff] }
 0x5d9   : > { %v3141_v16 = vpack.c.bf16 %v3127_v57, %v3126_v28  ;;  %v7754_v57 = vld [vmem:[#allocation73_spill] sm:$0xff] }
 0x5db   : > { %3154 = vmatpush.bf16.msra.mxu1 %v3141_v16  ;;  %3529 = vmatpush.bf16.msra.mxu3 %v3141_v16 }
 0x5dd   : > { %v3773_v48 = vpop.permute.xlu1 %3772 }
 0x5de   : > { %v3775_v29 = vunpack.i.h.bf16 %v3773_v48  ;;  %v3774_v12 = vunpack.i.l.bf16 %v3773_v48 }
 0x5e0   : > { %v3124_v47 = vsel %vm1730_vm0, %v2948_v0, %v3774_v12  ;;  %v3125_v41 = vsel %vm1730_vm0, %v2949_v37, %v3775_v29 }
 0x5e1   : > { %v3140_v52 = vpack.c.bf16 %v3125_v41, %v3124_v47 }
 0x5e3   : > { %3155 = vmatpush.bf16.msra.mxu1 %v3140_v52  ;;  %3530 = vmatpush.bf16.msra.mxu3 %v3140_v52 }
 0x5e6   : > { %3156 = vmatmul.bf16.vlgmr.msra.gmra.mxu1 %v3792_v62  ;;  %3176 = vmatmul.bf16.vlgmr.msra.gmra.mxu3 %v3793_v20 }
 0x5f6   : > { %3161 = vmatmul.bf16.gmra.mxu1 %v3794_v44  ;;  %3181 = vmatmul.bf16.gmra.mxu3 %v3795_v51 }
 0x606   : > { %3166 = vmatmul.bf16.gmra.mxu1 %v3796_v5  ;;  %3186 = vmatmul.bf16.gmra.mxu3 %v3797_v34 }
 0x616   : > { %3171 = vmatmul.bf16.gmra.mxu1 %v3798_v30  ;;  %3191 = vmatmul.bf16.gmra.mxu3 %v3799_v26 }
 0x663   : > { %v3157_v13 = vpop.f32.mrf.mxu1 }
 0x664   : > { %v3158_v49 = vadd.f32 %v3157_v13, %v7741_v10 }
 0x666   : > { %3197 = vst.msk [vmem:[%s5657_s27] sm:$0xff] %vm1730_vm0, %v3158_v49  ;;  %3229 = vrot.lane.b32.xlu2 %v3158_v49, %s4004_s10 }
 0x669   : > { %v3177_v18 = vpop.f32.mrf.mxu3 }
 0x66a   : > { %v3178_v22 = vadd.f32 %v3177_v18, %v7742_v7 }
 0x66b   : > { %v3159_v58 = vpop.f32.mrf.mxu1 }
 0x66c   : > { %3205 = vst.msk [vmem:[%s5657_s27 + $0x40] sm:$0xff] %vm1730_vm0, %v3178_v22  ;;  %v3160_v46 = vadd.f32 %v3159_v58, %v7743_v63 }
 0x66e   : > { %3198 = vst.msk [vmem:[%s5657_s27 + $0x8] sm:$0xff] %vm1730_vm0, %v3160_v46  ;;  %3231 = vrot.lane.b32.xlu0 %v3160_v46, %s4004_s10 }
 0x671   : > { %v3179_v23 = vpop.f32.mrf.mxu3 }
 0x672   : > { %v3180_v59 = vadd.f32 %v3179_v23, %v7744_v56 }
 0x673   : > { %v3162_v6 = vpop.f32.mrf.mxu1 }
 0x674   : > { %3206 = vst.msk [vmem:[%s5657_s27 + $0x48] sm:$0xff] %vm1730_vm0, %v3180_v59  ;;  %v3163_v19 = vadd.f32 %v3162_v6, %v7745_v11 }
 0x676   : > { %3199 = vst.msk [vmem:[%s5657_s27 + $0x10] sm:$0xff] %vm1730_vm0, %v3163_v19  ;;  %3233 = vrot.lane.b32.xlu1 %v3163_v19, %s4004_s10 }
 0x679   : > { %v3182_v55 = vpop.f32.mrf.mxu3 }
 0x67a   : > { %v3183_v61 = vadd.f32 %v3182_v55, %v7746_v31 }
 0x67b   : > { %v3164_v38 = vpop.f32.mrf.mxu1 }
 0x67c   : > { %3207 = vst.msk [vmem:[%s5657_s27 + $0x50] sm:$0xff] %vm1730_vm0, %v3183_v61  ;;  %v3165_v39 = vadd.f32 %v3164_v38, %v7747_v14 }
 0x67e   : > { %3200 = vst.msk [vmem:[%s5657_s27 + $0x18] sm:$0xff] %vm1730_vm0, %v3165_v39  ;;  %3235 = vrot.lane.b32.xlu2 %v3165_v39, %s4004_s10 }
 0x681   : > { %v3184_v24 = vpop.f32.mrf.mxu3 }
 0x682   : > { %v3185_v2 = vadd.f32 %v3184_v24, %v7748_v40 }
 0x683   : > { %v3167_v1 = vpop.f32.mrf.mxu1 }
 0x684   : > { %3208 = vst.msk [vmem:[%s5657_s27 + $0x58] sm:$0xff] %vm1730_vm0, %v3185_v2  ;;  %v3168_v27 = vadd.f32 %v3167_v1, %v7749_v17 }
 0x686   : > { %3201 = vst.msk [vmem:[%s5657_s27 + $0x20] sm:$0xff] %vm1730_vm0, %v3168_v27  ;;  %3237 = vrot.lane.b32.xlu0 %v3168_v27, %s4004_s10 }
 0x689   : > { %v3187_v4 = vpop.f32.mrf.mxu3 }
 0x68a   : > { %v3188_v33 = vadd.f32 %v3187_v4, %v7750_v25 }
 0x68b   : > { %v3169_v21 = vpop.f32.mrf.mxu1 }
 0x68c   : > { %3209 = vst.msk [vmem:[%s5657_s27 + $0x60] sm:$0xff] %vm1730_vm0, %v3188_v33  ;;  %v3170_v43 = vadd.f32 %v3169_v21, %v7751_v32 }
 0x68e   : > { %3202 = vst.msk [vmem:[%s5657_s27 + $0x28] sm:$0xff] %vm1730_vm0, %v3170_v43  ;;  %3239 = vrot.lane.b32.xlu1 %v3170_v43, %s4004_s10 }
 0x691   : > { %v3189_v42 = vpop.f32.mrf.mxu3 }
 0x692   : > { %v3190_v54 = vadd.f32 %v3189_v42, %v7752_v60 }
 0x693   : > { %v3172_v53 = vpop.f32.mrf.mxu1 }
 0x694   : > { %3210 = vst.msk [vmem:[%s5657_s27 + $0x68] sm:$0xff] %vm1730_vm0, %v3190_v54  ;;  %v3173_v45 = vadd.f32 %v3172_v53, %v7753_v8 }
 0x696   : > { %3203 = vst.msk [vmem:[%s5657_s27 + $0x30] sm:$0xff] %vm1730_vm0, %v3173_v45  ;;  %3245 = vrot.lane.b32.xlu1 %v3178_v22, %s4004_s10  ;;  %3241 = vrot.lane.b32.xlu2 %v3173_v45, %s4004_s10 }
 0x699   : > { %v3192_v28 = vpop.f32.mrf.mxu3 }
 0x69a   : > { %v3193_v16 = vadd.f32 %v3192_v28, %v7754_v57 }
 0x69b   : > { %v3174_v9 = vpop.f32.mrf.mxu1 }
 0x69c   : > { %3211 = vst.msk [vmem:[%s5657_s27 + $0x70] sm:$0xff] %vm1730_vm0, %v3193_v16  ;;  %v3175_v15 = vadd.f32 %v3174_v9, %v7755_v36 }
 0x69e   : > { %3204 = vst.msk [vmem:[%s5657_s27 + $0x38] sm:$0xff] %vm1730_vm0, %v3175_v15  ;;  %3251 = vrot.lane.b32.xlu1 %v3185_v2, %s4004_s10  ;;  %3243 = vrot.lane.b32.xlu0 %v3175_v15, %s4004_s10 }
 0x69f   : > { %3247 = vrot.lane.b32.xlu2 %v3180_v59, %s4004_s10 }
 0x6a1   : > { %v3194_v50 = vpop.f32.mrf.mxu3 }
 0x6a2   : > { %v3195_v35 = vadd.f32 %v3194_v50, %v7756_v3 }
 0x6a4   : > { %3212 = vst.msk [vmem:[%s5657_s27 + $0x78] sm:$0xff] %vm1730_vm0, %v3195_v35 }
 0x6a6   : > { %3257 = vrot.lane.b32.xlu1 %v3193_v16, %s4004_s10  ;;  %3249 = vrot.lane.b32.xlu0 %v3183_v61, %s4004_s10 }
 0x6a7   : > { %3253 = vrot.lane.b32.xlu2 %v3188_v33, %s4004_s10 }
 0x6ae   : > { %3255 = vrot.lane.b32.xlu0 %v3190_v54, %s4004_s10 }
 0x6af   : > { %3259 = vrot.lane.b32.xlu2 %v3195_v35, %s4004_s10 }
 0x6c0   : > { %v3230_v48 = vpop.permute.xlu2 %3229 }
 0x6c1   : > { %3278 = vst.msk [vmem:[%s5657_s27] sm:$0xff] %vm3277_vm2, %v3230_v48 }
 0x6d8   : > { %v3236_v0 = vpop.permute.xlu2 %3235 }
 0x6d9   : > { %3281 = vst.msk [vmem:[%s5657_s27 + $0x18] sm:$0xff] %vm3277_vm2, %v3236_v0 }
 0x6e0   : > { %v3232_v37 = vpop.permute.xlu0 %3231 }
 0x6e1   : > { %3279 = vst.msk [vmem:[%s5657_s27 + $0x8] sm:$0xff] %vm3277_vm2, %v3232_v37 }
 0x6e8   : > { %v3234_v29 = vpop.permute.xlu1 %3233 }
 0x6e9   : > { %3280 = vst.msk [vmem:[%s5657_s27 + $0x10] sm:$0xff] %vm3277_vm2, %v3234_v29 }
 0x6f0   : > { %v3242_v12 = vpop.permute.xlu2 %3241 }
 0x6f1   : > { %3284 = vst.msk [vmem:[%s5657_s27 + $0x30] sm:$0xff] %vm3277_vm2, %v3242_v12 }
 0x6f8   : > { %v3238_v47 = vpop.permute.xlu0 %3237 }
 0x6f9   : > { %3282 = vst.msk [vmem:[%s5657_s27 + $0x20] sm:$0xff] %vm3277_vm2, %v3238_v47  ;;  %v3248_v41 = vpop.permute.xlu2 %3247 }
 0x6fa   : > { %3287 = vst.msk [vmem:[%s5657_s27 + $0x48] sm:$0xff] %vm3277_vm2, %v3248_v41 }
 0x700   : > { %v3240_v52 = vpop.permute.xlu1 %3239 }
 0x701   : > { %3283 = vst.msk [vmem:[%s5657_s27 + $0x28] sm:$0xff] %vm3277_vm2, %v3240_v52  ;;  %v3254_v62 = vpop.permute.xlu2 %3253 }
 0x702   : > { %3290 = vst.msk [vmem:[%s5657_s27 + $0x60] sm:$0xff] %vm3277_vm2, %v3254_v62 }
 0x708   : > { %v3246_v20 = vpop.permute.xlu1 %3245 }
 0x709   : > { %3286 = vst.msk [vmem:[%s5657_s27 + $0x40] sm:$0xff] %vm3277_vm2, %v3246_v20  ;;  %v3260_v44 = vpop.permute.xlu2 %3259 }
 0x70a   : > { %3293 = vst.msk [vmem:[%s5657_s27 + $0x78] sm:$0xff] %vm3277_vm2, %v3260_v44 }
 0x710   : > { %v3252_v51 = vpop.permute.xlu1 %3251  ;;  %v3244_v5 = vpop.permute.xlu0 %3243 }
 0x711   : > { %3289 = vst.msk [vmem:[%s5657_s27 + $0x58] sm:$0xff] %vm3277_vm2, %v3252_v51 }
 0x712   : > { %3285 = vst.msk [vmem:[%s5657_s27 + $0x38] sm:$0xff] %vm3277_vm2, %v3244_v5 }
 0x718   : > { %v3258_v34 = vpop.permute.xlu1 %3257  ;;  %v3250_v30 = vpop.permute.xlu0 %3249 }
 0x719   : > { %3292 = vst.msk [vmem:[%s5657_s27 + $0x70] sm:$0xff] %vm3277_vm2, %v3258_v34 }
 0x71a   : > { %3288 = vst.msk [vmem:[%s5657_s27 + $0x50] sm:$0xff] %vm3277_vm2, %v3250_v30 }
 0x720   : > { %v3256_v26 = vpop.permute.xlu0 %3255 }
 0x721   : > { %3291 = vst.msk [vmem:[%s5657_s27 + $0x68] sm:$0xff] %vm3277_vm2, %v3256_v26 }
 0x722   : > { %3917 = shalt.err (!%p3914_p3)
}
 0x723   : > { %s4005_s17 = smov 128   ;;  %s4006_s29 = smov 8  }
 0x724   : > { %3539 = dma.vmem_to_hbm [thread:$0]  (%p4117_p5), %s3309_s12, 2048, %s3311_s14, %s3295_s19, %s4005_s17, %s4005_s17, %s4006_s29  }
 0x725 PF: > { %s7757_s20 = sld [smem:[#allocation13_spill]]  ;;  %p3553_p7 = pnand %p3452_p11, %p4087_p6 }
 0x727   : > { %p3554_p9 = pneg %p3553_p7 }
 0x72b   : > { %s3325_s27 = sand.u32 1, %s7757_s20  }
 0x72c   : > { %s3326_s23 = scalar_lea.sflag [#allocation4], %s3325_s27 }
 0x72d   : > { %3955 = dma.done.wait (%p3554_p9), %s3326_s23, 2048  }
 0x72e   : > { %3957 = vsyncadd (%p3554_p9), %s3326_s23, 4294965248  ;;  %s25_s26 = sadd.s32 1, %s3980_s26   ;;  %s7759_s30 = sld [smem:[#allocation14_spill]] }
 0x72f   : > { %p22_p2 = scmp.ge.s32.totalorder %s25_s26, 4   ;;  %s7760_s23 = sld [smem:[#allocation18_spill]] }
 0x730   : > { %s7761_s24 = sld [smem:[#allocation15_spill]]  ;;  %s7763_s21 = smov %s3964_s22 }
 0x731   : > { %s7762_s25 = sld [smem:[#allocation17_spill]]  ;;  %24 = sbr.rel (!%p22_p2) target bundleno = 10 (0xa), region = 109 }
 0x734   : > { %s7764_s22 = smov %s7759_s30 }
 0x736   :  { %3332 = vsyncpa [#allocation3], 1 }
 0x737   :  { %3334 = vsyncpa [#allocation3 + $0x1], 1 }
 0x738   :  { %3335 = vsyncpa [#allocation6], 1 }
 0x739   :  { %3337 = vsyncpa [#allocation6 + $0x1], 1 }
 0x73a   :  { %3338 = vsyncpa [#allocation4], 1 }
 0x73b   :  { %3340 = vsyncpa [#allocation4 + $0x1], 1 }

</bundles_post_ra>
